<compile_context>
chip_gen: v6e
topology: v6e:2x2x1
jax: 0.10.0
libtpu: 0.0.40
codegen_flags: <defaults>
</compile_context>

<pallas_src>
import math

import jax
import jax.numpy as jnp
from jax.experimental import pallas as pl
from jax.experimental.pallas import tpu as pltpu

# ----------------------------- small config ---------------------------------
B = 2            # batch
S = 8            # sequence length
H = 32           # hidden size per encoder   (torch model: 768)
NH = 2           # attention heads
HD = H // NH     # head dim
F = 64           # FFN intermediate size
LAYERS = 2       # encoder layers per model
VOCAB = 100
NENC = 2         # two encoders: code + markdown

MXU_DTYPE = jnp.bfloat16   # matmul-operand dtype (fp32 accumulation kept)


def _mxu(x):
    """Cast to the MXU operand dtype (bf16); accumulation stays fp32."""
    return x.astype(MXU_DTYPE)


def _layernorm(x, g, b):
    mu = jnp.mean(x, axis=-1, keepdims=True)
    var = jnp.mean(jnp.square(x - mu), axis=-1, keepdims=True)
    return (x - mu) * jax.lax.rsqrt(var + 1e-12) * g + b


# --------------------------- fused model kernel ------------------------------

def _model_kernel(x_ref, bias_ref, eg_ref, eb_ref,
                  wqkv_ref, bqkv_ref, wo_ref, bo_ref,
                  ln1g_ref, ln1b_ref, w1_ref, b1_ref, w2_ref, b2_ref,
                  ln2g_ref, ln2b_ref,
                  topw_ref, topb_ref, outw_ref, outb_ref,
                  o_ref):
    scale = 1.0 / math.sqrt(HD)
    cls_tokens = []
    for e in range(NENC):                       # unrolled: code / markdown
        x = x_ref[e]                            # [B*S, H] fp32 (emb + pos)
        bias = bias_ref[e]                      # [B, S]   fp32 additive mask
        x = _layernorm(x, eg_ref[e], eb_ref[e])
        for l in range(LAYERS):                 # unrolled; weights stay in VMEM
            # fused QKV projection: single [H, 3H] matmul
            qkv = jnp.dot(_mxu(x), _mxu(wqkv_ref[e, l]),
                          preferred_element_type=jnp.float32) + bqkv_ref[e, l]
            q = qkv[:, 0 * H:1 * H].reshape(B, S, H)
            k = qkv[:, 1 * H:2 * H].reshape(B, S, H)
            v = qkv[:, 2 * H:3 * H].reshape(B, S, H)

            ctx_heads = []
            for h in range(NH):                 # unrolled heads
                sl = slice(h * HD, (h + 1) * HD)
                qh, kh, vh = q[:, :, sl], k[:, :, sl], v[:, :, sl]
                s = jnp.einsum('bqd,bkd->bqk', _mxu(qh), _mxu(kh),
                               preferred_element_type=jnp.float32) * scale
                s = s + bias[:, None, :]        # fp32 masking
                s = s - jnp.max(s, axis=-1, keepdims=True)
                p = jnp.exp(s)
                p = p * pl.reciprocal(jnp.sum(p, axis=-1, keepdims=True),
                                      approx=True)
                ctx_heads.append(
                    jnp.einsum('bqk,bkd->bqd', _mxu(p), _mxu(vh),
                               preferred_element_type=jnp.float32))
            ctx = jnp.concatenate(ctx_heads, axis=-1).reshape(B * S, H)

            attn_out = jnp.dot(_mxu(ctx), _mxu(wo_ref[e, l]),
                               preferred_element_type=jnp.float32) + bo_ref[e, l]
            x = _layernorm(attn_out + x, ln1g_ref[e, l], ln1b_ref[e, l])

            ff = jnp.dot(_mxu(x), _mxu(w1_ref[e, l]),
                         preferred_element_type=jnp.float32) + b1_ref[e, l]
            # TODO(synk): HF BERT uses exact (erf) GELU; tanh approximation used here.
            ff = jax.nn.gelu(ff, approximate=True)
            ff = jnp.dot(_mxu(ff), _mxu(w2_ref[e, l]),
                         preferred_element_type=jnp.float32) + b2_ref[e, l]
            x = _layernorm(ff + x, ln2g_ref[e, l], ln2b_ref[e, l])

        cls_tokens.append(x.reshape(B, S, H)[:, 0, :])      # [B, H] ([CLS])

    code_cls, md_cls = cls_tokens
    # head: cat([code_cls, md_cls], 1) @ top_w + top_b, then @ out_w + out_b.
    # The concat is folded into two matmuls against the split halves of top_w.
    hid = (jnp.dot(_mxu(code_cls), _mxu(topw_ref[0]),
                   preferred_element_type=jnp.float32)
           + jnp.dot(_mxu(md_cls), _mxu(topw_ref[1]),
                     preferred_element_type=jnp.float32)
           + topb_ref[...])
    y = jnp.dot(_mxu(hid), _mxu(outw_ref[...]),
                preferred_element_type=jnp.float32) + outb_ref[...]
    o_ref[...] = y.astype(o_ref.dtype)


def _full_spec(shape):
    """Full-array BlockSpec (single invocation, no grid)."""
    nd = len(shape)
    return pl.BlockSpec(shape, lambda nd=nd: (0,) * nd)


# ------------------------------ forward glue ---------------------------------

@jax.jit
def code_markdown_forward(params, code_ids, code_mask, markdown_ids, markdown_mask):
    enc = params['enc']
    ids = jnp.stack([code_ids, markdown_ids]).astype(jnp.int32)       # [2, B, S]
    masks = jnp.stack([code_mask, markdown_mask]).astype(jnp.float32)  # [2, B, S]

    # embedding lookup (glue; gather has no tiled hot path at these shapes)
    x = jnp.stack([jnp.take(enc['word_emb'][e], ids[e], axis=0)
                   + enc['pos_emb'][e][None]
                   for e in range(NENC)])                              # [2, B, S, H]
    x = x.reshape(NENC, B * S, H)
    bias = (1.0 - masks) * (-1e9)                                      # fp32 additive mask

    operands = (
        x, bias,
        enc['emb_ln_g'], enc['emb_ln_b'],
        enc['wqkv'], enc['bqkv'], enc['wo'], enc['bo'],
        enc['ln1_g'], enc['ln1_b'], enc['w1'], enc['b1'],
        enc['w2'], enc['b2'], enc['ln2_g'], enc['ln2_b'],
        params['top_w'], params['top_b'], params['out_w'], params['out_b'],
    )
    return pl.pallas_call(
        _model_kernel,
        out_shape=jax.ShapeDtypeStruct((B, 1), jnp.float32),
        in_specs=[_full_spec(a.shape) for a in operands],
        out_specs=_full_spec((B, 1)),
        compiler_params=pltpu.CompilerParams(vmem_limit_bytes=32 * 1024 * 1024),
    )(*operands)
    # TODO(synk): at production BERT shapes (H=768, S~512) the row axis (B*S)
    # should be tiled with a "parallel" grid axis and 256-wide N/K tiles so the
    # v7x TensorCores shard work and tiles fit its 64 MiB VMEM.


# --------------------------- deterministic init -------------------------------

def _dense(key, shape):
    return 0.02 * jax.random.normal(key, shape, jnp.float32)


def init_encoder(key):
    kw, kp, kqkv, ko, k1, k2 = jax.random.split(key, 6)
    return {
        'word_emb': _dense(kw, (VOCAB, H)),
        'pos_emb': _dense(kp, (S, H)),
        'emb_ln_g': jnp.ones((1, H), jnp.float32),
        'emb_ln_b': jnp.zeros((1, H), jnp.float32),
        'wqkv': _dense(kqkv, (LAYERS, H, 3 * H)),         # fused [wq | wk | wv]
        'bqkv': jnp.zeros((LAYERS, 1, 3 * H), jnp.float32),
        'wo': _dense(ko, (LAYERS, H, H)),
        'bo': jnp.zeros((LAYERS, 1, H), jnp.float32),
        'ln1_g': jnp.ones((LAYERS, 1, H), jnp.float32),
        'ln1_b': jnp.zeros((LAYERS, 1, H), jnp.float32),
        'w1': _dense(k1, (LAYERS, H, F)),
        'b1': jnp.zeros((LAYERS, 1, F), jnp.float32),
        'w2': _dense(k2, (LAYERS, F, H)),
        'b2': jnp.zeros((LAYERS, 1, H), jnp.float32),
        'ln2_g': jnp.ones((LAYERS, 1, H), jnp.float32),
        'ln2_b': jnp.zeros((LAYERS, 1, H), jnp.float32),
    }


def init_params(key):
    k_code, k_md, k_top, k_out = jax.random.split(key, 4)
    code, md = init_encoder(k_code), init_encoder(k_md)
    # stack code/markdown encoder params on a leading axis of size 2
    enc = jax.tree_util.tree_map(lambda a, b: jnp.stack([a, b]), code, md)
    # nn.Linear(2H, H) / nn.Linear(H, 1), stored as [in, out];
    # top_w pre-split into code/markdown halves so the kernel skips the concat.
    top_w = _dense(k_top, (2 * H, H))
    return {
        'enc': enc,
        'top_w': jnp.stack([top_w[:H], top_w[H:]]),        # [2, H, H]
        'top_b': jnp.zeros((1, H), jnp.float32),
        'out_w': _dense(k_out, (H, 1)),
        'out_b': jnp.zeros((1, 1), jnp.float32),
    }


# TODO(synk): token-type embeddings and eval-mode dropout of the HF encoders are
# constant/identity contributions and are omitted from the synthetic encoders.

if __name__ == "__main__":
    root = jax.random.PRNGKey(0)
    k_params, k_cid, k_mid = jax.random.split(root, 3)
    params = init_params(k_params)

    code_ids = jax.random.randint(k_cid, (B, S), 0, VOCAB, dtype=jnp.int32)
    markdown_ids = jax.random.randint(k_mid, (B, S), 0, VOCAB, dtype=jnp.int32)
    # attention masks: batch 0 fully valid, batch 1 has padded positions
    code_mask = jnp.array([[1] * S, [1] * (S - 2) + [0, 0]], dtype=jnp.float32)
    markdown_mask = jnp.array([[1] * (S - 1) + [0], [1] * S], dtype=jnp.float32)

    out = code_markdown_forward(params, code_ids, code_mask,
                                markdown_ids, markdown_mask)
    out = jax.block_until_ready(out)
    assert out.shape == (B, 1) and out.dtype == jnp.float32
    assert bool(jnp.all(jnp.isfinite(out)))
    print("KERNEL_OK")
</pallas_src>

<mosaic_0001>
module attributes {stable_mosaic.version = 11 : i64} {
  func.func @_model_kernel(%arg0: memref<2x16x32xf32, #tpu.memory_space<vmem>>, %arg1: memref<2x2x8xf32, #tpu.memory_space<vmem>>, %arg2: memref<2x1x32xf32, #tpu.memory_space<vmem>>, %arg3: memref<2x1x32xf32, #tpu.memory_space<vmem>>, %arg4: memref<2x2x32x96xf32, #tpu.memory_space<vmem>>, %arg5: memref<2x2x1x96xf32, #tpu.memory_space<vmem>>, %arg6: memref<2x2x32x32xf32, #tpu.memory_space<vmem>>, %arg7: memref<2x2x1x32xf32, #tpu.memory_space<vmem>>, %arg8: memref<2x2x1x32xf32, #tpu.memory_space<vmem>>, %arg9: memref<2x2x1x32xf32, #tpu.memory_space<vmem>>, %arg10: memref<2x2x32x64xf32, #tpu.memory_space<vmem>>, %arg11: memref<2x2x1x64xf32, #tpu.memory_space<vmem>>, %arg12: memref<2x2x64x32xf32, #tpu.memory_space<vmem>>, %arg13: memref<2x2x1x32xf32, #tpu.memory_space<vmem>>, %arg14: memref<2x2x1x32xf32, #tpu.memory_space<vmem>>, %arg15: memref<2x2x1x32xf32, #tpu.memory_space<vmem>>, %arg16: memref<2x32x32xf32, #tpu.memory_space<vmem>>, %arg17: memref<1x32xf32, #tpu.memory_space<vmem>>, %arg18: memref<32x1xf32, #tpu.memory_space<vmem>>, %arg19: memref<1x1xf32, #tpu.memory_space<vmem>>, %arg20: memref<2x1xf32, #tpu.memory_space<vmem>>) attributes {dimension_semantics = [], scalar_prefetch = 0 : i64, scratch_operands = 0 : i64, tpu.core_type = #tpu.core_type<tc>} {
    %c0 = arith.constant 0 : index
    %c0_0 = arith.constant 0 : index
    %c0_1 = arith.constant 0 : index
    %0 = vector.load %arg0[%c0, %c0_0, %c0_1] : memref<2x16x32xf32, #tpu.memory_space<vmem>>, vector<1x16x32xf32>
    %1 = vector.shape_cast %0 : vector<1x16x32xf32> to vector<16x32xf32>
    %c0_2 = arith.constant 0 : index
    %c0_3 = arith.constant 0 : index
    %c0_4 = arith.constant 0 : index
    %2 = vector.load %arg1[%c0_2, %c0_3, %c0_4] : memref<2x2x8xf32, #tpu.memory_space<vmem>>, vector<1x2x8xf32>
    %3 = vector.shape_cast %2 : vector<1x2x8xf32> to vector<2x8xf32>
    %c0_5 = arith.constant 0 : index
    %c0_6 = arith.constant 0 : index
    %c0_7 = arith.constant 0 : index
    %4 = vector.load %arg2[%c0_5, %c0_6, %c0_7] : memref<2x1x32xf32, #tpu.memory_space<vmem>>, vector<1x1x32xf32>
    %5 = vector.shape_cast %4 : vector<1x1x32xf32> to vector<1x32xf32>
    %c0_8 = arith.constant 0 : index
    %c0_9 = arith.constant 0 : index
    %c0_10 = arith.constant 0 : index
    %6 = vector.load %arg3[%c0_8, %c0_9, %c0_10] : memref<2x1x32xf32, #tpu.memory_space<vmem>>, vector<1x1x32xf32>
    %7 = vector.shape_cast %6 : vector<1x1x32xf32> to vector<1x32xf32>
    %cst = arith.constant dense<0.000000e+00> : vector<16xf32>
    %8 = vector.multi_reduction <add>, %1, %cst [1] : vector<16x32xf32> to vector<16xf32>
    %9 = vector.shape_cast %8 : vector<16xf32> to vector<16x1xf32>
    %cst_11 = arith.constant 3.200000e+01 : f32
    %10 = vector.broadcast %cst_11 : f32 to vector<16x1xf32>
    %11 = arith.divf %9, %10 : vector<16x1xf32>
    %12 = vector.broadcast %11 : vector<16x1xf32> to vector<16x32xf32>
    %13 = arith.subf %1, %12 : vector<16x32xf32>
    %14 = arith.mulf %13, %13 : vector<16x32xf32>
    %cst_12 = arith.constant dense<0.000000e+00> : vector<16xf32>
    %15 = vector.multi_reduction <add>, %14, %cst_12 [1] : vector<16x32xf32> to vector<16xf32>
    %16 = vector.shape_cast %15 : vector<16xf32> to vector<16x1xf32>
    %cst_13 = arith.constant 3.200000e+01 : f32
    %17 = vector.broadcast %cst_13 : f32 to vector<16x1xf32>
    %18 = arith.divf %16, %17 : vector<16x1xf32>
    %19 = vector.broadcast %11 : vector<16x1xf32> to vector<16x32xf32>
    %20 = arith.subf %1, %19 : vector<16x32xf32>
    %cst_14 = arith.constant 9.99999996E-13 : f32
    %21 = vector.broadcast %cst_14 : f32 to vector<16x1xf32>
    %22 = arith.addf %18, %21 : vector<16x1xf32>
    %23 = math.rsqrt %22 : vector<16x1xf32>
    %24 = vector.broadcast %23 : vector<16x1xf32> to vector<16x32xf32>
    %25 = arith.mulf %20, %24 : vector<16x32xf32>
    %26 = vector.broadcast %5 : vector<1x32xf32> to vector<16x32xf32>
    %27 = arith.mulf %25, %26 : vector<16x32xf32>
    %28 = vector.broadcast %7 : vector<1x32xf32> to vector<16x32xf32>
    %29 = arith.addf %27, %28 : vector<16x32xf32>
    %30 = arith.truncf %29 : vector<16x32xf32> to vector<16x32xbf16>
    %c0_15 = arith.constant 0 : index
    %c0_16 = arith.constant 0 : index
    %c0_17 = arith.constant 0 : index
    %c0_18 = arith.constant 0 : index
    %31 = vector.load %arg4[%c0_15, %c0_16, %c0_17, %c0_18] : memref<2x2x32x96xf32, #tpu.memory_space<vmem>>, vector<1x1x32x96xf32>
    %32 = vector.shape_cast %31 : vector<1x1x32x96xf32> to vector<32x96xf32>
    %33 = arith.truncf %32 : vector<32x96xf32> to vector<32x96xbf16>
    %cst_19 = arith.constant dense<0.000000e+00> : vector<16x96xf32>
    %34 = tpu.matmul %30, %33, %cst_19 {dimension_numbers = #tpu.dot_dimension_numbers<[1], [0], [0], [1], [0, 0, 1, 1], [], []>} : vector<16x32xbf16>, vector<32x96xbf16>, vector<16x96xf32> -> vector<16x96xf32>
    %c0_20 = arith.constant 0 : index
    %c0_21 = arith.constant 0 : index
    %c0_22 = arith.constant 0 : index
    %c0_23 = arith.constant 0 : index
    %35 = vector.load %arg5[%c0_20, %c0_21, %c0_22, %c0_23] : memref<2x2x1x96xf32, #tpu.memory_space<vmem>>, vector<1x1x1x96xf32>
    %36 = vector.shape_cast %35 : vector<1x1x1x96xf32> to vector<1x96xf32>
    %37 = vector.broadcast %36 : vector<1x96xf32> to vector<16x96xf32>
    %38 = arith.addf %34, %37 : vector<16x96xf32>
    %39 = vector.extract_strided_slice %38 {offsets = [0, 0], sizes = [16, 32], strides = [1, 1]} : vector<16x96xf32> to vector<16x32xf32>
    %40 = vector.shape_cast %39 : vector<16x32xf32> to vector<2x8x32xf32>
    %41 = vector.extract_strided_slice %38 {offsets = [0, 32], sizes = [16, 32], strides = [1, 1]} : vector<16x96xf32> to vector<16x32xf32>
    %42 = vector.shape_cast %41 : vector<16x32xf32> to vector<2x8x32xf32>
    %43 = vector.extract_strided_slice %38 {offsets = [0, 64], sizes = [16, 32], strides = [1, 1]} : vector<16x96xf32> to vector<16x32xf32>
    %44 = vector.shape_cast %43 : vector<16x32xf32> to vector<2x8x32xf32>
    %45 = vector.extract_strided_slice %40 {offsets = [0, 0, 0], sizes = [2, 8, 16], strides = [1, 1, 1]} : vector<2x8x32xf32> to vector<2x8x16xf32>
    %46 = vector.extract_strided_slice %42 {offsets = [0, 0, 0], sizes = [2, 8, 16], strides = [1, 1, 1]} : vector<2x8x32xf32> to vector<2x8x16xf32>
    %47 = vector.extract_strided_slice %44 {offsets = [0, 0, 0], sizes = [2, 8, 16], strides = [1, 1, 1]} : vector<2x8x32xf32> to vector<2x8x16xf32>
    %48 = arith.truncf %45 : vector<2x8x16xf32> to vector<2x8x16xbf16>
    %49 = arith.truncf %46 : vector<2x8x16xf32> to vector<2x8x16xbf16>
    "tpu.trace_start"() <{level = 10 : i32, message = "bqd,bkd->bqk"}> : () -> ()
    %cst_24 = arith.constant dense<0.000000e+00> : vector<2x8x8xf32>
    %50 = tpu.matmul %48, %49, %cst_24 {dimension_numbers = #tpu.dot_dimension_numbers<[2], [2], [1], [1], [0, 0, 0, 1, 1, 1], [0], [0]>} : vector<2x8x16xbf16>, vector<2x8x16xbf16>, vector<2x8x8xf32> -> vector<2x8x8xf32>
    "tpu.trace_stop"() : () -> ()
    %cst_25 = arith.constant 2.500000e-01 : f32
    %51 = vector.broadcast %cst_25 : f32 to vector<2x8x8xf32>
    %52 = arith.mulf %50, %51 : vector<2x8x8xf32>
    %53 = vector.shape_cast %3 : vector<2x8xf32> to vector<2x1x8xf32>
    %54 = vector.broadcast %53 : vector<2x1x8xf32> to vector<2x8x8xf32>
    %55 = arith.addf %52, %54 : vector<2x8x8xf32>
    %cst_26 = arith.constant dense<0xFF800000> : vector<2x8xf32>
    %56 = vector.multi_reduction <maximumf>, %55, %cst_26 [2] : vector<2x8x8xf32> to vector<2x8xf32>
    %57 = vector.shape_cast %56 : vector<2x8xf32> to vector<2x8x1xf32>
    %58 = vector.broadcast %57 : vector<2x8x1xf32> to vector<2x8x8xf32>
    %59 = arith.subf %55, %58 : vector<2x8x8xf32>
    %60 = math.exp %59 : vector<2x8x8xf32>
    %cst_27 = arith.constant dense<0.000000e+00> : vector<2x8xf32>
    %61 = vector.multi_reduction <add>, %60, %cst_27 [2] : vector<2x8x8xf32> to vector<2x8xf32>
    %62 = vector.shape_cast %61 : vector<2x8xf32> to vector<2x8x1xf32>
    %63 = tpu.reciprocal %62 {approx = true} : vector<2x8x1xf32> -> vector<2x8x1xf32>
    %64 = vector.broadcast %63 : vector<2x8x1xf32> to vector<2x8x8xf32>
    %65 = arith.mulf %60, %64 : vector<2x8x8xf32>
    %66 = arith.truncf %65 : vector<2x8x8xf32> to vector<2x8x8xbf16>
    %67 = arith.truncf %47 : vector<2x8x16xf32> to vector<2x8x16xbf16>
    "tpu.trace_start"() <{level = 10 : i32, message = "bqk,bkd->bqd"}> : () -> ()
    %cst_28 = arith.constant dense<0.000000e+00> : vector<2x8x16xf32>
    %68 = tpu.matmul %66, %67, %cst_28 {dimension_numbers = #tpu.dot_dimension_numbers<[2], [1], [1], [2], [0, 0, 0, 1, 1, 2], [0], [0]>} : vector<2x8x8xbf16>, vector<2x8x16xbf16>, vector<2x8x16xf32> -> vector<2x8x16xf32>
    "tpu.trace_stop"() : () -> ()
    %69 = vector.extract_strided_slice %40 {offsets = [0, 0, 16], sizes = [2, 8, 16], strides = [1, 1, 1]} : vector<2x8x32xf32> to vector<2x8x16xf32>
    %70 = vector.extract_strided_slice %42 {offsets = [0, 0, 16], sizes = [2, 8, 16], strides = [1, 1, 1]} : vector<2x8x32xf32> to vector<2x8x16xf32>
    %71 = vector.extract_strided_slice %44 {offsets = [0, 0, 16], sizes = [2, 8, 16], strides = [1, 1, 1]} : vector<2x8x32xf32> to vector<2x8x16xf32>
    %72 = arith.truncf %69 : vector<2x8x16xf32> to vector<2x8x16xbf16>
    %73 = arith.truncf %70 : vector<2x8x16xf32> to vector<2x8x16xbf16>
    "tpu.trace_start"() <{level = 10 : i32, message = "bqd,bkd->bqk"}> : () -> ()
    %cst_29 = arith.constant dense<0.000000e+00> : vector<2x8x8xf32>
    %74 = tpu.matmul %72, %73, %cst_29 {dimension_numbers = #tpu.dot_dimension_numbers<[2], [2], [1], [1], [0, 0, 0, 1, 1, 1], [0], [0]>} : vector<2x8x16xbf16>, vector<2x8x16xbf16>, vector<2x8x8xf32> -> vector<2x8x8xf32>
    "tpu.trace_stop"() : () -> ()
    %cst_30 = arith.constant 2.500000e-01 : f32
    %75 = vector.broadcast %cst_30 : f32 to vector<2x8x8xf32>
    %76 = arith.mulf %74, %75 : vector<2x8x8xf32>
    %77 = vector.shape_cast %3 : vector<2x8xf32> to vector<2x1x8xf32>
    %78 = vector.broadcast %77 : vector<2x1x8xf32> to vector<2x8x8xf32>
    %79 = arith.addf %76, %78 : vector<2x8x8xf32>
    %cst_31 = arith.constant dense<0xFF800000> : vector<2x8xf32>
    %80 = vector.multi_reduction <maximumf>, %79, %cst_31 [2] : vector<2x8x8xf32> to vector<2x8xf32>
    %81 = vector.shape_cast %80 : vector<2x8xf32> to vector<2x8x1xf32>
    %82 = vector.broadcast %81 : vector<2x8x1xf32> to vector<2x8x8xf32>
    %83 = arith.subf %79, %82 : vector<2x8x8xf32>
    %84 = math.exp %83 : vector<2x8x8xf32>
    %cst_32 = arith.constant dense<0.000000e+00> : vector<2x8xf32>
    %85 = vector.multi_reduction <add>, %84, %cst_32 [2] : vector<2x8x8xf32> to vector<2x8xf32>
    %86 = vector.shape_cast %85 : vector<2x8xf32> to vector<2x8x1xf32>
    %87 = tpu.reciprocal %86 {approx = true} : vector<2x8x1xf32> -> vector<2x8x1xf32>
    %88 = vector.broadcast %87 : vector<2x8x1xf32> to vector<2x8x8xf32>
    %89 = arith.mulf %84, %88 : vector<2x8x8xf32>
    %90 = arith.truncf %89 : vector<2x8x8xf32> to vector<2x8x8xbf16>
    %91 = arith.truncf %71 : vector<2x8x16xf32> to vector<2x8x16xbf16>
    "tpu.trace_start"() <{level = 10 : i32, message = "bqk,bkd->bqd"}> : () -> ()
    %cst_33 = arith.constant dense<0.000000e+00> : vector<2x8x16xf32>
    %92 = tpu.matmul %90, %91, %cst_33 {dimension_numbers = #tpu.dot_dimension_numbers<[2], [1], [1], [2], [0, 0, 0, 1, 1, 2], [0], [0]>} : vector<2x8x8xbf16>, vector<2x8x16xbf16>, vector<2x8x16xf32> -> vector<2x8x16xf32>
    "tpu.trace_stop"() : () -> ()
    %93 = tpu.concatenate %68, %92 in 2 : vector<2x8x16xf32>, vector<2x8x16xf32> -> vector<2x8x32xf32>
    %94 = vector.shape_cast %93 : vector<2x8x32xf32> to vector<16x32xf32>
    %95 = arith.truncf %94 : vector<16x32xf32> to vector<16x32xbf16>
    %c0_34 = arith.constant 0 : index
    %c0_35 = arith.constant 0 : index
    %c0_36 = arith.constant 0 : index
    %c0_37 = arith.constant 0 : index
    %96 = vector.load %arg6[%c0_34, %c0_35, %c0_36, %c0_37] : memref<2x2x32x32xf32, #tpu.memory_space<vmem>>, vector<1x1x32x32xf32>
    %97 = vector.shape_cast %96 : vector<1x1x32x32xf32> to vector<32x32xf32>
    %98 = arith.truncf %97 : vector<32x32xf32> to vector<32x32xbf16>
    %cst_38 = arith.constant dense<0.000000e+00> : vector<16x32xf32>
    %99 = tpu.matmul %95, %98, %cst_38 {dimension_numbers = #tpu.dot_dimension_numbers<[1], [0], [0], [1], [0, 0, 1, 1], [], []>} : vector<16x32xbf16>, vector<32x32xbf16>, vector<16x32xf32> -> vector<16x32xf32>
    %c0_39 = arith.constant 0 : index
    %c0_40 = arith.constant 0 : index
    %c0_41 = arith.constant 0 : index
    %c0_42 = arith.constant 0 : index
    %100 = vector.load %arg7[%c0_39, %c0_40, %c0_41, %c0_42] : memref<2x2x1x32xf32, #tpu.memory_space<vmem>>, vector<1x1x1x32xf32>
    %101 = vector.shape_cast %100 : vector<1x1x1x32xf32> to vector<1x32xf32>
    %102 = vector.broadcast %101 : vector<1x32xf32> to vector<16x32xf32>
    %103 = arith.addf %99, %102 : vector<16x32xf32>
    %104 = arith.addf %103, %29 : vector<16x32xf32>
    %c0_43 = arith.constant 0 : index
    %c0_44 = arith.constant 0 : index
    %c0_45 = arith.constant 0 : index
    %c0_46 = arith.constant 0 : index
    %105 = vector.load %arg8[%c0_43, %c0_44, %c0_45, %c0_46] : memref<2x2x1x32xf32, #tpu.memory_space<vmem>>, vector<1x1x1x32xf32>
    %106 = vector.shape_cast %105 : vector<1x1x1x32xf32> to vector<1x32xf32>
    %c0_47 = arith.constant 0 : index
    %c0_48 = arith.constant 0 : index
    %c0_49 = arith.constant 0 : index
    %c0_50 = arith.constant 0 : index
    %107 = vector.load %arg9[%c0_47, %c0_48, %c0_49, %c0_50] : memref<2x2x1x32xf32, #tpu.memory_space<vmem>>, vector<1x1x1x32xf32>
    %108 = vector.shape_cast %107 : vector<1x1x1x32xf32> to vector<1x32xf32>
    %cst_51 = arith.constant dense<0.000000e+00> : vector<16xf32>
    %109 = vector.multi_reduction <add>, %104, %cst_51 [1] : vector<16x32xf32> to vector<16xf32>
    %110 = vector.shape_cast %109 : vector<16xf32> to vector<16x1xf32>
    %cst_52 = arith.constant 3.200000e+01 : f32
    %111 = vector.broadcast %cst_52 : f32 to vector<16x1xf32>
    %112 = arith.divf %110, %111 : vector<16x1xf32>
    %113 = vector.broadcast %112 : vector<16x1xf32> to vector<16x32xf32>
    %114 = arith.subf %104, %113 : vector<16x32xf32>
    %115 = arith.mulf %114, %114 : vector<16x32xf32>
    %cst_53 = arith.constant dense<0.000000e+00> : vector<16xf32>
    %116 = vector.multi_reduction <add>, %115, %cst_53 [1] : vector<16x32xf32> to vector<16xf32>
    %117 = vector.shape_cast %116 : vector<16xf32> to vector<16x1xf32>
    %cst_54 = arith.constant 3.200000e+01 : f32
    %118 = vector.broadcast %cst_54 : f32 to vector<16x1xf32>
    %119 = arith.divf %117, %118 : vector<16x1xf32>
    %120 = vector.broadcast %112 : vector<16x1xf32> to vector<16x32xf32>
    %121 = arith.subf %104, %120 : vector<16x32xf32>
    %cst_55 = arith.constant 9.99999996E-13 : f32
    %122 = vector.broadcast %cst_55 : f32 to vector<16x1xf32>
    %123 = arith.addf %119, %122 : vector<16x1xf32>
    %124 = math.rsqrt %123 : vector<16x1xf32>
    %125 = vector.broadcast %124 : vector<16x1xf32> to vector<16x32xf32>
    %126 = arith.mulf %121, %125 : vector<16x32xf32>
    %127 = vector.broadcast %106 : vector<1x32xf32> to vector<16x32xf32>
    %128 = arith.mulf %126, %127 : vector<16x32xf32>
    %129 = vector.broadcast %108 : vector<1x32xf32> to vector<16x32xf32>
    %130 = arith.addf %128, %129 : vector<16x32xf32>
    %131 = arith.truncf %130 : vector<16x32xf32> to vector<16x32xbf16>
    %c0_56 = arith.constant 0 : index
    %c0_57 = arith.constant 0 : index
    %c0_58 = arith.constant 0 : index
    %c0_59 = arith.constant 0 : index
    %132 = vector.load %arg10[%c0_56, %c0_57, %c0_58, %c0_59] : memref<2x2x32x64xf32, #tpu.memory_space<vmem>>, vector<1x1x32x64xf32>
    %133 = vector.shape_cast %132 : vector<1x1x32x64xf32> to vector<32x64xf32>
    %134 = arith.truncf %133 : vector<32x64xf32> to vector<32x64xbf16>
    %cst_60 = arith.constant dense<0.000000e+00> : vector<16x64xf32>
    %135 = tpu.matmul %131, %134, %cst_60 {dimension_numbers = #tpu.dot_dimension_numbers<[1], [0], [0], [1], [0, 0, 1, 1], [], []>} : vector<16x32xbf16>, vector<32x64xbf16>, vector<16x64xf32> -> vector<16x64xf32>
    %c0_61 = arith.constant 0 : index
    %c0_62 = arith.constant 0 : index
    %c0_63 = arith.constant 0 : index
    %c0_64 = arith.constant 0 : index
    %136 = vector.load %arg11[%c0_61, %c0_62, %c0_63, %c0_64] : memref<2x2x1x64xf32, #tpu.memory_space<vmem>>, vector<1x1x1x64xf32>
    %137 = vector.shape_cast %136 : vector<1x1x1x64xf32> to vector<1x64xf32>
    %138 = vector.broadcast %137 : vector<1x64xf32> to vector<16x64xf32>
    %139 = arith.addf %135, %138 : vector<16x64xf32>
    %140 = arith.mulf %139, %139 : vector<16x64xf32>
    %141 = arith.mulf %139, %140 : vector<16x64xf32>
    %cst_65 = arith.constant 4.471500e-02 : f32
    %142 = vector.broadcast %cst_65 : f32 to vector<16x64xf32>
    %143 = arith.mulf %142, %141 : vector<16x64xf32>
    %144 = arith.addf %139, %143 : vector<16x64xf32>
    %cst_66 = arith.constant 0.797884583 : f32
    %145 = vector.broadcast %cst_66 : f32 to vector<16x64xf32>
    %146 = arith.mulf %145, %144 : vector<16x64xf32>
    %147 = math.tanh %146 : vector<16x64xf32>
    %cst_67 = arith.constant 1.000000e+00 : f32
    %148 = vector.broadcast %cst_67 : f32 to vector<16x64xf32>
    %149 = arith.addf %148, %147 : vector<16x64xf32>
    %cst_68 = arith.constant 5.000000e-01 : f32
    %150 = vector.broadcast %cst_68 : f32 to vector<16x64xf32>
    %151 = arith.mulf %150, %149 : vector<16x64xf32>
    %152 = arith.mulf %139, %151 : vector<16x64xf32>
    %153 = arith.truncf %152 : vector<16x64xf32> to vector<16x64xbf16>
    %c0_69 = arith.constant 0 : index
    %c0_70 = arith.constant 0 : index
    %c0_71 = arith.constant 0 : index
    %c0_72 = arith.constant 0 : index
    %154 = vector.load %arg12[%c0_69, %c0_70, %c0_71, %c0_72] : memref<2x2x64x32xf32, #tpu.memory_space<vmem>>, vector<1x1x64x32xf32>
    %155 = vector.shape_cast %154 : vector<1x1x64x32xf32> to vector<64x32xf32>
    %156 = arith.truncf %155 : vector<64x32xf32> to vector<64x32xbf16>
    %cst_73 = arith.constant dense<0.000000e+00> : vector<16x32xf32>
    %157 = tpu.matmul %153, %156, %cst_73 {dimension_numbers = #tpu.dot_dimension_numbers<[1], [0], [0], [1], [0, 0, 1, 1], [], []>} : vector<16x64xbf16>, vector<64x32xbf16>, vector<16x32xf32> -> vector<16x32xf32>
    %c0_74 = arith.constant 0 : index
    %c0_75 = arith.constant 0 : index
    %c0_76 = arith.constant 0 : index
    %c0_77 = arith.constant 0 : index
    %158 = vector.load %arg13[%c0_74, %c0_75, %c0_76, %c0_77] : memref<2x2x1x32xf32, #tpu.memory_space<vmem>>, vector<1x1x1x32xf32>
    %159 = vector.shape_cast %158 : vector<1x1x1x32xf32> to vector<1x32xf32>
    %160 = vector.broadcast %159 : vector<1x32xf32> to vector<16x32xf32>
    %161 = arith.addf %157, %160 : vector<16x32xf32>
    %162 = arith.addf %161, %130 : vector<16x32xf32>
    %c0_78 = arith.constant 0 : index
    %c0_79 = arith.constant 0 : index
    %c0_80 = arith.constant 0 : index
    %c0_81 = arith.constant 0 : index
    %163 = vector.load %arg14[%c0_78, %c0_79, %c0_80, %c0_81] : memref<2x2x1x32xf32, #tpu.memory_space<vmem>>, vector<1x1x1x32xf32>
    %164 = vector.shape_cast %163 : vector<1x1x1x32xf32> to vector<1x32xf32>
    %c0_82 = arith.constant 0 : index
    %c0_83 = arith.constant 0 : index
    %c0_84 = arith.constant 0 : index
    %c0_85 = arith.constant 0 : index
    %165 = vector.load %arg15[%c0_82, %c0_83, %c0_84, %c0_85] : memref<2x2x1x32xf32, #tpu.memory_space<vmem>>, vector<1x1x1x32xf32>
    %166 = vector.shape_cast %165 : vector<1x1x1x32xf32> to vector<1x32xf32>
    %cst_86 = arith.constant dense<0.000000e+00> : vector<16xf32>
    %167 = vector.multi_reduction <add>, %162, %cst_86 [1] : vector<16x32xf32> to vector<16xf32>
    %168 = vector.shape_cast %167 : vector<16xf32> to vector<16x1xf32>
    %cst_87 = arith.constant 3.200000e+01 : f32
    %169 = vector.broadcast %cst_87 : f32 to vector<16x1xf32>
    %170 = arith.divf %168, %169 : vector<16x1xf32>
    %171 = vector.broadcast %170 : vector<16x1xf32> to vector<16x32xf32>
    %172 = arith.subf %162, %171 : vector<16x32xf32>
    %173 = arith.mulf %172, %172 : vector<16x32xf32>
    %cst_88 = arith.constant dense<0.000000e+00> : vector<16xf32>
    %174 = vector.multi_reduction <add>, %173, %cst_88 [1] : vector<16x32xf32> to vector<16xf32>
    %175 = vector.shape_cast %174 : vector<16xf32> to vector<16x1xf32>
    %cst_89 = arith.constant 3.200000e+01 : f32
    %176 = vector.broadcast %cst_89 : f32 to vector<16x1xf32>
    %177 = arith.divf %175, %176 : vector<16x1xf32>
    %178 = vector.broadcast %170 : vector<16x1xf32> to vector<16x32xf32>
    %179 = arith.subf %162, %178 : vector<16x32xf32>
    %cst_90 = arith.constant 9.99999996E-13 : f32
    %180 = vector.broadcast %cst_90 : f32 to vector<16x1xf32>
    %181 = arith.addf %177, %180 : vector<16x1xf32>
    %182 = math.rsqrt %181 : vector<16x1xf32>
    %183 = vector.broadcast %182 : vector<16x1xf32> to vector<16x32xf32>
    %184 = arith.mulf %179, %183 : vector<16x32xf32>
    %185 = vector.broadcast %164 : vector<1x32xf32> to vector<16x32xf32>
    %186 = arith.mulf %184, %185 : vector<16x32xf32>
    %187 = vector.broadcast %166 : vector<1x32xf32> to vector<16x32xf32>
    %188 = arith.addf %186, %187 : vector<16x32xf32>
    %189 = arith.truncf %188 : vector<16x32xf32> to vector<16x32xbf16>
    %c0_91 = arith.constant 0 : index
    %c1 = arith.constant 1 : index
    %c0_92 = arith.constant 0 : index
    %c0_93 = arith.constant 0 : index
    %190 = vector.load %arg4[%c0_91, %c1, %c0_92, %c0_93] : memref<2x2x32x96xf32, #tpu.memory_space<vmem>>, vector<1x1x32x96xf32>
    %191 = vector.shape_cast %190 : vector<1x1x32x96xf32> to vector<32x96xf32>
    %192 = arith.truncf %191 : vector<32x96xf32> to vector<32x96xbf16>
    %cst_94 = arith.constant dense<0.000000e+00> : vector<16x96xf32>
    %193 = tpu.matmul %189, %192, %cst_94 {dimension_numbers = #tpu.dot_dimension_numbers<[1], [0], [0], [1], [0, 0, 1, 1], [], []>} : vector<16x32xbf16>, vector<32x96xbf16>, vector<16x96xf32> -> vector<16x96xf32>
    %c0_95 = arith.constant 0 : index
    %c1_96 = arith.constant 1 : index
    %c0_97 = arith.constant 0 : index
    %c0_98 = arith.constant 0 : index
    %194 = vector.load %arg5[%c0_95, %c1_96, %c0_97, %c0_98] : memref<2x2x1x96xf32, #tpu.memory_space<vmem>>, vector<1x1x1x96xf32>
    %195 = vector.shape_cast %194 : vector<1x1x1x96xf32> to vector<1x96xf32>
    %196 = vector.broadcast %195 : vector<1x96xf32> to vector<16x96xf32>
    %197 = arith.addf %193, %196 : vector<16x96xf32>
    %198 = vector.extract_strided_slice %197 {offsets = [0, 0], sizes = [16, 32], strides = [1, 1]} : vector<16x96xf32> to vector<16x32xf32>
    %199 = vector.shape_cast %198 : vector<16x32xf32> to vector<2x8x32xf32>
    %200 = vector.extract_strided_slice %197 {offsets = [0, 32], sizes = [16, 32], strides = [1, 1]} : vector<16x96xf32> to vector<16x32xf32>
    %201 = vector.shape_cast %200 : vector<16x32xf32> to vector<2x8x32xf32>
    %202 = vector.extract_strided_slice %197 {offsets = [0, 64], sizes = [16, 32], strides = [1, 1]} : vector<16x96xf32> to vector<16x32xf32>
    %203 = vector.shape_cast %202 : vector<16x32xf32> to vector<2x8x32xf32>
    %204 = vector.extract_strided_slice %199 {offsets = [0, 0, 0], sizes = [2, 8, 16], strides = [1, 1, 1]} : vector<2x8x32xf32> to vector<2x8x16xf32>
    %205 = vector.extract_strided_slice %201 {offsets = [0, 0, 0], sizes = [2, 8, 16], strides = [1, 1, 1]} : vector<2x8x32xf32> to vector<2x8x16xf32>
    %206 = vector.extract_strided_slice %203 {offsets = [0, 0, 0], sizes = [2, 8, 16], strides = [1, 1, 1]} : vector<2x8x32xf32> to vector<2x8x16xf32>
    %207 = arith.truncf %204 : vector<2x8x16xf32> to vector<2x8x16xbf16>
    %208 = arith.truncf %205 : vector<2x8x16xf32> to vector<2x8x16xbf16>
    "tpu.trace_start"() <{level = 10 : i32, message = "bqd,bkd->bqk"}> : () -> ()
    %cst_99 = arith.constant dense<0.000000e+00> : vector<2x8x8xf32>
    %209 = tpu.matmul %207, %208, %cst_99 {dimension_numbers = #tpu.dot_dimension_numbers<[2], [2], [1], [1], [0, 0, 0, 1, 1, 1], [0], [0]>} : vector<2x8x16xbf16>, vector<2x8x16xbf16>, vector<2x8x8xf32> -> vector<2x8x8xf32>
    "tpu.trace_stop"() : () -> ()
    %cst_100 = arith.constant 2.500000e-01 : f32
    %210 = vector.broadcast %cst_100 : f32 to vector<2x8x8xf32>
    %211 = arith.mulf %209, %210 : vector<2x8x8xf32>
    %212 = vector.shape_cast %3 : vector<2x8xf32> to vector<2x1x8xf32>
    %213 = vector.broadcast %212 : vector<2x1x8xf32> to vector<2x8x8xf32>
    %214 = arith.addf %211, %213 : vector<2x8x8xf32>
    %cst_101 = arith.constant dense<0xFF800000> : vector<2x8xf32>
    %215 = vector.multi_reduction <maximumf>, %214, %cst_101 [2] : vector<2x8x8xf32> to vector<2x8xf32>
    %216 = vector.shape_cast %215 : vector<2x8xf32> to vector<2x8x1xf32>
    %217 = vector.broadcast %216 : vector<2x8x1xf32> to vector<2x8x8xf32>
    %218 = arith.subf %214, %217 : vector<2x8x8xf32>
    %219 = math.exp %218 : vector<2x8x8xf32>
    %cst_102 = arith.constant dense<0.000000e+00> : vector<2x8xf32>
    %220 = vector.multi_reduction <add>, %219, %cst_102 [2] : vector<2x8x8xf32> to vector<2x8xf32>
    %221 = vector.shape_cast %220 : vector<2x8xf32> to vector<2x8x1xf32>
    %222 = tpu.reciprocal %221 {approx = true} : vector<2x8x1xf32> -> vector<2x8x1xf32>
    %223 = vector.broadcast %222 : vector<2x8x1xf32> to vector<2x8x8xf32>
    %224 = arith.mulf %219, %223 : vector<2x8x8xf32>
    %225 = arith.truncf %224 : vector<2x8x8xf32> to vector<2x8x8xbf16>
    %226 = arith.truncf %206 : vector<2x8x16xf32> to vector<2x8x16xbf16>
    "tpu.trace_start"() <{level = 10 : i32, message = "bqk,bkd->bqd"}> : () -> ()
    %cst_103 = arith.constant dense<0.000000e+00> : vector<2x8x16xf32>
    %227 = tpu.matmul %225, %226, %cst_103 {dimension_numbers = #tpu.dot_dimension_numbers<[2], [1], [1], [2], [0, 0, 0, 1, 1, 2], [0], [0]>} : vector<2x8x8xbf16>, vector<2x8x16xbf16>, vector<2x8x16xf32> -> vector<2x8x16xf32>
    "tpu.trace_stop"() : () -> ()
    %228 = vector.extract_strided_slice %199 {offsets = [0, 0, 16], sizes = [2, 8, 16], strides = [1, 1, 1]} : vector<2x8x32xf32> to vector<2x8x16xf32>
    %229 = vector.extract_strided_slice %201 {offsets = [0, 0, 16], sizes = [2, 8, 16], strides = [1, 1, 1]} : vector<2x8x32xf32> to vector<2x8x16xf32>
    %230 = vector.extract_strided_slice %203 {offsets = [0, 0, 16], sizes = [2, 8, 16], strides = [1, 1, 1]} : vector<2x8x32xf32> to vector<2x8x16xf32>
    %231 = arith.truncf %228 : vector<2x8x16xf32> to vector<2x8x16xbf16>
    %232 = arith.truncf %229 : vector<2x8x16xf32> to vector<2x8x16xbf16>
    "tpu.trace_start"() <{level = 10 : i32, message = "bqd,bkd->bqk"}> : () -> ()
    %cst_104 = arith.constant dense<0.000000e+00> : vector<2x8x8xf32>
    %233 = tpu.matmul %231, %232, %cst_104 {dimension_numbers = #tpu.dot_dimension_numbers<[2], [2], [1], [1], [0, 0, 0, 1, 1, 1], [0], [0]>} : vector<2x8x16xbf16>, vector<2x8x16xbf16>, vector<2x8x8xf32> -> vector<2x8x8xf32>
    "tpu.trace_stop"() : () -> ()
    %cst_105 = arith.constant 2.500000e-01 : f32
    %234 = vector.broadcast %cst_105 : f32 to vector<2x8x8xf32>
    %235 = arith.mulf %233, %234 : vector<2x8x8xf32>
    %236 = vector.shape_cast %3 : vector<2x8xf32> to vector<2x1x8xf32>
    %237 = vector.broadcast %236 : vector<2x1x8xf32> to vector<2x8x8xf32>
    %238 = arith.addf %235, %237 : vector<2x8x8xf32>
    %cst_106 = arith.constant dense<0xFF800000> : vector<2x8xf32>
    %239 = vector.multi_reduction <maximumf>, %238, %cst_106 [2] : vector<2x8x8xf32> to vector<2x8xf32>
    %240 = vector.shape_cast %239 : vector<2x8xf32> to vector<2x8x1xf32>
    %241 = vector.broadcast %240 : vector<2x8x1xf32> to vector<2x8x8xf32>
    %242 = arith.subf %238, %241 : vector<2x8x8xf32>
    %243 = math.exp %242 : vector<2x8x8xf32>
    %cst_107 = arith.constant dense<0.000000e+00> : vector<2x8xf32>
    %244 = vector.multi_reduction <add>, %243, %cst_107 [2] : vector<2x8x8xf32> to vector<2x8xf32>
    %245 = vector.shape_cast %244 : vector<2x8xf32> to vector<2x8x1xf32>
    %246 = tpu.reciprocal %245 {approx = true} : vector<2x8x1xf32> -> vector<2x8x1xf32>
    %247 = vector.broadcast %246 : vector<2x8x1xf32> to vector<2x8x8xf32>
    %248 = arith.mulf %243, %247 : vector<2x8x8xf32>
    %249 = arith.truncf %248 : vector<2x8x8xf32> to vector<2x8x8xbf16>
    %250 = arith.truncf %230 : vector<2x8x16xf32> to vector<2x8x16xbf16>
    "tpu.trace_start"() <{level = 10 : i32, message = "bqk,bkd->bqd"}> : () -> ()
    %cst_108 = arith.constant dense<0.000000e+00> : vector<2x8x16xf32>
    %251 = tpu.matmul %249, %250, %cst_108 {dimension_numbers = #tpu.dot_dimension_numbers<[2], [1], [1], [2], [0, 0, 0, 1, 1, 2], [0], [0]>} : vector<2x8x8xbf16>, vector<2x8x16xbf16>, vector<2x8x16xf32> -> vector<2x8x16xf32>
    "tpu.trace_stop"() : () -> ()
    %252 = tpu.concatenate %227, %251 in 2 : vector<2x8x16xf32>, vector<2x8x16xf32> -> vector<2x8x32xf32>
    %253 = vector.shape_cast %252 : vector<2x8x32xf32> to vector<16x32xf32>
    %254 = arith.truncf %253 : vector<16x32xf32> to vector<16x32xbf16>
    %c0_109 = arith.constant 0 : index
    %c1_110 = arith.constant 1 : index
    %c0_111 = arith.constant 0 : index
    %c0_112 = arith.constant 0 : index
    %255 = vector.load %arg6[%c0_109, %c1_110, %c0_111, %c0_112] : memref<2x2x32x32xf32, #tpu.memory_space<vmem>>, vector<1x1x32x32xf32>
    %256 = vector.shape_cast %255 : vector<1x1x32x32xf32> to vector<32x32xf32>
    %257 = arith.truncf %256 : vector<32x32xf32> to vector<32x32xbf16>
    %cst_113 = arith.constant dense<0.000000e+00> : vector<16x32xf32>
    %258 = tpu.matmul %254, %257, %cst_113 {dimension_numbers = #tpu.dot_dimension_numbers<[1], [0], [0], [1], [0, 0, 1, 1], [], []>} : vector<16x32xbf16>, vector<32x32xbf16>, vector<16x32xf32> -> vector<16x32xf32>
    %c0_114 = arith.constant 0 : index
    %c1_115 = arith.constant 1 : index
    %c0_116 = arith.constant 0 : index
    %c0_117 = arith.constant 0 : index
    %259 = vector.load %arg7[%c0_114, %c1_115, %c0_116, %c0_117] : memref<2x2x1x32xf32, #tpu.memory_space<vmem>>, vector<1x1x1x32xf32>
    %260 = vector.shape_cast %259 : vector<1x1x1x32xf32> to vector<1x32xf32>
    %261 = vector.broadcast %260 : vector<1x32xf32> to vector<16x32xf32>
    %262 = arith.addf %258, %261 : vector<16x32xf32>
    %263 = arith.addf %262, %188 : vector<16x32xf32>
    %c0_118 = arith.constant 0 : index
    %c1_119 = arith.constant 1 : index
    %c0_120 = arith.constant 0 : index
    %c0_121 = arith.constant 0 : index
    %264 = vector.load %arg8[%c0_118, %c1_119, %c0_120, %c0_121] : memref<2x2x1x32xf32, #tpu.memory_space<vmem>>, vector<1x1x1x32xf32>
    %265 = vector.shape_cast %264 : vector<1x1x1x32xf32> to vector<1x32xf32>
    %c0_122 = arith.constant 0 : index
    %c1_123 = arith.constant 1 : index
    %c0_124 = arith.constant 0 : index
    %c0_125 = arith.constant 0 : index
    %266 = vector.load %arg9[%c0_122, %c1_123, %c0_124, %c0_125] : memref<2x2x1x32xf32, #tpu.memory_space<vmem>>, vector<1x1x1x32xf32>
    %267 = vector.shape_cast %266 : vector<1x1x1x32xf32> to vector<1x32xf32>
    %cst_126 = arith.constant dense<0.000000e+00> : vector<16xf32>
    %268 = vector.multi_reduction <add>, %263, %cst_126 [1] : vector<16x32xf32> to vector<16xf32>
    %269 = vector.shape_cast %268 : vector<16xf32> to vector<16x1xf32>
    %cst_127 = arith.constant 3.200000e+01 : f32
    %270 = vector.broadcast %cst_127 : f32 to vector<16x1xf32>
    %271 = arith.divf %269, %270 : vector<16x1xf32>
    %272 = vector.broadcast %271 : vector<16x1xf32> to vector<16x32xf32>
    %273 = arith.subf %263, %272 : vector<16x32xf32>
    %274 = arith.mulf %273, %273 : vector<16x32xf32>
    %cst_128 = arith.constant dense<0.000000e+00> : vector<16xf32>
    %275 = vector.multi_reduction <add>, %274, %cst_128 [1] : vector<16x32xf32> to vector<16xf32>
    %276 = vector.shape_cast %275 : vector<16xf32> to vector<16x1xf32>
    %cst_129 = arith.constant 3.200000e+01 : f32
    %277 = vector.broadcast %cst_129 : f32 to vector<16x1xf32>
    %278 = arith.divf %276, %277 : vector<16x1xf32>
    %279 = vector.broadcast %271 : vector<16x1xf32> to vector<16x32xf32>
    %280 = arith.subf %263, %279 : vector<16x32xf32>
    %cst_130 = arith.constant 9.99999996E-13 : f32
    %281 = vector.broadcast %cst_130 : f32 to vector<16x1xf32>
    %282 = arith.addf %278, %281 : vector<16x1xf32>
    %283 = math.rsqrt %282 : vector<16x1xf32>
    %284 = vector.broadcast %283 : vector<16x1xf32> to vector<16x32xf32>
    %285 = arith.mulf %280, %284 : vector<16x32xf32>
    %286 = vector.broadcast %265 : vector<1x32xf32> to vector<16x32xf32>
    %287 = arith.mulf %285, %286 : vector<16x32xf32>
    %288 = vector.broadcast %267 : vector<1x32xf32> to vector<16x32xf32>
    %289 = arith.addf %287, %288 : vector<16x32xf32>
    %290 = arith.truncf %289 : vector<16x32xf32> to vector<16x32xbf16>
    %c0_131 = arith.constant 0 : index
    %c1_132 = arith.constant 1 : index
    %c0_133 = arith.constant 0 : index
    %c0_134 = arith.constant 0 : index
    %291 = vector.load %arg10[%c0_131, %c1_132, %c0_133, %c0_134] : memref<2x2x32x64xf32, #tpu.memory_space<vmem>>, vector<1x1x32x64xf32>
    %292 = vector.shape_cast %291 : vector<1x1x32x64xf32> to vector<32x64xf32>
    %293 = arith.truncf %292 : vector<32x64xf32> to vector<32x64xbf16>
    %cst_135 = arith.constant dense<0.000000e+00> : vector<16x64xf32>
    %294 = tpu.matmul %290, %293, %cst_135 {dimension_numbers = #tpu.dot_dimension_numbers<[1], [0], [0], [1], [0, 0, 1, 1], [], []>} : vector<16x32xbf16>, vector<32x64xbf16>, vector<16x64xf32> -> vector<16x64xf32>
    %c0_136 = arith.constant 0 : index
    %c1_137 = arith.constant 1 : index
    %c0_138 = arith.constant 0 : index
    %c0_139 = arith.constant 0 : index
    %295 = vector.load %arg11[%c0_136, %c1_137, %c0_138, %c0_139] : memref<2x2x1x64xf32, #tpu.memory_space<vmem>>, vector<1x1x1x64xf32>
    %296 = vector.shape_cast %295 : vector<1x1x1x64xf32> to vector<1x64xf32>
    %297 = vector.broadcast %296 : vector<1x64xf32> to vector<16x64xf32>
    %298 = arith.addf %294, %297 : vector<16x64xf32>
    %299 = arith.mulf %298, %298 : vector<16x64xf32>
    %300 = arith.mulf %298, %299 : vector<16x64xf32>
    %cst_140 = arith.constant 4.471500e-02 : f32
    %301 = vector.broadcast %cst_140 : f32 to vector<16x64xf32>
    %302 = arith.mulf %301, %300 : vector<16x64xf32>
    %303 = arith.addf %298, %302 : vector<16x64xf32>
    %cst_141 = arith.constant 0.797884583 : f32
    %304 = vector.broadcast %cst_141 : f32 to vector<16x64xf32>
    %305 = arith.mulf %304, %303 : vector<16x64xf32>
    %306 = math.tanh %305 : vector<16x64xf32>
    %cst_142 = arith.constant 1.000000e+00 : f32
    %307 = vector.broadcast %cst_142 : f32 to vector<16x64xf32>
    %308 = arith.addf %307, %306 : vector<16x64xf32>
    %cst_143 = arith.constant 5.000000e-01 : f32
    %309 = vector.broadcast %cst_143 : f32 to vector<16x64xf32>
    %310 = arith.mulf %309, %308 : vector<16x64xf32>
    %311 = arith.mulf %298, %310 : vector<16x64xf32>
    %312 = arith.truncf %311 : vector<16x64xf32> to vector<16x64xbf16>
    %c0_144 = arith.constant 0 : index
    %c1_145 = arith.constant 1 : index
    %c0_146 = arith.constant 0 : index
    %c0_147 = arith.constant 0 : index
    %313 = vector.load %arg12[%c0_144, %c1_145, %c0_146, %c0_147] : memref<2x2x64x32xf32, #tpu.memory_space<vmem>>, vector<1x1x64x32xf32>
    %314 = vector.shape_cast %313 : vector<1x1x64x32xf32> to vector<64x32xf32>
    %315 = arith.truncf %314 : vector<64x32xf32> to vector<64x32xbf16>
    %cst_148 = arith.constant dense<0.000000e+00> : vector<16x32xf32>
    %316 = tpu.matmul %312, %315, %cst_148 {dimension_numbers = #tpu.dot_dimension_numbers<[1], [0], [0], [1], [0, 0, 1, 1], [], []>} : vector<16x64xbf16>, vector<64x32xbf16>, vector<16x32xf32> -> vector<16x32xf32>
    %c0_149 = arith.constant 0 : index
    %c1_150 = arith.constant 1 : index
    %c0_151 = arith.constant 0 : index
    %c0_152 = arith.constant 0 : index
    %317 = vector.load %arg13[%c0_149, %c1_150, %c0_151, %c0_152] : memref<2x2x1x32xf32, #tpu.memory_space<vmem>>, vector<1x1x1x32xf32>
    %318 = vector.shape_cast %317 : vector<1x1x1x32xf32> to vector<1x32xf32>
    %319 = vector.broadcast %318 : vector<1x32xf32> to vector<16x32xf32>
    %320 = arith.addf %316, %319 : vector<16x32xf32>
    %321 = arith.addf %320, %289 : vector<16x32xf32>
    %c0_153 = arith.constant 0 : index
    %c1_154 = arith.constant 1 : index
    %c0_155 = arith.constant 0 : index
    %c0_156 = arith.constant 0 : index
    %322 = vector.load %arg14[%c0_153, %c1_154, %c0_155, %c0_156] : memref<2x2x1x32xf32, #tpu.memory_space<vmem>>, vector<1x1x1x32xf32>
    %323 = vector.shape_cast %322 : vector<1x1x1x32xf32> to vector<1x32xf32>
    %c0_157 = arith.constant 0 : index
    %c1_158 = arith.constant 1 : index
    %c0_159 = arith.constant 0 : index
    %c0_160 = arith.constant 0 : index
    %324 = vector.load %arg15[%c0_157, %c1_158, %c0_159, %c0_160] : memref<2x2x1x32xf32, #tpu.memory_space<vmem>>, vector<1x1x1x32xf32>
    %325 = vector.shape_cast %324 : vector<1x1x1x32xf32> to vector<1x32xf32>
    %cst_161 = arith.constant dense<0.000000e+00> : vector<16xf32>
    %326 = vector.multi_reduction <add>, %321, %cst_161 [1] : vector<16x32xf32> to vector<16xf32>
    %327 = vector.shape_cast %326 : vector<16xf32> to vector<16x1xf32>
    %cst_162 = arith.constant 3.200000e+01 : f32
    %328 = vector.broadcast %cst_162 : f32 to vector<16x1xf32>
    %329 = arith.divf %327, %328 : vector<16x1xf32>
    %330 = vector.broadcast %329 : vector<16x1xf32> to vector<16x32xf32>
    %331 = arith.subf %321, %330 : vector<16x32xf32>
    %332 = arith.mulf %331, %331 : vector<16x32xf32>
    %cst_163 = arith.constant dense<0.000000e+00> : vector<16xf32>
    %333 = vector.multi_reduction <add>, %332, %cst_163 [1] : vector<16x32xf32> to vector<16xf32>
    %334 = vector.shape_cast %333 : vector<16xf32> to vector<16x1xf32>
    %cst_164 = arith.constant 3.200000e+01 : f32
    %335 = vector.broadcast %cst_164 : f32 to vector<16x1xf32>
    %336 = arith.divf %334, %335 : vector<16x1xf32>
    %337 = vector.broadcast %329 : vector<16x1xf32> to vector<16x32xf32>
    %338 = arith.subf %321, %337 : vector<16x32xf32>
    %cst_165 = arith.constant 9.99999996E-13 : f32
    %339 = vector.broadcast %cst_165 : f32 to vector<16x1xf32>
    %340 = arith.addf %336, %339 : vector<16x1xf32>
    %341 = math.rsqrt %340 : vector<16x1xf32>
    %342 = vector.broadcast %341 : vector<16x1xf32> to vector<16x32xf32>
    %343 = arith.mulf %338, %342 : vector<16x32xf32>
    %344 = vector.broadcast %323 : vector<1x32xf32> to vector<16x32xf32>
    %345 = arith.mulf %343, %344 : vector<16x32xf32>
    %346 = vector.broadcast %325 : vector<1x32xf32> to vector<16x32xf32>
    %347 = arith.addf %345, %346 : vector<16x32xf32>
    %348 = vector.shape_cast %347 : vector<16x32xf32> to vector<2x8x32xf32>
    %349 = vector.extract_strided_slice %348 {offsets = [0, 0, 0], sizes = [2, 1, 32], strides = [1, 1, 1]} : vector<2x8x32xf32> to vector<2x1x32xf32>
    %350 = vector.shape_cast %349 : vector<2x1x32xf32> to vector<2x32xf32>
    %c1_166 = arith.constant 1 : index
    %c0_167 = arith.constant 0 : index
    %c0_168 = arith.constant 0 : index
    %351 = vector.load %arg0[%c1_166, %c0_167, %c0_168] : memref<2x16x32xf32, #tpu.memory_space<vmem>>, vector<1x16x32xf32>
    %352 = vector.shape_cast %351 : vector<1x16x32xf32> to vector<16x32xf32>
    %c1_169 = arith.constant 1 : index
    %c0_170 = arith.constant 0 : index
    %c0_171 = arith.constant 0 : index
    %353 = vector.load %arg1[%c1_169, %c0_170, %c0_171] : memref<2x2x8xf32, #tpu.memory_space<vmem>>, vector<1x2x8xf32>
    %354 = vector.shape_cast %353 : vector<1x2x8xf32> to vector<2x8xf32>
    %c1_172 = arith.constant 1 : index
    %c0_173 = arith.constant 0 : index
    %c0_174 = arith.constant 0 : index
    %355 = vector.load %arg2[%c1_172, %c0_173, %c0_174] : memref<2x1x32xf32, #tpu.memory_space<vmem>>, vector<1x1x32xf32>
    %356 = vector.shape_cast %355 : vector<1x1x32xf32> to vector<1x32xf32>
    %c1_175 = arith.constant 1 : index
    %c0_176 = arith.constant 0 : index
    %c0_177 = arith.constant 0 : index
    %357 = vector.load %arg3[%c1_175, %c0_176, %c0_177] : memref<2x1x32xf32, #tpu.memory_space<vmem>>, vector<1x1x32xf32>
    %358 = vector.shape_cast %357 : vector<1x1x32xf32> to vector<1x32xf32>
    %cst_178 = arith.constant dense<0.000000e+00> : vector<16xf32>
    %359 = vector.multi_reduction <add>, %352, %cst_178 [1] : vector<16x32xf32> to vector<16xf32>
    %360 = vector.shape_cast %359 : vector<16xf32> to vector<16x1xf32>
    %cst_179 = arith.constant 3.200000e+01 : f32
    %361 = vector.broadcast %cst_179 : f32 to vector<16x1xf32>
    %362 = arith.divf %360, %361 : vector<16x1xf32>
    %363 = vector.broadcast %362 : vector<16x1xf32> to vector<16x32xf32>
    %364 = arith.subf %352, %363 : vector<16x32xf32>
    %365 = arith.mulf %364, %364 : vector<16x32xf32>
    %cst_180 = arith.constant dense<0.000000e+00> : vector<16xf32>
    %366 = vector.multi_reduction <add>, %365, %cst_180 [1] : vector<16x32xf32> to vector<16xf32>
    %367 = vector.shape_cast %366 : vector<16xf32> to vector<16x1xf32>
    %cst_181 = arith.constant 3.200000e+01 : f32
    %368 = vector.broadcast %cst_181 : f32 to vector<16x1xf32>
    %369 = arith.divf %367, %368 : vector<16x1xf32>
    %370 = vector.broadcast %362 : vector<16x1xf32> to vector<16x32xf32>
    %371 = arith.subf %352, %370 : vector<16x32xf32>
    %cst_182 = arith.constant 9.99999996E-13 : f32
    %372 = vector.broadcast %cst_182 : f32 to vector<16x1xf32>
    %373 = arith.addf %369, %372 : vector<16x1xf32>
    %374 = math.rsqrt %373 : vector<16x1xf32>
    %375 = vector.broadcast %374 : vector<16x1xf32> to vector<16x32xf32>
    %376 = arith.mulf %371, %375 : vector<16x32xf32>
    %377 = vector.broadcast %356 : vector<1x32xf32> to vector<16x32xf32>
    %378 = arith.mulf %376, %377 : vector<16x32xf32>
    %379 = vector.broadcast %358 : vector<1x32xf32> to vector<16x32xf32>
    %380 = arith.addf %378, %379 : vector<16x32xf32>
    %381 = arith.truncf %380 : vector<16x32xf32> to vector<16x32xbf16>
    %c1_183 = arith.constant 1 : index
    %c0_184 = arith.constant 0 : index
    %c0_185 = arith.constant 0 : index
    %c0_186 = arith.constant 0 : index
    %382 = vector.load %arg4[%c1_183, %c0_184, %c0_185, %c0_186] : memref<2x2x32x96xf32, #tpu.memory_space<vmem>>, vector<1x1x32x96xf32>
    %383 = vector.shape_cast %382 : vector<1x1x32x96xf32> to vector<32x96xf32>
    %384 = arith.truncf %383 : vector<32x96xf32> to vector<32x96xbf16>
    %cst_187 = arith.constant dense<0.000000e+00> : vector<16x96xf32>
    %385 = tpu.matmul %381, %384, %cst_187 {dimension_numbers = #tpu.dot_dimension_numbers<[1], [0], [0], [1], [0, 0, 1, 1], [], []>} : vector<16x32xbf16>, vector<32x96xbf16>, vector<16x96xf32> -> vector<16x96xf32>
    %c1_188 = arith.constant 1 : index
    %c0_189 = arith.constant 0 : index
    %c0_190 = arith.constant 0 : index
    %c0_191 = arith.constant 0 : index
    %386 = vector.load %arg5[%c1_188, %c0_189, %c0_190, %c0_191] : memref<2x2x1x96xf32, #tpu.memory_space<vmem>>, vector<1x1x1x96xf32>
    %387 = vector.shape_cast %386 : vector<1x1x1x96xf32> to vector<1x96xf32>
    %388 = vector.broadcast %387 : vector<1x96xf32> to vector<16x96xf32>
    %389 = arith.addf %385, %388 : vector<16x96xf32>
    %390 = vector.extract_strided_slice %389 {offsets = [0, 0], sizes = [16, 32], strides = [1, 1]} : vector<16x96xf32> to vector<16x32xf32>
    %391 = vector.shape_cast %390 : vector<16x32xf32> to vector<2x8x32xf32>
    %392 = vector.extract_strided_slice %389 {offsets = [0, 32], sizes = [16, 32], strides = [1, 1]} : vector<16x96xf32> to vector<16x32xf32>
    %393 = vector.shape_cast %392 : vector<16x32xf32> to vector<2x8x32xf32>
    %394 = vector.extract_strided_slice %389 {offsets = [0, 64], sizes = [16, 32], strides = [1, 1]} : vector<16x96xf32> to vector<16x32xf32>
    %395 = vector.shape_cast %394 : vector<16x32xf32> to vector<2x8x32xf32>
    %396 = vector.extract_strided_slice %391 {offsets = [0, 0, 0], sizes = [2, 8, 16], strides = [1, 1, 1]} : vector<2x8x32xf32> to vector<2x8x16xf32>
    %397 = vector.extract_strided_slice %393 {offsets = [0, 0, 0], sizes = [2, 8, 16], strides = [1, 1, 1]} : vector<2x8x32xf32> to vector<2x8x16xf32>
    %398 = vector.extract_strided_slice %395 {offsets = [0, 0, 0], sizes = [2, 8, 16], strides = [1, 1, 1]} : vector<2x8x32xf32> to vector<2x8x16xf32>
    %399 = arith.truncf %396 : vector<2x8x16xf32> to vector<2x8x16xbf16>
    %400 = arith.truncf %397 : vector<2x8x16xf32> to vector<2x8x16xbf16>
    "tpu.trace_start"() <{level = 10 : i32, message = "bqd,bkd->bqk"}> : () -> ()
    %cst_192 = arith.constant dense<0.000000e+00> : vector<2x8x8xf32>
    %401 = tpu.matmul %399, %400, %cst_192 {dimension_numbers = #tpu.dot_dimension_numbers<[2], [2], [1], [1], [0, 0, 0, 1, 1, 1], [0], [0]>} : vector<2x8x16xbf16>, vector<2x8x16xbf16>, vector<2x8x8xf32> -> vector<2x8x8xf32>
    "tpu.trace_stop"() : () -> ()
    %cst_193 = arith.constant 2.500000e-01 : f32
    %402 = vector.broadcast %cst_193 : f32 to vector<2x8x8xf32>
    %403 = arith.mulf %401, %402 : vector<2x8x8xf32>
    %404 = vector.shape_cast %354 : vector<2x8xf32> to vector<2x1x8xf32>
    %405 = vector.broadcast %404 : vector<2x1x8xf32> to vector<2x8x8xf32>
    %406 = arith.addf %403, %405 : vector<2x8x8xf32>
    %cst_194 = arith.constant dense<0xFF800000> : vector<2x8xf32>
    %407 = vector.multi_reduction <maximumf>, %406, %cst_194 [2] : vector<2x8x8xf32> to vector<2x8xf32>
    %408 = vector.shape_cast %407 : vector<2x8xf32> to vector<2x8x1xf32>
    %409 = vector.broadcast %408 : vector<2x8x1xf32> to vector<2x8x8xf32>
    %410 = arith.subf %406, %409 : vector<2x8x8xf32>
    %411 = math.exp %410 : vector<2x8x8xf32>
    %cst_195 = arith.constant dense<0.000000e+00> : vector<2x8xf32>
    %412 = vector.multi_reduction <add>, %411, %cst_195 [2] : vector<2x8x8xf32> to vector<2x8xf32>
    %413 = vector.shape_cast %412 : vector<2x8xf32> to vector<2x8x1xf32>
    %414 = tpu.reciprocal %413 {approx = true} : vector<2x8x1xf32> -> vector<2x8x1xf32>
    %415 = vector.broadcast %414 : vector<2x8x1xf32> to vector<2x8x8xf32>
    %416 = arith.mulf %411, %415 : vector<2x8x8xf32>
    %417 = arith.truncf %416 : vector<2x8x8xf32> to vector<2x8x8xbf16>
    %418 = arith.truncf %398 : vector<2x8x16xf32> to vector<2x8x16xbf16>
    "tpu.trace_start"() <{level = 10 : i32, message = "bqk,bkd->bqd"}> : () -> ()
    %cst_196 = arith.constant dense<0.000000e+00> : vector<2x8x16xf32>
    %419 = tpu.matmul %417, %418, %cst_196 {dimension_numbers = #tpu.dot_dimension_numbers<[2], [1], [1], [2], [0, 0, 0, 1, 1, 2], [0], [0]>} : vector<2x8x8xbf16>, vector<2x8x16xbf16>, vector<2x8x16xf32> -> vector<2x8x16xf32>
    "tpu.trace_stop"() : () -> ()
    %420 = vector.extract_strided_slice %391 {offsets = [0, 0, 16], sizes = [2, 8, 16], strides = [1, 1, 1]} : vector<2x8x32xf32> to vector<2x8x16xf32>
    %421 = vector.extract_strided_slice %393 {offsets = [0, 0, 16], sizes = [2, 8, 16], strides = [1, 1, 1]} : vector<2x8x32xf32> to vector<2x8x16xf32>
    %422 = vector.extract_strided_slice %395 {offsets = [0, 0, 16], sizes = [2, 8, 16], strides = [1, 1, 1]} : vector<2x8x32xf32> to vector<2x8x16xf32>
    %423 = arith.truncf %420 : vector<2x8x16xf32> to vector<2x8x16xbf16>
    %424 = arith.truncf %421 : vector<2x8x16xf32> to vector<2x8x16xbf16>
    "tpu.trace_start"() <{level = 10 : i32, message = "bqd,bkd->bqk"}> : () -> ()
    %cst_197 = arith.constant dense<0.000000e+00> : vector<2x8x8xf32>
    %425 = tpu.matmul %423, %424, %cst_197 {dimension_numbers = #tpu.dot_dimension_numbers<[2], [2], [1], [1], [0, 0, 0, 1, 1, 1], [0], [0]>} : vector<2x8x16xbf16>, vector<2x8x16xbf16>, vector<2x8x8xf32> -> vector<2x8x8xf32>
    "tpu.trace_stop"() : () -> ()
    %cst_198 = arith.constant 2.500000e-01 : f32
    %426 = vector.broadcast %cst_198 : f32 to vector<2x8x8xf32>
    %427 = arith.mulf %425, %426 : vector<2x8x8xf32>
    %428 = vector.shape_cast %354 : vector<2x8xf32> to vector<2x1x8xf32>
    %429 = vector.broadcast %428 : vector<2x1x8xf32> to vector<2x8x8xf32>
    %430 = arith.addf %427, %429 : vector<2x8x8xf32>
    %cst_199 = arith.constant dense<0xFF800000> : vector<2x8xf32>
    %431 = vector.multi_reduction <maximumf>, %430, %cst_199 [2] : vector<2x8x8xf32> to vector<2x8xf32>
    %432 = vector.shape_cast %431 : vector<2x8xf32> to vector<2x8x1xf32>
    %433 = vector.broadcast %432 : vector<2x8x1xf32> to vector<2x8x8xf32>
    %434 = arith.subf %430, %433 : vector<2x8x8xf32>
    %435 = math.exp %434 : vector<2x8x8xf32>
    %cst_200 = arith.constant dense<0.000000e+00> : vector<2x8xf32>
    %436 = vector.multi_reduction <add>, %435, %cst_200 [2] : vector<2x8x8xf32> to vector<2x8xf32>
    %437 = vector.shape_cast %436 : vector<2x8xf32> to vector<2x8x1xf32>
    %438 = tpu.reciprocal %437 {approx = true} : vector<2x8x1xf32> -> vector<2x8x1xf32>
    %439 = vector.broadcast %438 : vector<2x8x1xf32> to vector<2x8x8xf32>
    %440 = arith.mulf %435, %439 : vector<2x8x8xf32>
    %441 = arith.truncf %440 : vector<2x8x8xf32> to vector<2x8x8xbf16>
    %442 = arith.truncf %422 : vector<2x8x16xf32> to vector<2x8x16xbf16>
    "tpu.trace_start"() <{level = 10 : i32, message = "bqk,bkd->bqd"}> : () -> ()
    %cst_201 = arith.constant dense<0.000000e+00> : vector<2x8x16xf32>
    %443 = tpu.matmul %441, %442, %cst_201 {dimension_numbers = #tpu.dot_dimension_numbers<[2], [1], [1], [2], [0, 0, 0, 1, 1, 2], [0], [0]>} : vector<2x8x8xbf16>, vector<2x8x16xbf16>, vector<2x8x16xf32> -> vector<2x8x16xf32>
    "tpu.trace_stop"() : () -> ()
    %444 = tpu.concatenate %419, %443 in 2 : vector<2x8x16xf32>, vector<2x8x16xf32> -> vector<2x8x32xf32>
    %445 = vector.shape_cast %444 : vector<2x8x32xf32> to vector<16x32xf32>
    %446 = arith.truncf %445 : vector<16x32xf32> to vector<16x32xbf16>
    %c1_202 = arith.constant 1 : index
    %c0_203 = arith.constant 0 : index
    %c0_204 = arith.constant 0 : index
    %c0_205 = arith.constant 0 : index
    %447 = vector.load %arg6[%c1_202, %c0_203, %c0_204, %c0_205] : memref<2x2x32x32xf32, #tpu.memory_space<vmem>>, vector<1x1x32x32xf32>
    %448 = vector.shape_cast %447 : vector<1x1x32x32xf32> to vector<32x32xf32>
    %449 = arith.truncf %448 : vector<32x32xf32> to vector<32x32xbf16>
    %cst_206 = arith.constant dense<0.000000e+00> : vector<16x32xf32>
    %450 = tpu.matmul %446, %449, %cst_206 {dimension_numbers = #tpu.dot_dimension_numbers<[1], [0], [0], [1], [0, 0, 1, 1], [], []>} : vector<16x32xbf16>, vector<32x32xbf16>, vector<16x32xf32> -> vector<16x32xf32>
    %c1_207 = arith.constant 1 : index
    %c0_208 = arith.constant 0 : index
    %c0_209 = arith.constant 0 : index
    %c0_210 = arith.constant 0 : index
    %451 = vector.load %arg7[%c1_207, %c0_208, %c0_209, %c0_210] : memref<2x2x1x32xf32, #tpu.memory_space<vmem>>, vector<1x1x1x32xf32>
    %452 = vector.shape_cast %451 : vector<1x1x1x32xf32> to vector<1x32xf32>
    %453 = vector.broadcast %452 : vector<1x32xf32> to vector<16x32xf32>
    %454 = arith.addf %450, %453 : vector<16x32xf32>
    %455 = arith.addf %454, %380 : vector<16x32xf32>
    %c1_211 = arith.constant 1 : index
    %c0_212 = arith.constant 0 : index
    %c0_213 = arith.constant 0 : index
    %c0_214 = arith.constant 0 : index
    %456 = vector.load %arg8[%c1_211, %c0_212, %c0_213, %c0_214] : memref<2x2x1x32xf32, #tpu.memory_space<vmem>>, vector<1x1x1x32xf32>
    %457 = vector.shape_cast %456 : vector<1x1x1x32xf32> to vector<1x32xf32>
    %c1_215 = arith.constant 1 : index
    %c0_216 = arith.constant 0 : index
    %c0_217 = arith.constant 0 : index
    %c0_218 = arith.constant 0 : index
    %458 = vector.load %arg9[%c1_215, %c0_216, %c0_217, %c0_218] : memref<2x2x1x32xf32, #tpu.memory_space<vmem>>, vector<1x1x1x32xf32>
    %459 = vector.shape_cast %458 : vector<1x1x1x32xf32> to vector<1x32xf32>
    %cst_219 = arith.constant dense<0.000000e+00> : vector<16xf32>
    %460 = vector.multi_reduction <add>, %455, %cst_219 [1] : vector<16x32xf32> to vector<16xf32>
    %461 = vector.shape_cast %460 : vector<16xf32> to vector<16x1xf32>
    %cst_220 = arith.constant 3.200000e+01 : f32
    %462 = vector.broadcast %cst_220 : f32 to vector<16x1xf32>
    %463 = arith.divf %461, %462 : vector<16x1xf32>
    %464 = vector.broadcast %463 : vector<16x1xf32> to vector<16x32xf32>
    %465 = arith.subf %455, %464 : vector<16x32xf32>
    %466 = arith.mulf %465, %465 : vector<16x32xf32>
    %cst_221 = arith.constant dense<0.000000e+00> : vector<16xf32>
    %467 = vector.multi_reduction <add>, %466, %cst_221 [1] : vector<16x32xf32> to vector<16xf32>
    %468 = vector.shape_cast %467 : vector<16xf32> to vector<16x1xf32>
    %cst_222 = arith.constant 3.200000e+01 : f32
    %469 = vector.broadcast %cst_222 : f32 to vector<16x1xf32>
    %470 = arith.divf %468, %469 : vector<16x1xf32>
    %471 = vector.broadcast %463 : vector<16x1xf32> to vector<16x32xf32>
    %472 = arith.subf %455, %471 : vector<16x32xf32>
    %cst_223 = arith.constant 9.99999996E-13 : f32
    %473 = vector.broadcast %cst_223 : f32 to vector<16x1xf32>
    %474 = arith.addf %470, %473 : vector<16x1xf32>
    %475 = math.rsqrt %474 : vector<16x1xf32>
    %476 = vector.broadcast %475 : vector<16x1xf32> to vector<16x32xf32>
    %477 = arith.mulf %472, %476 : vector<16x32xf32>
    %478 = vector.broadcast %457 : vector<1x32xf32> to vector<16x32xf32>
    %479 = arith.mulf %477, %478 : vector<16x32xf32>
    %480 = vector.broadcast %459 : vector<1x32xf32> to vector<16x32xf32>
    %481 = arith.addf %479, %480 : vector<16x32xf32>
    %482 = arith.truncf %481 : vector<16x32xf32> to vector<16x32xbf16>
    %c1_224 = arith.constant 1 : index
    %c0_225 = arith.constant 0 : index
    %c0_226 = arith.constant 0 : index
    %c0_227 = arith.constant 0 : index
    %483 = vector.load %arg10[%c1_224, %c0_225, %c0_226, %c0_227] : memref<2x2x32x64xf32, #tpu.memory_space<vmem>>, vector<1x1x32x64xf32>
    %484 = vector.shape_cast %483 : vector<1x1x32x64xf32> to vector<32x64xf32>
    %485 = arith.truncf %484 : vector<32x64xf32> to vector<32x64xbf16>
    %cst_228 = arith.constant dense<0.000000e+00> : vector<16x64xf32>
    %486 = tpu.matmul %482, %485, %cst_228 {dimension_numbers = #tpu.dot_dimension_numbers<[1], [0], [0], [1], [0, 0, 1, 1], [], []>} : vector<16x32xbf16>, vector<32x64xbf16>, vector<16x64xf32> -> vector<16x64xf32>
    %c1_229 = arith.constant 1 : index
    %c0_230 = arith.constant 0 : index
    %c0_231 = arith.constant 0 : index
    %c0_232 = arith.constant 0 : index
    %487 = vector.load %arg11[%c1_229, %c0_230, %c0_231, %c0_232] : memref<2x2x1x64xf32, #tpu.memory_space<vmem>>, vector<1x1x1x64xf32>
    %488 = vector.shape_cast %487 : vector<1x1x1x64xf32> to vector<1x64xf32>
    %489 = vector.broadcast %488 : vector<1x64xf32> to vector<16x64xf32>
    %490 = arith.addf %486, %489 : vector<16x64xf32>
    %491 = arith.mulf %490, %490 : vector<16x64xf32>
    %492 = arith.mulf %490, %491 : vector<16x64xf32>
    %cst_233 = arith.constant 4.471500e-02 : f32
    %493 = vector.broadcast %cst_233 : f32 to vector<16x64xf32>
    %494 = arith.mulf %493, %492 : vector<16x64xf32>
    %495 = arith.addf %490, %494 : vector<16x64xf32>
    %cst_234 = arith.constant 0.797884583 : f32
    %496 = vector.broadcast %cst_234 : f32 to vector<16x64xf32>
    %497 = arith.mulf %496, %495 : vector<16x64xf32>
    %498 = math.tanh %497 : vector<16x64xf32>
    %cst_235 = arith.constant 1.000000e+00 : f32
    %499 = vector.broadcast %cst_235 : f32 to vector<16x64xf32>
    %500 = arith.addf %499, %498 : vector<16x64xf32>
    %cst_236 = arith.constant 5.000000e-01 : f32
    %501 = vector.broadcast %cst_236 : f32 to vector<16x64xf32>
    %502 = arith.mulf %501, %500 : vector<16x64xf32>
    %503 = arith.mulf %490, %502 : vector<16x64xf32>
    %504 = arith.truncf %503 : vector<16x64xf32> to vector<16x64xbf16>
    %c1_237 = arith.constant 1 : index
    %c0_238 = arith.constant 0 : index
    %c0_239 = arith.constant 0 : index
    %c0_240 = arith.constant 0 : index
    %505 = vector.load %arg12[%c1_237, %c0_238, %c0_239, %c0_240] : memref<2x2x64x32xf32, #tpu.memory_space<vmem>>, vector<1x1x64x32xf32>
    %506 = vector.shape_cast %505 : vector<1x1x64x32xf32> to vector<64x32xf32>
    %507 = arith.truncf %506 : vector<64x32xf32> to vector<64x32xbf16>
    %cst_241 = arith.constant dense<0.000000e+00> : vector<16x32xf32>
    %508 = tpu.matmul %504, %507, %cst_241 {dimension_numbers = #tpu.dot_dimension_numbers<[1], [0], [0], [1], [0, 0, 1, 1], [], []>} : vector<16x64xbf16>, vector<64x32xbf16>, vector<16x32xf32> -> vector<16x32xf32>
    %c1_242 = arith.constant 1 : index
    %c0_243 = arith.constant 0 : index
    %c0_244 = arith.constant 0 : index
    %c0_245 = arith.constant 0 : index
    %509 = vector.load %arg13[%c1_242, %c0_243, %c0_244, %c0_245] : memref<2x2x1x32xf32, #tpu.memory_space<vmem>>, vector<1x1x1x32xf32>
    %510 = vector.shape_cast %509 : vector<1x1x1x32xf32> to vector<1x32xf32>
    %511 = vector.broadcast %510 : vector<1x32xf32> to vector<16x32xf32>
    %512 = arith.addf %508, %511 : vector<16x32xf32>
    %513 = arith.addf %512, %481 : vector<16x32xf32>
    %c1_246 = arith.constant 1 : index
    %c0_247 = arith.constant 0 : index
    %c0_248 = arith.constant 0 : index
    %c0_249 = arith.constant 0 : index
    %514 = vector.load %arg14[%c1_246, %c0_247, %c0_248, %c0_249] : memref<2x2x1x32xf32, #tpu.memory_space<vmem>>, vector<1x1x1x32xf32>
    %515 = vector.shape_cast %514 : vector<1x1x1x32xf32> to vector<1x32xf32>
    %c1_250 = arith.constant 1 : index
    %c0_251 = arith.constant 0 : index
    %c0_252 = arith.constant 0 : index
    %c0_253 = arith.constant 0 : index
    %516 = vector.load %arg15[%c1_250, %c0_251, %c0_252, %c0_253] : memref<2x2x1x32xf32, #tpu.memory_space<vmem>>, vector<1x1x1x32xf32>
    %517 = vector.shape_cast %516 : vector<1x1x1x32xf32> to vector<1x32xf32>
    %cst_254 = arith.constant dense<0.000000e+00> : vector<16xf32>
    %518 = vector.multi_reduction <add>, %513, %cst_254 [1] : vector<16x32xf32> to vector<16xf32>
    %519 = vector.shape_cast %518 : vector<16xf32> to vector<16x1xf32>
    %cst_255 = arith.constant 3.200000e+01 : f32
    %520 = vector.broadcast %cst_255 : f32 to vector<16x1xf32>
    %521 = arith.divf %519, %520 : vector<16x1xf32>
    %522 = vector.broadcast %521 : vector<16x1xf32> to vector<16x32xf32>
    %523 = arith.subf %513, %522 : vector<16x32xf32>
    %524 = arith.mulf %523, %523 : vector<16x32xf32>
    %cst_256 = arith.constant dense<0.000000e+00> : vector<16xf32>
    %525 = vector.multi_reduction <add>, %524, %cst_256 [1] : vector<16x32xf32> to vector<16xf32>
    %526 = vector.shape_cast %525 : vector<16xf32> to vector<16x1xf32>
    %cst_257 = arith.constant 3.200000e+01 : f32
    %527 = vector.broadcast %cst_257 : f32 to vector<16x1xf32>
    %528 = arith.divf %526, %527 : vector<16x1xf32>
    %529 = vector.broadcast %521 : vector<16x1xf32> to vector<16x32xf32>
    %530 = arith.subf %513, %529 : vector<16x32xf32>
    %cst_258 = arith.constant 9.99999996E-13 : f32
    %531 = vector.broadcast %cst_258 : f32 to vector<16x1xf32>
    %532 = arith.addf %528, %531 : vector<16x1xf32>
    %533 = math.rsqrt %532 : vector<16x1xf32>
    %534 = vector.broadcast %533 : vector<16x1xf32> to vector<16x32xf32>
    %535 = arith.mulf %530, %534 : vector<16x32xf32>
    %536 = vector.broadcast %515 : vector<1x32xf32> to vector<16x32xf32>
    %537 = arith.mulf %535, %536 : vector<16x32xf32>
    %538 = vector.broadcast %517 : vector<1x32xf32> to vector<16x32xf32>
    %539 = arith.addf %537, %538 : vector<16x32xf32>
    %540 = arith.truncf %539 : vector<16x32xf32> to vector<16x32xbf16>
    %c1_259 = arith.constant 1 : index
    %c1_260 = arith.constant 1 : index
    %c0_261 = arith.constant 0 : index
    %c0_262 = arith.constant 0 : index
    %541 = vector.load %arg4[%c1_259, %c1_260, %c0_261, %c0_262] : memref<2x2x32x96xf32, #tpu.memory_space<vmem>>, vector<1x1x32x96xf32>
    %542 = vector.shape_cast %541 : vector<1x1x32x96xf32> to vector<32x96xf32>
    %543 = arith.truncf %542 : vector<32x96xf32> to vector<32x96xbf16>
    %cst_263 = arith.constant dense<0.000000e+00> : vector<16x96xf32>
    %544 = tpu.matmul %540, %543, %cst_263 {dimension_numbers = #tpu.dot_dimension_numbers<[1], [0], [0], [1], [0, 0, 1, 1], [], []>} : vector<16x32xbf16>, vector<32x96xbf16>, vector<16x96xf32> -> vector<16x96xf32>
    %c1_264 = arith.constant 1 : index
    %c1_265 = arith.constant 1 : index
    %c0_266 = arith.constant 0 : index
    %c0_267 = arith.constant 0 : index
    %545 = vector.load %arg5[%c1_264, %c1_265, %c0_266, %c0_267] : memref<2x2x1x96xf32, #tpu.memory_space<vmem>>, vector<1x1x1x96xf32>
    %546 = vector.shape_cast %545 : vector<1x1x1x96xf32> to vector<1x96xf32>
    %547 = vector.broadcast %546 : vector<1x96xf32> to vector<16x96xf32>
    %548 = arith.addf %544, %547 : vector<16x96xf32>
    %549 = vector.extract_strided_slice %548 {offsets = [0, 0], sizes = [16, 32], strides = [1, 1]} : vector<16x96xf32> to vector<16x32xf32>
    %550 = vector.shape_cast %549 : vector<16x32xf32> to vector<2x8x32xf32>
    %551 = vector.extract_strided_slice %548 {offsets = [0, 32], sizes = [16, 32], strides = [1, 1]} : vector<16x96xf32> to vector<16x32xf32>
    %552 = vector.shape_cast %551 : vector<16x32xf32> to vector<2x8x32xf32>
    %553 = vector.extract_strided_slice %548 {offsets = [0, 64], sizes = [16, 32], strides = [1, 1]} : vector<16x96xf32> to vector<16x32xf32>
    %554 = vector.shape_cast %553 : vector<16x32xf32> to vector<2x8x32xf32>
    %555 = vector.extract_strided_slice %550 {offsets = [0, 0, 0], sizes = [2, 8, 16], strides = [1, 1, 1]} : vector<2x8x32xf32> to vector<2x8x16xf32>
    %556 = vector.extract_strided_slice %552 {offsets = [0, 0, 0], sizes = [2, 8, 16], strides = [1, 1, 1]} : vector<2x8x32xf32> to vector<2x8x16xf32>
    %557 = vector.extract_strided_slice %554 {offsets = [0, 0, 0], sizes = [2, 8, 16], strides = [1, 1, 1]} : vector<2x8x32xf32> to vector<2x8x16xf32>
    %558 = arith.truncf %555 : vector<2x8x16xf32> to vector<2x8x16xbf16>
    %559 = arith.truncf %556 : vector<2x8x16xf32> to vector<2x8x16xbf16>
    "tpu.trace_start"() <{level = 10 : i32, message = "bqd,bkd->bqk"}> : () -> ()
    %cst_268 = arith.constant dense<0.000000e+00> : vector<2x8x8xf32>
    %560 = tpu.matmul %558, %559, %cst_268 {dimension_numbers = #tpu.dot_dimension_numbers<[2], [2], [1], [1], [0, 0, 0, 1, 1, 1], [0], [0]>} : vector<2x8x16xbf16>, vector<2x8x16xbf16>, vector<2x8x8xf32> -> vector<2x8x8xf32>
    "tpu.trace_stop"() : () -> ()
    %cst_269 = arith.constant 2.500000e-01 : f32
    %561 = vector.broadcast %cst_269 : f32 to vector<2x8x8xf32>
    %562 = arith.mulf %560, %561 : vector<2x8x8xf32>
    %563 = vector.shape_cast %354 : vector<2x8xf32> to vector<2x1x8xf32>
    %564 = vector.broadcast %563 : vector<2x1x8xf32> to vector<2x8x8xf32>
    %565 = arith.addf %562, %564 : vector<2x8x8xf32>
    %cst_270 = arith.constant dense<0xFF800000> : vector<2x8xf32>
    %566 = vector.multi_reduction <maximumf>, %565, %cst_270 [2] : vector<2x8x8xf32> to vector<2x8xf32>
    %567 = vector.shape_cast %566 : vector<2x8xf32> to vector<2x8x1xf32>
    %568 = vector.broadcast %567 : vector<2x8x1xf32> to vector<2x8x8xf32>
    %569 = arith.subf %565, %568 : vector<2x8x8xf32>
    %570 = math.exp %569 : vector<2x8x8xf32>
    %cst_271 = arith.constant dense<0.000000e+00> : vector<2x8xf32>
    %571 = vector.multi_reduction <add>, %570, %cst_271 [2] : vector<2x8x8xf32> to vector<2x8xf32>
    %572 = vector.shape_cast %571 : vector<2x8xf32> to vector<2x8x1xf32>
    %573 = tpu.reciprocal %572 {approx = true} : vector<2x8x1xf32> -> vector<2x8x1xf32>
    %574 = vector.broadcast %573 : vector<2x8x1xf32> to vector<2x8x8xf32>
    %575 = arith.mulf %570, %574 : vector<2x8x8xf32>
    %576 = arith.truncf %575 : vector<2x8x8xf32> to vector<2x8x8xbf16>
    %577 = arith.truncf %557 : vector<2x8x16xf32> to vector<2x8x16xbf16>
    "tpu.trace_start"() <{level = 10 : i32, message = "bqk,bkd->bqd"}> : () -> ()
    %cst_272 = arith.constant dense<0.000000e+00> : vector<2x8x16xf32>
    %578 = tpu.matmul %576, %577, %cst_272 {dimension_numbers = #tpu.dot_dimension_numbers<[2], [1], [1], [2], [0, 0, 0, 1, 1, 2], [0], [0]>} : vector<2x8x8xbf16>, vector<2x8x16xbf16>, vector<2x8x16xf32> -> vector<2x8x16xf32>
    "tpu.trace_stop"() : () -> ()
    %579 = vector.extract_strided_slice %550 {offsets = [0, 0, 16], sizes = [2, 8, 16], strides = [1, 1, 1]} : vector<2x8x32xf32> to vector<2x8x16xf32>
    %580 = vector.extract_strided_slice %552 {offsets = [0, 0, 16], sizes = [2, 8, 16], strides = [1, 1, 1]} : vector<2x8x32xf32> to vector<2x8x16xf32>
    %581 = vector.extract_strided_slice %554 {offsets = [0, 0, 16], sizes = [2, 8, 16], strides = [1, 1, 1]} : vector<2x8x32xf32> to vector<2x8x16xf32>
    %582 = arith.truncf %579 : vector<2x8x16xf32> to vector<2x8x16xbf16>
    %583 = arith.truncf %580 : vector<2x8x16xf32> to vector<2x8x16xbf16>
    "tpu.trace_start"() <{level = 10 : i32, message = "bqd,bkd->bqk"}> : () -> ()
    %cst_273 = arith.constant dense<0.000000e+00> : vector<2x8x8xf32>
    %584 = tpu.matmul %582, %583, %cst_273 {dimension_numbers = #tpu.dot_dimension_numbers<[2], [2], [1], [1], [0, 0, 0, 1, 1, 1], [0], [0]>} : vector<2x8x16xbf16>, vector<2x8x16xbf16>, vector<2x8x8xf32> -> vector<2x8x8xf32>
    "tpu.trace_stop"() : () -> ()
    %cst_274 = arith.constant 2.500000e-01 : f32
    %585 = vector.broadcast %cst_274 : f32 to vector<2x8x8xf32>
    %586 = arith.mulf %584, %585 : vector<2x8x8xf32>
    %587 = vector.shape_cast %354 : vector<2x8xf32> to vector<2x1x8xf32>
    %588 = vector.broadcast %587 : vector<2x1x8xf32> to vector<2x8x8xf32>
    %589 = arith.addf %586, %588 : vector<2x8x8xf32>
    %cst_275 = arith.constant dense<0xFF800000> : vector<2x8xf32>
    %590 = vector.multi_reduction <maximumf>, %589, %cst_275 [2] : vector<2x8x8xf32> to vector<2x8xf32>
    %591 = vector.shape_cast %590 : vector<2x8xf32> to vector<2x8x1xf32>
    %592 = vector.broadcast %591 : vector<2x8x1xf32> to vector<2x8x8xf32>
    %593 = arith.subf %589, %592 : vector<2x8x8xf32>
    %594 = math.exp %593 : vector<2x8x8xf32>
    %cst_276 = arith.constant dense<0.000000e+00> : vector<2x8xf32>
    %595 = vector.multi_reduction <add>, %594, %cst_276 [2] : vector<2x8x8xf32> to vector<2x8xf32>
    %596 = vector.shape_cast %595 : vector<2x8xf32> to vector<2x8x1xf32>
    %597 = tpu.reciprocal %596 {approx = true} : vector<2x8x1xf32> -> vector<2x8x1xf32>
    %598 = vector.broadcast %597 : vector<2x8x1xf32> to vector<2x8x8xf32>
    %599 = arith.mulf %594, %598 : vector<2x8x8xf32>
    %600 = arith.truncf %599 : vector<2x8x8xf32> to vector<2x8x8xbf16>
    %601 = arith.truncf %581 : vector<2x8x16xf32> to vector<2x8x16xbf16>
    "tpu.trace_start"() <{level = 10 : i32, message = "bqk,bkd->bqd"}> : () -> ()
    %cst_277 = arith.constant dense<0.000000e+00> : vector<2x8x16xf32>
    %602 = tpu.matmul %600, %601, %cst_277 {dimension_numbers = #tpu.dot_dimension_numbers<[2], [1], [1], [2], [0, 0, 0, 1, 1, 2], [0], [0]>} : vector<2x8x8xbf16>, vector<2x8x16xbf16>, vector<2x8x16xf32> -> vector<2x8x16xf32>
    "tpu.trace_stop"() : () -> ()
    %603 = tpu.concatenate %578, %602 in 2 : vector<2x8x16xf32>, vector<2x8x16xf32> -> vector<2x8x32xf32>
    %604 = vector.shape_cast %603 : vector<2x8x32xf32> to vector<16x32xf32>
    %605 = arith.truncf %604 : vector<16x32xf32> to vector<16x32xbf16>
    %c1_278 = arith.constant 1 : index
    %c1_279 = arith.constant 1 : index
    %c0_280 = arith.constant 0 : index
    %c0_281 = arith.constant 0 : index
    %606 = vector.load %arg6[%c1_278, %c1_279, %c0_280, %c0_281] : memref<2x2x32x32xf32, #tpu.memory_space<vmem>>, vector<1x1x32x32xf32>
    %607 = vector.shape_cast %606 : vector<1x1x32x32xf32> to vector<32x32xf32>
    %608 = arith.truncf %607 : vector<32x32xf32> to vector<32x32xbf16>
    %cst_282 = arith.constant dense<0.000000e+00> : vector<16x32xf32>
    %609 = tpu.matmul %605, %608, %cst_282 {dimension_numbers = #tpu.dot_dimension_numbers<[1], [0], [0], [1], [0, 0, 1, 1], [], []>} : vector<16x32xbf16>, vector<32x32xbf16>, vector<16x32xf32> -> vector<16x32xf32>
    %c1_283 = arith.constant 1 : index
    %c1_284 = arith.constant 1 : index
    %c0_285 = arith.constant 0 : index
    %c0_286 = arith.constant 0 : index
    %610 = vector.load %arg7[%c1_283, %c1_284, %c0_285, %c0_286] : memref<2x2x1x32xf32, #tpu.memory_space<vmem>>, vector<1x1x1x32xf32>
    %611 = vector.shape_cast %610 : vector<1x1x1x32xf32> to vector<1x32xf32>
    %612 = vector.broadcast %611 : vector<1x32xf32> to vector<16x32xf32>
    %613 = arith.addf %609, %612 : vector<16x32xf32>
    %614 = arith.addf %613, %539 : vector<16x32xf32>
    %c1_287 = arith.constant 1 : index
    %c1_288 = arith.constant 1 : index
    %c0_289 = arith.constant 0 : index
    %c0_290 = arith.constant 0 : index
    %615 = vector.load %arg8[%c1_287, %c1_288, %c0_289, %c0_290] : memref<2x2x1x32xf32, #tpu.memory_space<vmem>>, vector<1x1x1x32xf32>
    %616 = vector.shape_cast %615 : vector<1x1x1x32xf32> to vector<1x32xf32>
    %c1_291 = arith.constant 1 : index
    %c1_292 = arith.constant 1 : index
    %c0_293 = arith.constant 0 : index
    %c0_294 = arith.constant 0 : index
    %617 = vector.load %arg9[%c1_291, %c1_292, %c0_293, %c0_294] : memref<2x2x1x32xf32, #tpu.memory_space<vmem>>, vector<1x1x1x32xf32>
    %618 = vector.shape_cast %617 : vector<1x1x1x32xf32> to vector<1x32xf32>
    %cst_295 = arith.constant dense<0.000000e+00> : vector<16xf32>
    %619 = vector.multi_reduction <add>, %614, %cst_295 [1] : vector<16x32xf32> to vector<16xf32>
    %620 = vector.shape_cast %619 : vector<16xf32> to vector<16x1xf32>
    %cst_296 = arith.constant 3.200000e+01 : f32
    %621 = vector.broadcast %cst_296 : f32 to vector<16x1xf32>
    %622 = arith.divf %620, %621 : vector<16x1xf32>
    %623 = vector.broadcast %622 : vector<16x1xf32> to vector<16x32xf32>
    %624 = arith.subf %614, %623 : vector<16x32xf32>
    %625 = arith.mulf %624, %624 : vector<16x32xf32>
    %cst_297 = arith.constant dense<0.000000e+00> : vector<16xf32>
    %626 = vector.multi_reduction <add>, %625, %cst_297 [1] : vector<16x32xf32> to vector<16xf32>
    %627 = vector.shape_cast %626 : vector<16xf32> to vector<16x1xf32>
    %cst_298 = arith.constant 3.200000e+01 : f32
    %628 = vector.broadcast %cst_298 : f32 to vector<16x1xf32>
    %629 = arith.divf %627, %628 : vector<16x1xf32>
    %630 = vector.broadcast %622 : vector<16x1xf32> to vector<16x32xf32>
    %631 = arith.subf %614, %630 : vector<16x32xf32>
    %cst_299 = arith.constant 9.99999996E-13 : f32
    %632 = vector.broadcast %cst_299 : f32 to vector<16x1xf32>
    %633 = arith.addf %629, %632 : vector<16x1xf32>
    %634 = math.rsqrt %633 : vector<16x1xf32>
    %635 = vector.broadcast %634 : vector<16x1xf32> to vector<16x32xf32>
    %636 = arith.mulf %631, %635 : vector<16x32xf32>
    %637 = vector.broadcast %616 : vector<1x32xf32> to vector<16x32xf32>
    %638 = arith.mulf %636, %637 : vector<16x32xf32>
    %639 = vector.broadcast %618 : vector<1x32xf32> to vector<16x32xf32>
    %640 = arith.addf %638, %639 : vector<16x32xf32>
    %641 = arith.truncf %640 : vector<16x32xf32> to vector<16x32xbf16>
    %c1_300 = arith.constant 1 : index
    %c1_301 = arith.constant 1 : index
    %c0_302 = arith.constant 0 : index
    %c0_303 = arith.constant 0 : index
    %642 = vector.load %arg10[%c1_300, %c1_301, %c0_302, %c0_303] : memref<2x2x32x64xf32, #tpu.memory_space<vmem>>, vector<1x1x32x64xf32>
    %643 = vector.shape_cast %642 : vector<1x1x32x64xf32> to vector<32x64xf32>
    %644 = arith.truncf %643 : vector<32x64xf32> to vector<32x64xbf16>
    %cst_304 = arith.constant dense<0.000000e+00> : vector<16x64xf32>
    %645 = tpu.matmul %641, %644, %cst_304 {dimension_numbers = #tpu.dot_dimension_numbers<[1], [0], [0], [1], [0, 0, 1, 1], [], []>} : vector<16x32xbf16>, vector<32x64xbf16>, vector<16x64xf32> -> vector<16x64xf32>
    %c1_305 = arith.constant 1 : index
    %c1_306 = arith.constant 1 : index
    %c0_307 = arith.constant 0 : index
    %c0_308 = arith.constant 0 : index
    %646 = vector.load %arg11[%c1_305, %c1_306, %c0_307, %c0_308] : memref<2x2x1x64xf32, #tpu.memory_space<vmem>>, vector<1x1x1x64xf32>
    %647 = vector.shape_cast %646 : vector<1x1x1x64xf32> to vector<1x64xf32>
    %648 = vector.broadcast %647 : vector<1x64xf32> to vector<16x64xf32>
    %649 = arith.addf %645, %648 : vector<16x64xf32>
    %650 = arith.mulf %649, %649 : vector<16x64xf32>
    %651 = arith.mulf %649, %650 : vector<16x64xf32>
    %cst_309 = arith.constant 4.471500e-02 : f32
    %652 = vector.broadcast %cst_309 : f32 to vector<16x64xf32>
    %653 = arith.mulf %652, %651 : vector<16x64xf32>
    %654 = arith.addf %649, %653 : vector<16x64xf32>
    %cst_310 = arith.constant 0.797884583 : f32
    %655 = vector.broadcast %cst_310 : f32 to vector<16x64xf32>
    %656 = arith.mulf %655, %654 : vector<16x64xf32>
    %657 = math.tanh %656 : vector<16x64xf32>
    %cst_311 = arith.constant 1.000000e+00 : f32
    %658 = vector.broadcast %cst_311 : f32 to vector<16x64xf32>
    %659 = arith.addf %658, %657 : vector<16x64xf32>
    %cst_312 = arith.constant 5.000000e-01 : f32
    %660 = vector.broadcast %cst_312 : f32 to vector<16x64xf32>
    %661 = arith.mulf %660, %659 : vector<16x64xf32>
    %662 = arith.mulf %649, %661 : vector<16x64xf32>
    %663 = arith.truncf %662 : vector<16x64xf32> to vector<16x64xbf16>
    %c1_313 = arith.constant 1 : index
    %c1_314 = arith.constant 1 : index
    %c0_315 = arith.constant 0 : index
    %c0_316 = arith.constant 0 : index
    %664 = vector.load %arg12[%c1_313, %c1_314, %c0_315, %c0_316] : memref<2x2x64x32xf32, #tpu.memory_space<vmem>>, vector<1x1x64x32xf32>
    %665 = vector.shape_cast %664 : vector<1x1x64x32xf32> to vector<64x32xf32>
    %666 = arith.truncf %665 : vector<64x32xf32> to vector<64x32xbf16>
    %cst_317 = arith.constant dense<0.000000e+00> : vector<16x32xf32>
    %667 = tpu.matmul %663, %666, %cst_317 {dimension_numbers = #tpu.dot_dimension_numbers<[1], [0], [0], [1], [0, 0, 1, 1], [], []>} : vector<16x64xbf16>, vector<64x32xbf16>, vector<16x32xf32> -> vector<16x32xf32>
    %c1_318 = arith.constant 1 : index
    %c1_319 = arith.constant 1 : index
    %c0_320 = arith.constant 0 : index
    %c0_321 = arith.constant 0 : index
    %668 = vector.load %arg13[%c1_318, %c1_319, %c0_320, %c0_321] : memref<2x2x1x32xf32, #tpu.memory_space<vmem>>, vector<1x1x1x32xf32>
    %669 = vector.shape_cast %668 : vector<1x1x1x32xf32> to vector<1x32xf32>
    %670 = vector.broadcast %669 : vector<1x32xf32> to vector<16x32xf32>
    %671 = arith.addf %667, %670 : vector<16x32xf32>
    %672 = arith.addf %671, %640 : vector<16x32xf32>
    %c1_322 = arith.constant 1 : index
    %c1_323 = arith.constant 1 : index
    %c0_324 = arith.constant 0 : index
    %c0_325 = arith.constant 0 : index
    %673 = vector.load %arg14[%c1_322, %c1_323, %c0_324, %c0_325] : memref<2x2x1x32xf32, #tpu.memory_space<vmem>>, vector<1x1x1x32xf32>
    %674 = vector.shape_cast %673 : vector<1x1x1x32xf32> to vector<1x32xf32>
    %c1_326 = arith.constant 1 : index
    %c1_327 = arith.constant 1 : index
    %c0_328 = arith.constant 0 : index
    %c0_329 = arith.constant 0 : index
    %675 = vector.load %arg15[%c1_326, %c1_327, %c0_328, %c0_329] : memref<2x2x1x32xf32, #tpu.memory_space<vmem>>, vector<1x1x1x32xf32>
    %676 = vector.shape_cast %675 : vector<1x1x1x32xf32> to vector<1x32xf32>
    %cst_330 = arith.constant dense<0.000000e+00> : vector<16xf32>
    %677 = vector.multi_reduction <add>, %672, %cst_330 [1] : vector<16x32xf32> to vector<16xf32>
    %678 = vector.shape_cast %677 : vector<16xf32> to vector<16x1xf32>
    %cst_331 = arith.constant 3.200000e+01 : f32
    %679 = vector.broadcast %cst_331 : f32 to vector<16x1xf32>
    %680 = arith.divf %678, %679 : vector<16x1xf32>
    %681 = vector.broadcast %680 : vector<16x1xf32> to vector<16x32xf32>
    %682 = arith.subf %672, %681 : vector<16x32xf32>
    %683 = arith.mulf %682, %682 : vector<16x32xf32>
    %cst_332 = arith.constant dense<0.000000e+00> : vector<16xf32>
    %684 = vector.multi_reduction <add>, %683, %cst_332 [1] : vector<16x32xf32> to vector<16xf32>
    %685 = vector.shape_cast %684 : vector<16xf32> to vector<16x1xf32>
    %cst_333 = arith.constant 3.200000e+01 : f32
    %686 = vector.broadcast %cst_333 : f32 to vector<16x1xf32>
    %687 = arith.divf %685, %686 : vector<16x1xf32>
    %688 = vector.broadcast %680 : vector<16x1xf32> to vector<16x32xf32>
    %689 = arith.subf %672, %688 : vector<16x32xf32>
    %cst_334 = arith.constant 9.99999996E-13 : f32
    %690 = vector.broadcast %cst_334 : f32 to vector<16x1xf32>
    %691 = arith.addf %687, %690 : vector<16x1xf32>
    %692 = math.rsqrt %691 : vector<16x1xf32>
    %693 = vector.broadcast %692 : vector<16x1xf32> to vector<16x32xf32>
    %694 = arith.mulf %689, %693 : vector<16x32xf32>
    %695 = vector.broadcast %674 : vector<1x32xf32> to vector<16x32xf32>
    %696 = arith.mulf %694, %695 : vector<16x32xf32>
    %697 = vector.broadcast %676 : vector<1x32xf32> to vector<16x32xf32>
    %698 = arith.addf %696, %697 : vector<16x32xf32>
    %699 = vector.shape_cast %698 : vector<16x32xf32> to vector<2x8x32xf32>
    %700 = vector.extract_strided_slice %699 {offsets = [0, 0, 0], sizes = [2, 1, 32], strides = [1, 1, 1]} : vector<2x8x32xf32> to vector<2x1x32xf32>
    %701 = vector.shape_cast %700 : vector<2x1x32xf32> to vector<2x32xf32>
    %702 = arith.truncf %350 : vector<2x32xf32> to vector<2x32xbf16>
    %c0_335 = arith.constant 0 : index
    %c0_336 = arith.constant 0 : index
    %c0_337 = arith.constant 0 : index
    %703 = vector.load %arg16[%c0_335, %c0_336, %c0_337] : memref<2x32x32xf32, #tpu.memory_space<vmem>>, vector<1x32x32xf32>
    %704 = vector.shape_cast %703 : vector<1x32x32xf32> to vector<32x32xf32>
    %705 = arith.truncf %704 : vector<32x32xf32> to vector<32x32xbf16>
    %cst_338 = arith.constant dense<0.000000e+00> : vector<2x32xf32>
    %706 = tpu.matmul %702, %705, %cst_338 {dimension_numbers = #tpu.dot_dimension_numbers<[1], [0], [0], [1], [0, 0, 1, 1], [], []>} : vector<2x32xbf16>, vector<32x32xbf16>, vector<2x32xf32> -> vector<2x32xf32>
    %707 = arith.truncf %701 : vector<2x32xf32> to vector<2x32xbf16>
    %c1_339 = arith.constant 1 : index
    %c0_340 = arith.constant 0 : index
    %c0_341 = arith.constant 0 : index
    %708 = vector.load %arg16[%c1_339, %c0_340, %c0_341] : memref<2x32x32xf32, #tpu.memory_space<vmem>>, vector<1x32x32xf32>
    %709 = vector.shape_cast %708 : vector<1x32x32xf32> to vector<32x32xf32>
    %710 = arith.truncf %709 : vector<32x32xf32> to vector<32x32xbf16>
    %cst_342 = arith.constant dense<0.000000e+00> : vector<2x32xf32>
    %711 = tpu.matmul %707, %710, %cst_342 {dimension_numbers = #tpu.dot_dimension_numbers<[1], [0], [0], [1], [0, 0, 1, 1], [], []>} : vector<2x32xbf16>, vector<32x32xbf16>, vector<2x32xf32> -> vector<2x32xf32>
    %712 = arith.addf %706, %711 : vector<2x32xf32>
    %c0_343 = arith.constant 0 : index
    %c0_344 = arith.constant 0 : index
    %713 = vector.load %arg17[%c0_343, %c0_344] : memref<1x32xf32, #tpu.memory_space<vmem>>, vector<1x32xf32>
    %714 = vector.broadcast %713 : vector<1x32xf32> to vector<2x32xf32>
    %715 = arith.addf %712, %714 : vector<2x32xf32>
    %716 = arith.truncf %715 : vector<2x32xf32> to vector<2x32xbf16>
    %c0_345 = arith.constant 0 : index
    %c0_346 = arith.constant 0 : index
    %717 = vector.load %arg18[%c0_345, %c0_346] : memref<32x1xf32, #tpu.memory_space<vmem>>, vector<32x1xf32>
    %718 = arith.truncf %717 : vector<32x1xf32> to vector<32x1xbf16>
    %cst_347 = arith.constant dense<0.000000e+00> : vector<2x1xf32>
    %719 = tpu.matmul %716, %718, %cst_347 {dimension_numbers = #tpu.dot_dimension_numbers<[1], [0], [0], [1], [0, 0, 1, 1], [], []>} : vector<2x32xbf16>, vector<32x1xbf16>, vector<2x1xf32> -> vector<2x1xf32>
    %c0_348 = arith.constant 0 : index
    %c0_349 = arith.constant 0 : index
    %720 = vector.load %arg19[%c0_348, %c0_349] : memref<1x1xf32, #tpu.memory_space<vmem>>, vector<1x1xf32>
    %721 = vector.broadcast %720 : vector<1x1xf32> to vector<2x1xf32>
    %722 = arith.addf %719, %721 : vector<2x1xf32>
    %c0_350 = arith.constant 0 : index
    %c0_351 = arith.constant 0 : index
    %723 = vector.load %arg20[%c0_350, %c0_351] : memref<2x1xf32, #tpu.memory_space<vmem>>, vector<2x1xf32>
    tpu.vector_store %arg20[%c0_350, %c0_351], %722 {strides = array<i32>} : memref<2x1xf32, #tpu.memory_space<vmem>>, vector<2x1xf32>,
    return
  }
}

</mosaic_0001>

<bundles_post_ra>
// kernel: code_markdown_forward.1
= control target key start
LH: loop header
LB: loop body
LE: loop exit
PB: predicated region body
PF: predicated region fallthrough
CT: control target
= control target key end

     0   :  { %vm73_vm0 = vcmask 261120   ;;  %v4509_v14 = vmov 0.0   ;;  %vm4510_vm1 = vmmov 0   ;;  %vm180_vm2 = vcmask 130048   ;;  %s5639_s21 = smov 80   ;;  %s5635_s24 = smov 48   ;;  %s5609_s0 = inlined_call_operand.vmem [shape: f32[2,16,32], index: 0, kind: input, shape index: {}]   ;;  %s5610_s4 = inlined_call_operand.vmem [shape: f32[2,2,32,96], index: 4, kind: input, shape index: {}]   ;;  %s5611_s2 = inlined_call_operand.vmem [shape: f32[2,1,32], index: 2, kind: input, shape index: {}]   ;;  %s5612_s3 = inlined_call_operand.vmem [shape: f32[2,1,32], index: 3, kind: input, shape index: {}]   ;;  %s5613_s5 = inlined_call_operand.vmem [shape: f32[2,2,1,96], index: 5, kind: input, shape index: {}]   ;;  %s5614_s1 = inlined_call_operand.vmem [shape: f32[2,2,8], index: 1, kind: input, shape index: {}]   ;;  %s5615_s6 = inlined_call_operand.vmem [shape: f32[2,2,32,32], index: 6, kind: input, shape index: {}]   ;;  %s5616_s7 = inlined_call_operand.vmem [shape: f32[2,2,1,32], index: 7, kind: input, shape index: {}]   ;;  %s5617_s10 = inlined_call_operand.vmem [shape: f32[2,2,32,64], index: 10, kind: input, shape index: {}]   ;;  %s5618_s8 = inlined_call_operand.vmem [shape: f32[2,2,1,32], index: 8, kind: input, shape index: {}]   ;;  %s5619_s9 = inlined_call_operand.vmem [shape: f32[2,2,1,32], index: 9, kind: input, shape index: {}]   ;;  %s5620_s12 = inlined_call_operand.vmem [shape: f32[2,2,64,32], index: 12, kind: input, shape index: {}]   ;;  %s5621_s11 = inlined_call_operand.vmem [shape: f32[2,2,1,64], index: 11, kind: input, shape index: {}]   ;;  %s5622_s13 = inlined_call_operand.vmem [shape: f32[2,2,1,32], index: 13, kind: input, shape index: {}]   ;;  %s5623_s14 = inlined_call_operand.vmem [shape: f32[2,2,1,32], index: 14, kind: input, shape index: {}]   ;;  %s5624_s15 = inlined_call_operand.vmem [shape: f32[2,2,1,32], index: 15, kind: input, shape index: {}]   ;;  %s5625_s16 = inlined_call_operand.vmem [shape: f32[2,32,32], index: 16, kind: input, shape index: {}]   ;;  %s5626_s18 = inlined_call_operand.vmem [shape: f32[32,1], index: 18, kind: input, shape index: {}]   ;;  %s5627_s19 = inlined_call_operand.<no memory space> [shape: f32[1,1], index: 19, kind: input, shape index: {}]   ;;  %s5628_s17 = inlined_call_operand.vmem [shape: f32[1,32], index: 17, kind: input, shape index: {}]   ;;  %s5629_s20 = inlined_call_operand.vmem [shape: f32[2,1], index: 20, kind: output, shape index: {}]  }
   0x1   :  { %5647 = sst [smem:[#allocation3_spill]] %s5609_s0  ;;  %4000 = vmatprep.subr.bf16.mxu0 %v4509_v14  ;;  %4004 = vmatprep.mubr.msk.bf16.mxu0 %vm4510_vm1, %v4509_v14  ;;  %v4512_v51 = vmov 1966171168   ;;  %v290_v53 = vlaneseq  ;;  %vm313_vm3 = vcmask 64512   ;;  %s5643_s0 = smov 64   ;;  %vm343_vm4 = vcmask 1043456  }
   0x2   :  { %5648 = sst [smem:[#allocation4_spill]] %s5610_s4  ;;  %4008 = vmatprep.subr.bf16.mxu1 %v4509_v14  ;;  %4010 = vmatprep.mubr.msk.bf16.mxu1 %vm4510_vm1, %v4509_v14  ;;  %v288_v52 = vunpack.c.l.s4 %v4512_v51  ;;  %v3693_v57 = vld.sshfl [vmem:[%s5614_s1] sm:$0x11 pattern:$0x75316420]  ;;  %s5637_s4 = smov 112  }
   0x3   :  { %5649 = sst [smem:[#allocation5_spill]] %s5611_s2  ;;  %v291_v55 = vshrl.u32 %v290_v53, 7  ;;  %v286_v60 = vcombine.high %v3693_v57, %v3693_v57  ;;  %s5641_s2 = smov 16   ;;  %vm869_vm5 = vcmask 523264   ;;  %vm3520_vm6 = vcmask 1041409  }
   0x4   :  { %5650 = sst [smem:[#allocation6_spill]] %s5612_s3  ;;  %v289_v54 = vunpack.c.0.s8 %v288_v52  ;;  %vm3681_vm7 = vcmask 1024  }
   0x5   :  { %5651 = sst [smem:[#allocation7_spill]] %s5613_s5  ;;  %s5645_s5 = smov 96   ;;  %v4697_v59 = vsub.s32 0, %v291_v55 }
   0x6   :  { %5652 = sst [smem:[#allocation8_spill]] %s5628_s17  ;;  %v4691_v56 = vsub.s32 %v289_v54, %v291_v55  ;;  %s5663_s17 = smov 96  }
   0x7   :  { %5653 = sst [smem:[#allocation9_spill]] %s5629_s20 }
   0x8   :  { %s5654_s23 = sld [smem:[#allocation3_spill]]  ;;  %v293_v58 = vrot.slane %v3693_v57, %v4691_v56  ;;  %v300_v62 = vrot.slane %v286_v60, %v4691_v56 }
   0x9   :  { %s5655_s26 = sld [smem:[#allocation4_spill]] }
   0xa   :  { %s5656_s22 = sld [smem:[#allocation5_spill]]  ;;  %v4700_v61 = vrot.slane %v293_v58, %v4697_v59 }
   0xb   :  { %s5657_s25 = sld [smem:[#allocation6_spill]] }
   0xc   :  { %s5658_s28 = sld [smem:[#allocation7_spill]] }
   0xe   :  { %v68_v0 = vld [vmem:[%s5654_s23] sm:$0xff]  ;;  %v69_v1 = vld [vmem:[%s5654_s23 + $0x8] sm:$0xff] }
   0xf   :  { %v74_v2 = vsel %vm73_vm0, %v68_v0, 0.0  ;;  %v77_v3 = vsel %vm73_vm0, %v69_v1, 0.0  ;;  %v120_v15 = vld [vmem:[%s5655_s26 + $0x10] sm:$0xff]  ;;  %v121_v16 = vld [vmem:[%s5655_s26 + $0x18] sm:$0xff]  ;;  %v118_v17 = vld [vmem:[%s5655_s26] sm:$0xff] }
  0x10   :  { %75 = vadd.xlane.f32.xlu0 %v74_v2  ;;  %v123_v18 = vpack.c.bf16 %v121_v16, %v120_v15  ;;  %v119_v19 = vld [vmem:[%s5655_s26 + $0x8] sm:$0xff]  ;;  %v3687_v29 = vld [vmem:[%s5656_s22] ss:$0 sm:$0xff] }
  0x11   :  { %v122_v20 = vpack.c.bf16 %v119_v19, %v118_v17  ;;  %v3688_v33 = vld [vmem:[%s5657_s25] ss:$0 sm:$0xff] }
  0x12   :  { %4001 = vmatpush3.bf16.msra.mxu0 %v123_v18  ;;  %v3689_v38 = vld [vmem:[%s5658_s28] ss:$0 sm:$0xff] }
  0x13   :  { %4002 = vmatprep.subr.bf16.mxu0 %v4509_v14 }
  0x14   :  { %78 = vadd.xlane.f32.xlu0 %v77_v3  ;;  %v4705_v3 = vrot.slane %v300_v62, %v4697_v59 }
  0x16   :  { %4003 = vmatpush3.bf16.msra.mxu0 %v122_v20 }
  0x17   :  { %4014 = vmatprep.subr.bf16.mxu0 %v4509_v14 }
  0x99   :  { %v76_v4 = vpop.xlane.xlu0 %75 }
  0x9a   :  { %v81_v5 = vmul.f32 0.03125, %v76_v4 }
  0x9c   :  { %v83_v6 = vsub.f32 %v68_v0, %v81_v5 }
  0x9d   :  { %v79_v7 = vpop.xlane.xlu0 %78 }
  0x9e   :  { %v82_v8 = vmul.f32 0.03125, %v79_v7  ;;  %v85_v9 = vmul.f32 %v83_v6, %v83_v6 }
  0xa0   :  { %v84_v10 = vsub.f32 %v69_v1, %v82_v8  ;;  %v87_v11 = vsel %vm73_vm0, %v85_v9, 0.0 }
  0xa1   :  { %88 = vadd.xlane.f32.xlu1 %v87_v11 }
  0xa2   :  { %v86_v12 = vmul.f32 %v84_v10, %v84_v10 }
  0xa4   :  { %v90_v13 = vsel %vm73_vm0, %v86_v12, 0.0 }
  0xa5   :  { %91 = vadd.xlane.f32.xlu1 %v90_v13 }
 0x12a   :  { %v89_v21 = vpop.xlane.xlu1 %88 }
 0x12b   :  { %v93_v22 = vmul.f32 0.03125, %v89_v21 }
 0x12d   :  { %v95_v23 = vadd.f32 1e-12, %v93_v22 }
 0x12e   :  { %v92_v24 = vpop.xlane.xlu1 %91 }
 0x12f   :  { %4389 = vrsqrt.f32 %v95_v23  ;;  %v94_v25 = vmul.f32 0.03125, %v92_v24 }
 0x131   :  { %v96_v26 = vadd.f32 1e-12, %v94_v25 }
 0x133   :  { %4391 = vrsqrt.f32 %v96_v26 }
 0x13c   :  { %v4390_v27 = vpop.eup %4389 }
 0x13d   :  { %v99_v28 = vmul.f32 %v4390_v27, %v83_v6 }
 0x13f   :  { %v107_v32 = vmul.f32 %v3687_v29, %v99_v28 }
 0x140   :  { %v4392_v30 = vpop.eup %4391 }
 0x141   :  { %v100_v31 = vmul.f32 %v4392_v30, %v84_v10  ;;  %v4659_v35 = vadd.f32 %v3688_v33, %v107_v32 }
 0x143   :  { %v108_v34 = vmul.f32 %v3687_v29, %v100_v31 }
 0x145   :  { %v4661_v36 = vadd.f32 %v3688_v33, %v108_v34 }
 0x147   :  { %v117_v37 = vpack.c.bf16 %v4661_v36, %v4659_v35 }
 0x149   :  { %4005 = vmatmul.mubr.msk.bf16.vlgmr.msra.gmra.mxu0 %vm73_vm0, %v117_v37 }
 0x14a   :  { %4016 = vmatprep.mubr.msk.bf16.mxu0 %vm4510_vm1, %v4509_v14 }
 0x209   :  { %v168_v39 = vpop.f32.mrf.mxu0 }
 0x20a   :  { %v169_v40 = vadd.f32 %v3689_v38, %v168_v39 }
 0x20b   :  { %v4006_v41 = vpop.f32.mrf.mxu0 }
 0x20c   :  { %v4671_v42 = vpack.c.bf16 %v169_v40, %v169_v40 }
 0x20d   :  { %v171_v43 = vpop.f32.mrf.mxu0 }
 0x20e   :  { %v172_v44 = vadd.f32 %v3689_v38, %v171_v43  ;;  %178 = vrot.lane.b32.xlu0 %v4671_v42, %s5645_s5 }
 0x20f   :  { %v4007_v45 = vpop.f32.mrf.mxu0 }
 0x210   :  { %v4675_v46 = vpack.c.bf16 %v172_v44, %v172_v44 }
 0x212   :  { %228 = vrot.lane.b32.xlu1 %v4675_v46, %s5645_s5 }
 0x280   :  { %v179_v47 = vpop.permute.xlu0 %178 }
 0x281   :  { %v185_v48 = vsel %vm180_vm2, %v179_v47, 0 }
 0x282   :  { %4009 = vmatpush3.bf16.xpose.msra.mxu1 %v185_v48 }
 0x283   :  { %4020 = vmatprep.subr.bf16.mxu1 %v4509_v14 }
 0x284   :  { %v229_v49 = vpop.permute.xlu1 %228 }
 0x285   :  { %v234_v50 = vsel %vm180_vm2, %v229_v49, 0 }
 0x286   :  { %4015 = vmatpush3.bf16.xpose.msra.mxu0 %v234_v50 }
 0x287   :  { %4026 = vmatprep.subr.bf16.mxu0 %v4509_v14 }
 0x289   :  { %4011 = vmatmul.mubr.msk.bf16.vlgmr.msra.gmra.mxu1 %vm180_vm2, %v4671_v42 }
 0x28a   :  { %4022 = vmatprep.mubr.msk.bf16.mxu1 %vm4510_vm1, %v4509_v14 }
 0x28d   :  { %4017 = vmatmul.mubr.msk.bf16.vlgmr.msra.gmra.mxu0 %vm180_vm2, %v4675_v46 }
 0x28e   :  { %4028 = vmatprep.mubr.msk.bf16.mxu0 %vm4510_vm1, %v4509_v14 }
 0x349   :  { %v221_v63 = vpop.f32.mrf.mxu1 }
 0x34a   :  { %v276_v0 = vmul.f32 0.25, %v221_v63 }
 0x34b   :  { %v4012_v1 = vpop.f32.mrf.mxu1 }
 0x34c   :  { %v311_v2 = vadd.f32 %v4700_v61, %v276_v0 }
 0x34d   :  { %v224_v4 = vpop.f32.mrf.mxu1  ;;  %v270_v5 = vpop.f32.mrf.mxu0 }
 0x34e   :  { %v277_v6 = vmul.f32 0.25, %v270_v5  ;;  %v314_v7 = vsel %vm313_vm3, %v311_v2, -inf }
 0x34f   :  { %v4013_v8 = vpop.f32.mrf.mxu1  ;;  %315 = vmax.xlane.f32.xlu1 %v314_v7  ;;  %v4018_v9 = vpop.f32.mrf.mxu0 }
 0x350   :  { %v312_v10 = vadd.f32 %v4705_v3, %v277_v6 }
 0x351   :  { %v273_v11 = vpop.f32.mrf.mxu0 }
 0x352   :  { %v317_v12 = vsel %vm313_vm3, %v312_v10, -inf }
 0x353   :  { %318 = vmax.xlane.f32.xlu0 %v317_v12  ;;  %v4019_v13 = vpop.f32.mrf.mxu0 }
 0x360   :  { %387 = vrot.lane.b32.xlu1 %v4675_v46, %s5643_s0 }
 0x364   :  { %437 = vrot.lane.b32.xlu1 %v4671_v42, %s5639_s21 }
 0x3d8   :  { %v316_v15 = vpop.xlane.xlu1 %315 }
 0x3d9   :  { %v320_v16 = vsub.f32 %v311_v2, %v316_v15 }
 0x3db   :  { %v322_v17 = vmul.f32 1.442695, %v320_v16 }
 0x3dc   :  { %v388_v18 = vpop.permute.xlu1 %387  ;;  %v319_v19 = vpop.xlane.xlu0 %318 }
 0x3dd   :  { %4393 = vpow2.f32 %v322_v17  ;;  %v393_v20 = vsel %vm343_vm4, %v388_v18, 0  ;;  %v321_v21 = vsub.f32 %v312_v10, %v319_v19 }
 0x3de   :  { %4027 = vmatpush3.bf16.msra.mxu0 %v393_v20 }
 0x3df   :  { %v324_v22 = vmul.f32 1.442695, %v321_v21  ;;  %4038 = vmatprep.subr.bf16.mxu0 %v4509_v14 }
 0x3e0   :  { %v438_v27 = vpop.permute.xlu1 %437 }
 0x3e1   :  { %4395 = vpow2.f32 %v324_v22  ;;  %v443_v38 = vsel %vm180_vm2, %v438_v27, 0 }
 0x3ea   :  { %v4394_v23 = vpop.eup %4393 }
 0x3eb   :  { %v326_v24 = vsel %vm313_vm3, %v4394_v23, 0.0 }
 0x3ec   :  { %327 = vadd.xlane.f32.xlu0 %v326_v24 }
 0x3ee   :  { %v4396_v25 = vpop.eup %4395 }
 0x3ef   :  { %v329_v26 = vsel %vm313_vm3, %v4396_v25, 0.0 }
 0x3f0   :  { %330 = vadd.xlane.f32.xlu1 %v329_v26 }
 0x401   :  { %487 = vrot.lane.b32.xlu1 %v4675_v46, %s5639_s21  ;;  %s5659_s21 = smov 80  }
 0x402   :  { %338 = vrot.lane.b32.xlu0 %v4671_v42, %s5643_s0 }
 0x405   :  { %485 = vrot.lane.b32.xlu1 %v4675_v46, %s5637_s4 }
 0x406   :  { %435 = vrot.lane.b32.xlu0 %v4671_v42, %s5637_s4  ;;  %s5660_s4 = smov 112  }
 0x475   :  { %v328_v28 = vpop.xlane.xlu0 %327 }
 0x476   :  { %4397 = vrcp.f32 %v328_v28 }
 0x479   :  { %v331_v29 = vpop.xlane.xlu1 %330  ;;  %v339_v30 = vpop.permute.xlu0 %338 }
 0x47a   :  { %4399 = vrcp.f32 %v331_v29  ;;  %v345_v31 = vsel %vm343_vm4, %v339_v30, 0  ;;  %v672_v30 = vld [vmem:[%s5615_s6 + $0x10] sm:$0xff] }
 0x47b   :  { %4021 = vmatpush3.bf16.msra.mxu1 %v345_v31  ;;  %v673_v31 = vld [vmem:[%s5615_s6 + $0x18] sm:$0xff] }
 0x47c   :  { %4032 = vmatprep.subr.bf16.mxu1 %v4509_v14 }
 0x47d   :  { %v488_v40 = vpop.permute.xlu1 %487  ;;  %v436_v44 = vpop.permute.xlu0 %435 }
 0x47e   :  { %v493_v43 = vsel %vm180_vm2, %v488_v40, 0 }
 0x481   :  { %v486_v45 = vpop.permute.xlu1 %485 }
 0x483   :  { %v4398_v32 = vpop.eup %4397 }
 0x484   :  { %v334_v33 = vmul.f32 %v4398_v32, %v4394_v23  ;;  %v675_v32 = vpack.c.bf16 %v673_v31, %v672_v30  ;;  %v3703_v31 = vld [vmem:[%s5619_s9] ss:$0 sm:$0xff] }
 0x486   :  { %v336_v34 = vpack.c.bf16 %v334_v33, %v334_v33  ;;  %v670_v33 = vld [vmem:[%s5615_s6] sm:$0xff] }
 0x487   :  { %v4400_v37 = vpop.eup %4399 }
 0x488   :  { %4023 = vmatmul.mubr.msk.bf16.vlgmr.msra.gmra.mxu1 %vm313_vm3, %v336_v34  ;;  %v335_v39 = vmul.f32 %v4400_v37, %v4396_v25  ;;  %v671_v34 = vld [vmem:[%s5615_s6 + $0x8] sm:$0xff] }
 0x489   :  { %4033 = vmatpush3.bf16.xpose.msra.mxu1 %v443_v38  ;;  %4034 = vmatprep.mubr.msk.bf16.mxu1 %vm4510_vm1, %v4509_v14  ;;  %v674_v37 = vpack.c.bf16 %v671_v34, %v670_v33 }
 0x48a   :  { %v337_v41 = vpack.c.bf16 %v335_v39, %v335_v39  ;;  %4044 = vmatprep.subr.bf16.mxu1 %v4509_v14 }
 0x48c   :  { %4029 = vmatmul.mubr.msk.bf16.vlgmr.msra.gmra.mxu0 %vm313_vm3, %v337_v41 }
 0x48d   :  { %4039 = vmatpush3.bf16.xpose.msra.mxu0 %v493_v43  ;;  %4040 = vmatprep.mubr.msk.bf16.mxu0 %vm4510_vm1, %v4509_v14 }
 0x48e   :  { %4050 = vmatprep.subr.bf16.mxu0 %v4509_v14 }
 0x490   :  { %4035 = vmatmul.mubr.msk.bf16.vlgmr.msra.gmra.mxu1 %vm180_vm2, %v436_v44 }
 0x491   :  { %4046 = vmatprep.mubr.msk.bf16.mxu1 %vm4510_vm1, %v4509_v14 }
 0x494   :  { %4041 = vmatmul.mubr.msk.bf16.vlgmr.msra.gmra.mxu0 %vm180_vm2, %v486_v45 }
 0x495   :  { %4052 = vmatprep.mubr.msk.bf16.mxu0 %vm4510_vm1, %v4509_v14 }
 0x548   :  { %v4744_v47 = vpop.f32.mrf.mxu1 }
 0x54a   :  { %v4024_v48 = vpop.f32.mrf.mxu1 }
 0x54c   :  { %v384_v49 = vpop.f32.mrf.mxu1  ;;  %v4746_v50 = vpop.f32.mrf.mxu0 }
 0x54e   :  { %v4025_v51 = vpop.f32.mrf.mxu1  ;;  %v4030_v52 = vpop.f32.mrf.mxu0 }
 0x550   :  { %v432_v53 = vpop.f32.mrf.mxu0  ;;  %v479_v54 = vpop.f32.mrf.mxu1 }
 0x551   :  { %v535_v55 = vmul.f32 0.25, %v479_v54 }
 0x552   :  { %v4031_v57 = vpop.f32.mrf.mxu0  ;;  %v4036_v58 = vpop.f32.mrf.mxu1 }
 0x553   :  { %v537_v60 = vadd.f32 %v535_v55, %v4700_v61  ;;  %v3700_v58 = vld [vmem:[%s5616_s7] ss:$0 sm:$0xff] }
 0x554   :  { %v482_v62 = vpop.f32.mrf.mxu1  ;;  %v529_v63 = vpop.f32.mrf.mxu0 }
 0x555   :  { %v536_v0 = vmul.f32 0.25, %v529_v63  ;;  %v539_v1 = vsel %vm313_vm3, %v537_v60, -inf }
 0x556   :  { %540 = vmax.xlane.f32.xlu0 %v539_v1  ;;  %v4037_v2 = vpop.f32.mrf.mxu1  ;;  %v4042_v4 = vpop.f32.mrf.mxu0 }
 0x557   :  { %v538_v5 = vadd.f32 %v536_v0, %v4705_v3 }
 0x558   :  { %v532_v6 = vpop.f32.mrf.mxu0 }
 0x559   :  { %v542_v7 = vsel %vm313_vm3, %v538_v5, -inf }
 0x55a   :  { %543 = vmax.xlane.f32.xlu1 %v542_v7  ;;  %v4043_v8 = vpop.f32.mrf.mxu0 }
 0x56b   :  { %611 = vrot.lane.b32.xlu1 %v4675_v46, %s5635_s24 }
 0x5df   :  { %v541_v9 = vpop.xlane.xlu0 %540 }
 0x5e0   :  { %v545_v10 = vsub.f32 %v537_v60, %v541_v9 }
 0x5e2   :  { %v547_v11 = vmul.f32 1.442695, %v545_v10 }
 0x5e3   :  { %v544_v12 = vpop.xlane.xlu1 %543 }
 0x5e4   :  { %4401 = vpow2.f32 %v547_v11  ;;  %v546_v13 = vsub.f32 %v538_v5, %v544_v12 }
 0x5e6   :  { %v549_v15 = vmul.f32 1.442695, %v546_v13 }
 0x5e7   :  { %v612_v16 = vpop.permute.xlu1 %611 }
 0x5e8   :  { %4403 = vpow2.f32 %v549_v15  ;;  %v617_v17 = vsel %vm343_vm4, %v612_v16, 0  ;;  %v777_v16 = vld [vmem:[%s5617_s10 + $0x18] sm:$0xff] }
 0x5e9   :  { %4051 = vmatpush3.bf16.msra.mxu0 %v617_v17 }
 0x5ea   :  { %4064 = vmatprep.subr.bf16.mxu0 %v4509_v14 }
 0x5f1   :  { %v4402_v18 = vpop.eup %4401 }
 0x5f2   :  { %v551_v19 = vsel %vm313_vm3, %v4402_v18, 0.0 }
 0x5f3   :  { %552 = vadd.xlane.f32.xlu0 %v551_v19  ;;  %v775_v19 = vld [vmem:[%s5617_s10 + $0x8] sm:$0xff] }
 0x5f5   :  { %v4404_v20 = vpop.eup %4403 }
 0x5f6   :  { %v554_v46 = vsel %vm313_vm3, %v4404_v20, 0.0 }
 0x5f7   :  { %555 = vadd.xlane.f32.xlu0 %v554_v46 }
 0x60d   :  { %563 = vrot.lane.b32.xlu0 %v4671_v42, %s5635_s24  ;;  %s5661_s24 = smov 48  }
 0x67c   :  { %v553_v21 = vpop.xlane.xlu0 %552 }
 0x67d   :  { %4405 = vrcp.f32 %v553_v21 }
 0x680   :  { %v556_v22 = vpop.xlane.xlu0 %555 }
 0x681   :  { %4407 = vrcp.f32 %v556_v22 }
 0x684   :  { %v564_v23 = vpop.permute.xlu0 %563 }
 0x685   :  { %v569_v24 = vsel %vm343_vm4, %v564_v23, 0 }
 0x686   :  { %4045 = vmatpush3.bf16.msra.mxu1 %v569_v24 }
 0x687   :  { %4056 = vmatprep.subr.bf16.mxu1 %v4509_v14 }
 0x68a   :  { %v4406_v25 = vpop.eup %4405 }
 0x68b   :  { %v559_v26 = vmul.f32 %v4406_v25, %v4402_v18  ;;  %v774_v18 = vld [vmem:[%s5617_s10] sm:$0xff] }
 0x68d   :  { %v561_v27 = vpack.c.bf16 %v559_v26, %v559_v26 }
 0x68e   :  { %v4408_v28 = vpop.eup %4407 }
 0x68f   :  { %4047 = vmatmul.mubr.msk.bf16.vlgmr.msra.gmra.mxu1 %vm313_vm3, %v561_v27  ;;  %v560_v29 = vmul.f32 %v4408_v28, %v4404_v20  ;;  %v778_v20 = vpack.c.bf16 %v775_v19, %v774_v18  ;;  %v3702_v28 = vld [vmem:[%s5618_s8] ss:$0 sm:$0xff] }
 0x690   :  { %4060 = vmatprep.mubr.msk.bf16.mxu1 %vm4510_vm1, %v4509_v14  ;;  %4057 = vmatpush3.bf16.msra.mxu1 %v675_v32 }
 0x691   :  { %v562_v42 = vpack.c.bf16 %v560_v29, %v560_v29  ;;  %4058 = vmatprep.subr.bf16.mxu1 %v4509_v14 }
 0x693   :  { %4053 = vmatmul.mubr.msk.bf16.vlgmr.msra.gmra.mxu0 %vm313_vm3, %v562_v42 }
 0x694   :  { %4068 = vmatprep.mubr.msk.bf16.mxu0 %vm4510_vm1, %v4509_v14  ;;  %4059 = vmatpush3.bf16.msra.mxu1 %v674_v37 }
 0x695   :  { %4072 = vmatprep.subr.bf16.mxu1 %v4509_v14 }
 0x74f   :  { %v605_v38 = vpop.f32.mrf.mxu1 }
 0x751   :  { %v4048_v39 = vpop.f32.mrf.mxu1 }
 0x752   :  { %v857_v39 = vld [vmem:[%s5620_s12 + $0x38] sm:$0xff] }
 0x753   :  { %v608_v40 = vpop.f32.mrf.mxu1  ;;  %v653_v41 = vpop.f32.mrf.mxu0 }
 0x754   :  { %v4369_v43 = vpack.i.bf16 %v653_v41, %v605_v38  ;;  %v856_v38 = vld [vmem:[%s5620_s12 + $0x30] sm:$0xff]  ;;  %v854_v41 = vld [vmem:[%s5620_s12 + $0x20] sm:$0xff] }
 0x755   :  { %v4049_v44 = vpop.f32.mrf.mxu1  ;;  %v4054_v45 = vpop.f32.mrf.mxu0  ;;  %v861_v40 = vpack.c.bf16 %v857_v39, %v856_v38  ;;  %v3713_v39 = vld [vmem:[%s5655_s26 + $0x38] sm:$0xff] }
 0x756   :  { %4370 = vrot.lane.b32.xlu1 %v4369_v43, %s5641_s2  ;;  %v855_v43 = vld [vmem:[%s5620_s12 + $0x28] sm:$0xff]  ;;  %v852_v45 = vld [vmem:[%s5620_s12 + $0x10] sm:$0xff]  ;;  %s5662_s2 = smov 16  }
 0x757   :  { %v656_v48 = vpop.f32.mrf.mxu0  ;;  %v860_v44 = vpack.c.bf16 %v855_v43, %v854_v41  ;;  %v3710_v41 = vld [vmem:[%s5655_s26 + $0x20] sm:$0xff]  ;;  %v3711_v43 = vld [vmem:[%s5655_s26 + $0x28] sm:$0xff] }
 0x758   :  { %v853_v48 = vld [vmem:[%s5620_s12 + $0x18] sm:$0xff] }
 0x759   :  { %v4055_v49 = vpop.f32.mrf.mxu0 }
 0x75a   :  { %v859_v49 = vpack.c.bf16 %v853_v48, %v852_v45 }
 0x7c8   :  { %v4371_v51 = vpop.permute.xlu1 %4370 }
 0x7c9   :  { %v4373_v52 = vunpack.i.h.bf16 %v4371_v51  ;;  %v4372_v53 = vunpack.i.l.bf16 %v4371_v51  ;;  %v850_v51 = vld [vmem:[%s5620_s12] sm:$0xff] }
 0x7cb   :  { %v668_v54 = vsel %vm180_vm2, %v4746_v50, %v4373_v52  ;;  %v667_v55 = vsel %vm180_vm2, %v4744_v47, %v4372_v53  ;;  %v851_v52 = vld [vmem:[%s5620_s12 + $0x8] sm:$0xff] }
 0x7cc   :  { %v669_v57 = vpack.c.bf16 %v668_v54, %v667_v55  ;;  %v858_v53 = vpack.c.bf16 %v851_v52, %v850_v51  ;;  %v3704_v54 = vld [vmem:[%s5621_s11] ss:$0 sm:$0xff] }
 0x7ce   :  { %4061 = vmatmul.mubr.msk.bf16.vlgmr.msra.gmra.mxu1 %vm73_vm0, %v669_v57 }
 0x7cf   :  { %4080 = vmatprep.mubr.msk.bf16.mxu1 %vm4510_vm1, %v4509_v14  ;;  %4073 = vmatpush3.bf16.msra.mxu1 %v861_v40 }
 0x7d0   :  { %4074 = vmatprep.subr.bf16.mxu1 %v4509_v14 }
 0x7d3   :  { %4075 = vmatpush3.bf16.msra.mxu1 %v860_v44  ;;  %v966_v44 = vpack.c.bf16 %v3711_v43, %v3710_v41 }
 0x7d4   :  { %4076 = vmatprep.subr.bf16.mxu1 %v4509_v14 }
 0x7d7   :  { %4077 = vmatpush3.bf16.msra.mxu1 %v859_v49 }
 0x7d8   :  { %4078 = vmatprep.subr.bf16.mxu1 %v4509_v14 }
 0x7db   :  { %4079 = vmatpush3.bf16.msra.mxu1 %v858_v53 }
 0x7dc   :  { %4098 = vmatprep.subr.bf16.mxu1 %v4509_v14 }
 0x88e   :  { %v720_v60 = vpop.f32.mrf.mxu1 }
 0x88f   :  { %v721_v62 = vadd.f32 %v3700_v58, %v720_v60 }
 0x890   :  { %v4062_v63 = vpop.f32.mrf.mxu1 }
 0x891   :  { %v727_v0 = vadd.f32 %v721_v62, %v4659_v35 }
 0x892   :  { %v723_v1 = vpop.f32.mrf.mxu1 }
 0x893   :  { %v724_v50 = vadd.f32 %v3700_v58, %v723_v1  ;;  %v731_v2 = vsel %vm73_vm0, %v727_v0, 0.0 }
 0x894   :  { %732 = vadd.xlane.f32.xlu1 %v731_v2  ;;  %v4063_v47 = vpop.f32.mrf.mxu1 }
 0x895   :  { %v728_v4 = vadd.f32 %v724_v50, %v4661_v36  ;;  %v776_v36 = vld [vmem:[%s5617_s10 + $0x10] sm:$0xff] }
 0x896   :  { %v779_v17 = vpack.c.bf16 %v777_v16, %v776_v36 }
 0x897   :  { %v734_v5 = vsel %vm73_vm0, %v728_v4, 0.0 }
 0x898   :  { %735 = vadd.xlane.f32.xlu0 %v734_v5  ;;  %4065 = vmatpush3.bf16.msra.mxu0 %v779_v17  ;;  %v3706_v17 = vld [vmem:[%s5622_s13] ss:$0 sm:$0xff] }
 0x899   :  { %4066 = vmatprep.subr.bf16.mxu0 %v4509_v14 }
 0x89c   :  { %4067 = vmatpush3.bf16.msra.mxu0 %v778_v20 }
 0x89d   :  { %4084 = vmatprep.subr.bf16.mxu0 %v4509_v14 }
 0x91d   :  { %v733_v6 = vpop.xlane.xlu1 %732 }
 0x91e   :  { %v737_v7 = vmul.f32 0.03125, %v733_v6 }
 0x920   :  { %v739_v8 = vsub.f32 %v727_v0, %v737_v7 }
 0x921   :  { %v736_v9 = vpop.xlane.xlu0 %735 }
 0x922   :  { %v738_v10 = vmul.f32 0.03125, %v736_v9  ;;  %v741_v11 = vmul.f32 %v739_v8, %v739_v8 }
 0x924   :  { %v740_v12 = vsub.f32 %v728_v4, %v738_v10  ;;  %v743_v35 = vsel %vm73_vm0, %v741_v11, 0.0 }
 0x925   :  { %744 = vadd.xlane.f32.xlu0 %v743_v35 }
 0x926   :  { %v742_v13 = vmul.f32 %v740_v12, %v740_v12 }
 0x928   :  { %v746_v15 = vsel %vm73_vm0, %v742_v13, 0.0 }
 0x929   :  { %747 = vadd.xlane.f32.xlu0 %v746_v15 }
 0x9ae   :  { %v745_v46 = vpop.xlane.xlu0 %744 }
 0x9af   :  { %v749_v21 = vmul.f32 0.03125, %v745_v46 }
 0x9b1   :  { %v751_v22 = vadd.f32 1e-12, %v749_v21 }
 0x9b2   :  { %v748_v23 = vpop.xlane.xlu0 %747 }
 0x9b3   :  { %4409 = vrsqrt.f32 %v751_v22  ;;  %v750_v24 = vmul.f32 0.03125, %v748_v23 }
 0x9b5   :  { %v752_v25 = vadd.f32 1e-12, %v750_v24 }
 0x9b7   :  { %4411 = vrsqrt.f32 %v752_v25 }
 0x9c0   :  { %v4410_v26 = vpop.eup %4409 }
 0x9c1   :  { %v755_v27 = vmul.f32 %v4410_v26, %v739_v8 }
 0x9c3   :  { %v763_v30 = vmul.f32 %v3702_v28, %v755_v27 }
 0x9c4   :  { %v4412_v29 = vpop.eup %4411 }
 0x9c5   :  { %v756_v42 = vmul.f32 %v4412_v29, %v740_v12  ;;  %v4819_v33 = vadd.f32 %v3703_v31, %v763_v30 }
 0x9c7   :  { %v764_v32 = vmul.f32 %v3702_v28, %v756_v42 }
 0x9c9   :  { %v4821_v34 = vadd.f32 %v3703_v31, %v764_v32 }
 0x9cb   :  { %v773_v37 = vpack.c.bf16 %v4821_v34, %v4819_v33 }
 0x9cd   :  { %4069 = vmatmul.mubr.msk.bf16.vlgmr.msra.gmra.mxu0 %vm73_vm0, %v773_v37 }
 0x9ce   :  { %4088 = vmatprep.mubr.msk.bf16.mxu0 %vm4510_vm1, %v4509_v14 }
 0xa8d   :  { %v824_v55 = vpop.f32.mrf.mxu0 }
 0xa8e   :  { %v825_v57 = vadd.f32 %v3704_v54, %v824_v55 }
 0xa8f   :  { %v4070_v58 = vpop.f32.mrf.mxu0 }
 0xa90   :  { %v831_v60 = vmul.f32 %v825_v57, %v825_v57 }
 0xa91   :  { %v827_v62 = vpop.f32.mrf.mxu0 }
 0xa92   :  { %v833_v63 = vmul.f32 %v831_v60, %v825_v57  ;;  %v828_v0 = vadd.f32 %v3704_v54, %v827_v62 }
 0xa93   :  { %v4071_v1 = vpop.f32.mrf.mxu0 }
 0xa94   :  { %v835_v50 = vmul.f32 0.044715, %v833_v63  ;;  %v832_v2 = vmul.f32 %v828_v0, %v828_v0  ;;  %v3709_v63 = vld [vmem:[%s5624_s15] ss:$0 sm:$0xff] }
 0xa96   :  { %v837_v47 = vadd.f32 %v835_v50, %v825_v57  ;;  %v834_v4 = vmul.f32 %v832_v2, %v828_v0 }
 0xa98   :  { %v839_v5 = vmul.f32 0.7978846, %v837_v47  ;;  %v836_v6 = vmul.f32 0.044715, %v834_v4  ;;  %v3715_v47 = vld [vmem:[%s5658_s28 + $0x1] ss:$0 sm:$0xff] }
 0xa9a   :  { %4413 = vtanh.f32 %v839_v5  ;;  %v838_v7 = vadd.f32 %v836_v6, %v828_v0 }
 0xa9c   :  { %v840_v8 = vmul.f32 0.7978846, %v838_v7 }
 0xa9e   :  { %4415 = vtanh.f32 %v840_v8 }
 0xaa7   :  { %v4414_v9 = vpop.eup %4413 }
 0xaa8   :  { %v843_v10 = vadd.f32 1.0, %v4414_v9 }
 0xaaa   :  { %v845_v12 = vmul.f32 0.5, %v843_v10 }
 0xaab   :  { %v4416_v11 = vpop.eup %4415 }
 0xaac   :  { %v844_v35 = vadd.f32 1.0, %v4416_v11  ;;  %v847_v15 = vmul.f32 %v845_v12, %v825_v57  ;;  %v3708_v57 = vld [vmem:[%s5623_s14] ss:$0 sm:$0xff] }
 0xaae   :  { %v846_v13 = vmul.f32 0.5, %v844_v35 }
 0xab0   :  { %v848_v36 = vmul.f32 %v846_v13, %v828_v0 }
 0xab2   :  { %v849_v16 = vpack.c.bf16 %v848_v36, %v847_v15 }
 0xab4   :  { %4081 = vmatmul.mubr.msk.bf16.vlgmr.msra.gmra.mxu1 %vm869_vm5, %v849_v16 }
 0xab5   :  { %4100 = vmatprep.mubr.msk.bf16.mxu1 %vm4510_vm1, %v4509_v14 }
 0xb74   :  { %v907_v18 = vpop.f32.mrf.mxu1 }
 0xb75   :  { %v908_v19 = vadd.f32 %v3706_v17, %v907_v18 }
 0xb76   :  { %v4082_v20 = vpop.f32.mrf.mxu1 }
 0xb77   :  { %v914_v46 = vadd.f32 %v908_v19, %v4819_v33 }
 0xb78   :  { %v910_v21 = vpop.f32.mrf.mxu1 }
 0xb79   :  { %v911_v22 = vadd.f32 %v3706_v17, %v910_v21  ;;  %v918_v23 = vsel %vm73_vm0, %v914_v46, 0.0 }
 0xb7a   :  { %919 = vadd.xlane.f32.xlu1 %v918_v23  ;;  %v4083_v24 = vpop.f32.mrf.mxu1 }
 0xb7b   :  { %v915_v25 = vadd.f32 %v911_v22, %v4821_v34  ;;  %v3712_v34 = vld [vmem:[%s5655_s26 + $0x30] sm:$0xff] }
 0xb7c   :  { %v967_v40 = vpack.c.bf16 %v3713_v39, %v3712_v34 }
 0xb7d   :  { %v921_v26 = vsel %vm73_vm0, %v915_v25, 0.0 }
 0xb7e   :  { %922 = vadd.xlane.f32.xlu0 %v921_v26  ;;  %4085 = vmatpush3.bf16.msra.mxu0 %v967_v40 }
 0xb7f   :  { %4086 = vmatprep.subr.bf16.mxu0 %v4509_v14 }
 0xb82   :  { %4087 = vmatpush3.bf16.msra.mxu0 %v966_v44 }
 0xb83   :  { %4092 = vmatprep.subr.bf16.mxu0 %v4509_v14 }
 0xc03   :  { %v920_v27 = vpop.xlane.xlu1 %919 }
 0xc04   :  { %v924_v28 = vmul.f32 0.03125, %v920_v27 }
 0xc06   :  { %v926_v29 = vsub.f32 %v914_v46, %v924_v28 }
 0xc07   :  { %v923_v42 = vpop.xlane.xlu0 %922 }
 0xc08   :  { %v925_v30 = vmul.f32 0.03125, %v923_v42  ;;  %v928_v31 = vmul.f32 %v926_v29, %v926_v29 }
 0xc0a   :  { %v927_v32 = vsub.f32 %v915_v25, %v925_v30  ;;  %v930_v33 = vsel %vm73_vm0, %v928_v31, 0.0 }
 0xc0b   :  { %931 = vadd.xlane.f32.xlu1 %v930_v33 }
 0xc0c   :  { %v929_v37 = vmul.f32 %v927_v32, %v927_v32 }
 0xc0e   :  { %v933_v38 = vsel %vm73_vm0, %v929_v37, 0.0 }
 0xc0f   :  { %934 = vadd.xlane.f32.xlu0 %v933_v38 }
 0xc94   :  { %v932_v45 = vpop.xlane.xlu1 %931 }
 0xc95   :  { %v936_v48 = vmul.f32 0.03125, %v932_v45 }
 0xc97   :  { %v938_v49 = vadd.f32 1e-12, %v936_v48 }
 0xc98   :  { %v935_v51 = vpop.xlane.xlu0 %934 }
 0xc99   :  { %4417 = vrsqrt.f32 %v938_v49  ;;  %v937_v52 = vmul.f32 0.03125, %v935_v51 }
 0xc9b   :  { %v939_v53 = vadd.f32 1e-12, %v937_v52 }
 0xc9d   :  { %4419 = vrsqrt.f32 %v939_v53 }
 0xca6   :  { %v4418_v54 = vpop.eup %4417 }
 0xca7   :  { %v942_v55 = vmul.f32 %v4418_v54, %v926_v29 }
 0xca9   :  { %v950_v62 = vmul.f32 %v3708_v57, %v942_v55 }
 0xcaa   :  { %v4420_v58 = vpop.eup %4419 }
 0xcab   :  { %v943_v60 = vmul.f32 %v4420_v58, %v927_v32  ;;  %v4891_v1 = vadd.f32 %v3709_v63, %v950_v62 }
 0xcad   :  { %v951_v0 = vmul.f32 %v3708_v57, %v943_v60 }
 0xcaf   :  { %v4893_v50 = vadd.f32 %v3709_v63, %v951_v0 }
 0xcb1   :  { %v960_v2 = vpack.c.bf16 %v4893_v50, %v4891_v1 }
 0xcb3   :  { %4089 = vmatmul.mubr.msk.bf16.vlgmr.msra.gmra.mxu0 %vm73_vm0, %v960_v2 }
 0xcb4   :  { %4094 = vmatprep.mubr.msk.bf16.mxu0 %vm4510_vm1, %v4509_v14 }
 0xd73   :  { %v1013_v4 = vpop.f32.mrf.mxu0 }
 0xd74   :  { %v1014_v5 = vadd.f32 %v3715_v47, %v1013_v4 }
 0xd75   :  { %v4090_v6 = vpop.f32.mrf.mxu0 }
 0xd76   :  { %v4903_v7 = vpack.c.bf16 %v1014_v5, %v1014_v5 }
 0xd77   :  { %v1016_v8 = vpop.f32.mrf.mxu0 }
 0xd78   :  { %v1017_v9 = vadd.f32 %v3715_v47, %v1016_v8  ;;  %1023 = vrot.lane.b32.xlu1 %v4903_v7, %s5645_s5 }
 0xd79   :  { %v4091_v10 = vpop.f32.mrf.mxu0 }
 0xd7a   :  { %v4907_v11 = vpack.c.bf16 %v1017_v9, %v1017_v9 }
 0xd7c   :  { %1072 = vrot.lane.b32.xlu0 %v4907_v11, %s5645_s5 }
 0xdea   :  { %v1024_v12 = vpop.permute.xlu1 %1023 }
 0xdeb   :  { %v1029_v35 = vsel %vm180_vm2, %v1024_v12, 0 }
 0xdec   :  { %4093 = vmatpush3.bf16.xpose.msra.mxu0 %v1029_v35 }
 0xded   :  { %4104 = vmatprep.subr.bf16.mxu0 %v4509_v14 }
 0xdee   :  { %v1073_v13 = vpop.permute.xlu0 %1072 }
 0xdef   :  { %v1078_v15 = vsel %vm180_vm2, %v1073_v13, 0 }
 0xdf0   :  { %4099 = vmatpush3.bf16.xpose.msra.mxu1 %v1078_v15 }
 0xdf1   :  { %4110 = vmatprep.subr.bf16.mxu1 %v4509_v14 }
 0xdf3   :  { %4095 = vmatmul.mubr.msk.bf16.vlgmr.msra.gmra.mxu0 %vm180_vm2, %v4903_v7 }
 0xdf4   :  { %4106 = vmatprep.mubr.msk.bf16.mxu0 %vm4510_vm1, %v4509_v14 }
 0xdf7   :  { %4101 = vmatmul.mubr.msk.bf16.vlgmr.msra.gmra.mxu1 %vm180_vm2, %v4907_v11 }
 0xdf8   :  { %4112 = vmatprep.mubr.msk.bf16.mxu1 %vm4510_vm1, %v4509_v14 }
 0xeb3   :  { %v1065_v36 = vpop.f32.mrf.mxu0 }
 0xeb4   :  { %v1120_v16 = vmul.f32 0.25, %v1065_v36 }
 0xeb5   :  { %v4096_v17 = vpop.f32.mrf.mxu0 }
 0xeb6   :  { %v1122_v18 = vadd.f32 %v1120_v16, %v4700_v61 }
 0xeb7   :  { %v1068_v19 = vpop.f32.mrf.mxu0  ;;  %v1114_v20 = vpop.f32.mrf.mxu1 }
 0xeb8   :  { %v1121_v46 = vmul.f32 0.25, %v1114_v20  ;;  %v1124_v21 = vsel %vm313_vm3, %v1122_v18, -inf }
 0xeb9   :  { %v4102_v22 = vpop.f32.mrf.mxu1  ;;  %1125 = vmax.xlane.f32.xlu1 %v1124_v21  ;;  %v4097_v23 = vpop.f32.mrf.mxu0 }
 0xeba   :  { %v1123_v24 = vadd.f32 %v1121_v46, %v4705_v3 }
 0xebb   :  { %v1117_v25 = vpop.f32.mrf.mxu1 }
 0xebc   :  { %v1127_v26 = vsel %vm313_vm3, %v1123_v24, -inf }
 0xebd   :  { %1128 = vmax.xlane.f32.xlu0 %v1127_v26  ;;  %v4103_v27 = vpop.f32.mrf.mxu1 }
 0xeca   :  { %1148 = vrot.lane.b32.xlu1 %v4903_v7, %s5643_s0 }
 0xf42   :  { %v1126_v28 = vpop.xlane.xlu1 %1125 }
 0xf43   :  { %v1130_v29 = vsub.f32 %v1122_v18, %v1126_v28 }
 0xf45   :  { %v1132_v42 = vmul.f32 1.442695, %v1130_v29 }
 0xf46   :  { %v1129_v30 = vpop.xlane.xlu0 %1128  ;;  %v1149_v31 = vpop.permute.xlu1 %1148 }
 0xf47   :  { %4421 = vpow2.f32 %v1132_v42  ;;  %v1131_v32 = vsub.f32 %v1123_v24, %v1129_v30  ;;  %v1154_v33 = vsel %vm343_vm4, %v1149_v31, 0 }
 0xf48   :  { %4105 = vmatpush3.bf16.msra.mxu0 %v1154_v33 }
 0xf49   :  { %v1134_v37 = vmul.f32 1.442695, %v1131_v32  ;;  %4116 = vmatprep.subr.bf16.mxu0 %v4509_v14 }
 0xf4b   :  { %4423 = vpow2.f32 %v1134_v37 }
 0xf54   :  { %v4422_v38 = vpop.eup %4421 }
 0xf55   :  { %v1136_v34 = vsel %vm313_vm3, %v4422_v38, 0.0 }
 0xf56   :  { %1137 = vadd.xlane.f32.xlu1 %v1136_v34 }
 0xf58   :  { %v4424_v39 = vpop.eup %4423 }
 0xf59   :  { %v1139_v40 = vsel %vm313_vm3, %v4424_v39, 0.0 }
 0xf5a   :  { %1140 = vadd.xlane.f32.xlu0 %v1139_v40 }
 0xf67   :  { %1246 = vrot.lane.b32.xlu1 %v4903_v7, %s5659_s21 }
 0xf6b   :  { %1296 = vrot.lane.b32.xlu1 %v4907_v11, %s5659_s21 }
 0xf6f   :  { %1244 = vrot.lane.b32.xlu1 %v4903_v7, %s5660_s4 }
 0xf70   :  { %1196 = vrot.lane.b32.xlu0 %v4907_v11, %s5643_s0 }
 0xf74   :  { %1294 = vrot.lane.b32.xlu0 %v4907_v11, %s5660_s4 }
 0xfdf   :  { %v1138_v41 = vpop.xlane.xlu1 %1137 }
 0xfe0   :  { %4425 = vrcp.f32 %v1138_v41 }
 0xfe3   :  { %v1141_v43 = vpop.xlane.xlu0 %1140  ;;  %v1247_v49 = vpop.permute.xlu1 %1246 }
 0xfe4   :  { %4427 = vrcp.f32 %v1141_v43  ;;  %v1252_v54 = vsel %vm180_vm2, %v1247_v49, 0  ;;  %v3727_v43 = vld [vmem:[%s5615_s6 + $0x30] sm:$0xff]  ;;  %v3726_v49 = vld [vmem:[%s5615_s6 + $0x28] sm:$0xff] }
 0xfe7   :  { %v1197_v44 = vpop.permute.xlu0 %1196  ;;  %v1297_v57 = vpop.permute.xlu1 %1296 }
 0xfe8   :  { %v1202_v45 = vsel %vm343_vm4, %v1197_v44, 0  ;;  %v1302_v60 = vsel %vm180_vm2, %v1297_v57, 0  ;;  %v3728_v44 = vld [vmem:[%s5615_s6 + $0x38] sm:$0xff] }
 0xfe9   :  { %4111 = vmatpush3.bf16.msra.mxu1 %v1202_v45  ;;  %v1485_v45 = vpack.c.bf16 %v3728_v44, %v3727_v43 }
 0xfea   :  { %4122 = vmatprep.subr.bf16.mxu1 %v4509_v14 }
 0xfeb   :  { %v1245_v62 = vpop.permute.xlu1 %1244  ;;  %v1295_v63 = vpop.permute.xlu0 %1294 }
 0xfed   :  { %v4426_v48 = vpop.eup %4425 }
 0xfee   :  { %v1144_v51 = vmul.f32 %v4426_v48, %v4422_v38  ;;  %v3725_v48 = vld [vmem:[%s5615_s6 + $0x20] sm:$0xff] }
 0xff0   :  { %v1146_v52 = vpack.c.bf16 %v1144_v51, %v1144_v51  ;;  %v1484_v51 = vpack.c.bf16 %v3726_v49, %v3725_v48 }
 0xff1   :  { %v4428_v53 = vpop.eup %4427 }
 0xff2   :  { %4107 = vmatmul.mubr.msk.bf16.vlgmr.msra.gmra.mxu0 %vm313_vm3, %v1146_v52  ;;  %v1145_v55 = vmul.f32 %v4428_v53, %v4424_v39 }
 0xff3   :  { %4117 = vmatpush3.bf16.xpose.msra.mxu0 %v1252_v54  ;;  %4118 = vmatprep.mubr.msk.bf16.mxu0 %vm4510_vm1, %v4509_v14 }
 0xff4   :  { %v1147_v58 = vpack.c.bf16 %v1145_v55, %v1145_v55  ;;  %4128 = vmatprep.subr.bf16.mxu0 %v4509_v14 }
 0xff6   :  { %4113 = vmatmul.mubr.msk.bf16.vlgmr.msra.gmra.mxu1 %vm313_vm3, %v1147_v58 }
 0xff7   :  { %4123 = vmatpush3.bf16.xpose.msra.mxu1 %v1302_v60  ;;  %4124 = vmatprep.mubr.msk.bf16.mxu1 %vm4510_vm1, %v4509_v14 }
 0xff8   :  { %4134 = vmatprep.subr.bf16.mxu1 %v4509_v14 }
 0xffa   :  { %4119 = vmatmul.mubr.msk.bf16.vlgmr.msra.gmra.mxu0 %vm180_vm2, %v1245_v62 }
 0xffb   :  { %4130 = vmatprep.mubr.msk.bf16.mxu0 %vm4510_vm1, %v4509_v14 }
 0xffe   :  { %4125 = vmatmul.mubr.msk.bf16.vlgmr.msra.gmra.mxu1 %vm180_vm2, %v1295_v63 }
 0xfff   :  { %4136 = vmatprep.mubr.msk.bf16.mxu1 %vm4510_vm1, %v4509_v14 }
0x10b2   :  { %v4961_v0 = vpop.f32.mrf.mxu0 }
0x10b4   :  { %v4108_v2 = vpop.f32.mrf.mxu0 }
0x10b6   :  { %v1193_v47 = vpop.f32.mrf.mxu0  ;;  %v4963_v4 = vpop.f32.mrf.mxu1 }
0x10b8   :  { %v4109_v5 = vpop.f32.mrf.mxu0  ;;  %v4114_v6 = vpop.f32.mrf.mxu1 }
0x10ba   :  { %v1241_v8 = vpop.f32.mrf.mxu1  ;;  %v1288_v9 = vpop.f32.mrf.mxu0 }
0x10bb   :  { %v1344_v10 = vmul.f32 0.25, %v1288_v9 }
0x10bc   :  { %v4115_v12 = vpop.f32.mrf.mxu1  ;;  %v4120_v35 = vpop.f32.mrf.mxu0 }
0x10bd   :  { %v1346_v13 = vadd.f32 %v1344_v10, %v4700_v61  ;;  %v3730_v10 = vld [vmem:[%s5616_s7 + $0x1] ss:$0 sm:$0xff] }
0x10be   :  { %v1291_v15 = vpop.f32.mrf.mxu0  ;;  %v1338_v36 = vpop.f32.mrf.mxu1 }
0x10bf   :  { %v1345_v16 = vmul.f32 0.25, %v1338_v36  ;;  %v1348_v17 = vsel %vm313_vm3, %v1346_v13, -inf }
0x10c0   :  { %v4126_v18 = vpop.f32.mrf.mxu1  ;;  %1349 = vmax.xlane.f32.xlu1 %v1348_v17  ;;  %v4121_v19 = vpop.f32.mrf.mxu0 }
0x10c1   :  { %v1347_v20 = vadd.f32 %v1345_v16, %v4705_v3 }
0x10c2   :  { %v1341_v46 = vpop.f32.mrf.mxu1 }
0x10c3   :  { %v1351_v21 = vsel %vm313_vm3, %v1347_v20, -inf }
0x10c4   :  { %1352 = vmax.xlane.f32.xlu0 %v1351_v21  ;;  %v4127_v22 = vpop.f32.mrf.mxu1 }
0x10d1   :  { %1372 = vrot.lane.b32.xlu1 %v4903_v7, %s5661_s24 }
0x1149   :  { %v1350_v23 = vpop.xlane.xlu1 %1349 }
0x114a   :  { %v1354_v61 = vsub.f32 %v1346_v13, %v1350_v23 }
0x114c   :  { %v1356_v24 = vmul.f32 1.442695, %v1354_v61 }
0x114d   :  { %v1353_v25 = vpop.xlane.xlu0 %1352  ;;  %v1373_v26 = vpop.permute.xlu1 %1372 }
0x114e   :  { %4429 = vpow2.f32 %v1356_v24  ;;  %v1355_v27 = vsub.f32 %v1347_v20, %v1353_v25  ;;  %v1378_v28 = vsel %vm343_vm4, %v1373_v26, 0  ;;  %v3758_v20 = vld [vmem:[%s5654_s23 + $0x10] sm:$0xff] }
0x114f   :  { %4129 = vmatpush3.bf16.msra.mxu0 %v1378_v28  ;;  %v1787_v46 = vsel %vm73_vm0, %v3758_v20, 0.0 }
0x1150   :  { %v1358_v29 = vmul.f32 1.442695, %v1355_v27  ;;  %4140 = vmatprep.subr.bf16.mxu0 %v4509_v14 }
0x1152   :  { %4431 = vpow2.f32 %v1358_v29 }
0x115b   :  { %v4430_v3 = vpop.eup %4429 }
0x115c   :  { %v1360_v42 = vsel %vm313_vm3, %v4430_v3, 0.0 }
0x115d   :  { %1361 = vadd.xlane.f32.xlu0 %v1360_v42 }
0x115f   :  { %v4432_v30 = vpop.eup %4431 }
0x1160   :  { %v1363_v7 = vsel %vm313_vm3, %v4432_v30, 0.0 }
0x1161   :  { %1364 = vadd.xlane.f32.xlu0 %v1363_v7 }
0x1177   :  { %1420 = vrot.lane.b32.xlu0 %v4907_v11, %s5661_s24 }
0x11e6   :  { %v1362_v31 = vpop.xlane.xlu0 %1361 }
0x11e7   :  { %4433 = vrcp.f32 %v1362_v31 }
0x11ea   :  { %v1365_v32 = vpop.xlane.xlu0 %1364 }
0x11eb   :  { %4435 = vrcp.f32 %v1365_v32 }
0x11ee   :  { %v1421_v33 = vpop.permute.xlu0 %1420 }
0x11ef   :  { %v1426_v37 = vsel %vm343_vm4, %v1421_v33, 0 }
0x11f0   :  { %4135 = vmatpush3.bf16.msra.mxu1 %v1426_v37 }
0x11f1   :  { %4148 = vmatprep.subr.bf16.mxu1 %v4509_v14 }
0x11f4   :  { %v4434_v38 = vpop.eup %4433 }
0x11f5   :  { %v1368_v34 = vmul.f32 %v4434_v38, %v4430_v3 }
0x11f7   :  { %v1370_v39 = vpack.c.bf16 %v1368_v34, %v1368_v34  ;;  %v3738_v34 = vld [vmem:[%s5617_s10 + $0x30] sm:$0xff] }
0x11f8   :  { %v4436_v40 = vpop.eup %4435 }
0x11f9   :  { %4131 = vmatmul.mubr.msk.bf16.vlgmr.msra.gmra.mxu0 %vm313_vm3, %v1370_v39  ;;  %v1369_v41 = vmul.f32 %v4436_v40, %v4432_v30  ;;  %v3739_v39 = vld [vmem:[%s5617_s10 + $0x38] sm:$0xff] }
0x11fa   :  { %4144 = vmatprep.mubr.msk.bf16.mxu0 %vm4510_vm1, %v4509_v14  ;;  %4141 = vmatpush3.bf16.msra.mxu0 %v1485_v45  ;;  %v1593_v40 = vpack.c.bf16 %v3739_v39, %v3738_v34 }
0x11fb   :  { %v1371_v11 = vpack.c.bf16 %v1369_v41, %v1369_v41  ;;  %4142 = vmatprep.subr.bf16.mxu0 %v4509_v14  ;;  %v3736_v41 = vld [vmem:[%s5617_s10 + $0x20] sm:$0xff] }
0x11fd   :  { %4137 = vmatmul.mubr.msk.bf16.vlgmr.msra.gmra.mxu1 %vm313_vm3, %v1371_v11  ;;  %v3737_v11 = vld [vmem:[%s5617_s10 + $0x28] sm:$0xff] }
0x11fe   :  { %4152 = vmatprep.mubr.msk.bf16.mxu1 %vm4510_vm1, %v4509_v14  ;;  %4143 = vmatpush3.bf16.msra.mxu0 %v1484_v51  ;;  %v1592_v43 = vpack.c.bf16 %v3737_v11, %v3736_v41 }
0x11ff   :  { %4156 = vmatprep.subr.bf16.mxu0 %v4509_v14  ;;  %4149 = vmatpush3.bf16.msra.mxu1 %v1593_v40 }
0x1200   :  { %4150 = vmatprep.subr.bf16.mxu1 %v4509_v14 }
0x1203   :  { %4151 = vmatpush3.bf16.msra.mxu1 %v1592_v43 }
0x1204   :  { %4168 = vmatprep.subr.bf16.mxu1 %v4509_v14 }
0x12b9   :  { %v1414_v52 = vpop.f32.mrf.mxu0 }
0x12bb   :  { %v4132_v53 = vpop.f32.mrf.mxu0 }
0x12bd   :  { %v1417_v54 = vpop.f32.mrf.mxu0  ;;  %v1462_v55 = vpop.f32.mrf.mxu1 }
0x12be   :  { %v4374_v57 = vpack.i.bf16 %v1462_v55, %v1414_v52 }
0x12bf   :  { %v4133_v58 = vpop.f32.mrf.mxu0  ;;  %v4138_v60 = vpop.f32.mrf.mxu1 }
0x12c0   :  { %4375 = vrot.lane.b32.xlu1 %v4374_v57, %s5662_s2 }
0x12c1   :  { %v1465_v62 = vpop.f32.mrf.mxu1 }
0x12c3   :  { %v4139_v63 = vpop.f32.mrf.mxu1 }
0x1332   :  { %v4376_v2 = vpop.permute.xlu1 %4375 }
0x1333   :  { %v4378_v47 = vunpack.i.h.bf16 %v4376_v2  ;;  %v4377_v5 = vunpack.i.l.bf16 %v4376_v2  ;;  %v3734_v2 = vld [vmem:[%s5618_s8 + $0x1] ss:$0 sm:$0xff] }
0x1335   :  { %v1477_v6 = vsel %vm180_vm2, %v4963_v4, %v4378_v47  ;;  %v1476_v8 = vsel %vm180_vm2, %v4961_v0, %v4377_v5  ;;  %v3759_v0 = vld [vmem:[%s5654_s23 + $0x18] sm:$0xff] }
0x1336   :  { %v1478_v9 = vpack.c.bf16 %v1477_v6, %v1476_v8  ;;  %v1790_v19 = vsel %vm73_vm0, %v3759_v0, 0.0  ;;  %v3735_v8 = vld [vmem:[%s5619_s9 + $0x1] ss:$0 sm:$0xff] }
0x1338   :  { %4145 = vmatmul.mubr.msk.bf16.vlgmr.msra.gmra.mxu0 %vm73_vm0, %v1478_v9 }
0x1339   :  { %4164 = vmatprep.mubr.msk.bf16.mxu0 %vm4510_vm1, %v4509_v14 }
0x13f8   :  { %v1531_v12 = vpop.f32.mrf.mxu0 }
0x13f9   :  { %v1532_v35 = vadd.f32 %v3730_v10, %v1531_v12  ;;  %v3768_v12 = vld [vmem:[%s5655_s26 + $0x58] sm:$0xff] }
0x13fa   :  { %v4146_v13 = vpop.f32.mrf.mxu0 }
0x13fb   :  { %v1538_v15 = vadd.f32 %v1532_v35, %v4891_v1  ;;  %v3763_v13 = vld [vmem:[%s5656_s22 + $0x1] ss:$0 sm:$0xff] }
0x13fc   :  { %v1534_v36 = vpop.f32.mrf.mxu0 }
0x13fd   :  { %v1535_v4 = vadd.f32 %v3730_v10, %v1534_v36  ;;  %v1544_v16 = vsel %vm73_vm0, %v1538_v15, 0.0  ;;  %v3767_v10 = vld [vmem:[%s5655_s26 + $0x50] sm:$0xff] }
0x13fe   :  { %1545 = vadd.xlane.f32.xlu1 %v1544_v16  ;;  %v4147_v17 = vpop.f32.mrf.mxu0  ;;  %v3764_v16 = vld [vmem:[%s5657_s25 + $0x1] ss:$0 sm:$0xff] }
0x13ff   :  { %v1539_v18 = vadd.f32 %v1535_v4, %v4893_v50 }
0x1401   :  { %v1547_v1 = vsel %vm73_vm0, %v1539_v18, 0.0 }
0x1402   :  { %1548 = vadd.xlane.f32.xlu0 %v1547_v1  ;;  %1791 = vadd.xlane.f32.xlu1 %v1790_v19  ;;  %v3766_v1 = vld [vmem:[%s5655_s26 + $0x48] sm:$0xff] }
0x1406   :  { %1788 = vadd.xlane.f32.xlu0 %v1787_v46 }
0x1487   :  { %v1546_v21 = vpop.xlane.xlu1 %1545 }
0x1488   :  { %v1550_v22 = vmul.f32 0.03125, %v1546_v21 }
0x148a   :  { %v1552_v23 = vsub.f32 %v1538_v15, %v1550_v22 }
0x148b   :  { %v1549_v61 = vpop.xlane.xlu0 %1548  ;;  %v1792_v24 = vpop.xlane.xlu1 %1791 }
0x148c   :  { %v1551_v25 = vmul.f32 0.03125, %v1549_v61  ;;  %v1794_v50 = vmul.f32 0.03125, %v1792_v24  ;;  %v1554_v26 = vmul.f32 %v1552_v23, %v1552_v23 }
0x148e   :  { %v1553_v27 = vsub.f32 %v1539_v18, %v1551_v25  ;;  %v1796_v28 = vsub.f32 %v3759_v0, %v1794_v50  ;;  %v1556_v29 = vsel %vm73_vm0, %v1554_v26, 0.0  ;;  %v1836_v18 = vpack.c.bf16 %v3768_v12, %v3767_v10  ;;  %v3749_v25 = vld [vmem:[%s5620_s12 + $0x70] sm:$0xff]  ;;  %v3750_v50 = vld [vmem:[%s5620_s12 + $0x78] sm:$0xff] }
0x148f   :  { %1557 = vadd.xlane.f32.xlu0 %v1556_v29  ;;  %v1789_v3 = vpop.xlane.xlu0 %1788  ;;  %v1677_v26 = vpack.c.bf16 %v3750_v50, %v3749_v25 }
0x1490   :  { %v1793_v42 = vmul.f32 0.03125, %v1789_v3  ;;  %v1555_v30 = vmul.f32 %v1553_v27, %v1553_v27  ;;  %v1798_v7 = vmul.f32 %v1796_v28, %v1796_v28  ;;  %v3745_v3 = vld [vmem:[%s5620_s12 + $0x50] sm:$0xff] }
0x1491   :  { %4157 = vmatpush3.bf16.msra.mxu0 %v1677_v26 }
0x1492   :  { %v1795_v31 = vsub.f32 %v3758_v20, %v1793_v42  ;;  %v1559_v32 = vsel %vm73_vm0, %v1555_v30, 0.0  ;;  %v1802_v33 = vsel %vm73_vm0, %v1798_v7, 0.0  ;;  %v3765_v20 = vld [vmem:[%s5655_s26 + $0x40] sm:$0xff]  ;;  %4158 = vmatprep.subr.bf16.mxu0 %v4509_v14  ;;  %v3746_v42 = vld [vmem:[%s5620_s12 + $0x58] sm:$0xff] }
0x1493   :  { %1560 = vadd.xlane.f32.xlu1 %v1559_v32  ;;  %v1675_v30 = vpack.c.bf16 %v3746_v42, %v3745_v3  ;;  %v3743_v7 = vld [vmem:[%s5620_s12 + $0x40] sm:$0xff] }
0x1494   :  { %v1797_v37 = vmul.f32 %v1795_v31, %v1795_v31 }
0x1496   :  { %v1799_v38 = vsel %vm73_vm0, %v1797_v37, 0.0 }
0x1497   :  { %1803 = vadd.xlane.f32.xlu1 %v1802_v33  ;;  %1800 = vadd.xlane.f32.xlu0 %v1799_v38  ;;  %v3741_v33 = vld [vmem:[%s5621_s11 + $0x1] ss:$0 sm:$0xff] }
0x1518   :  { %v1558_v44 = vpop.xlane.xlu0 %1557 }
0x1519   :  { %v1562_v45 = vmul.f32 0.03125, %v1558_v44  ;;  %v3770_v44 = vld [vmem:[%s5658_s28 + $0x2] ss:$0 sm:$0xff] }
0x151b   :  { %v1564_v48 = vadd.f32 1e-12, %v1562_v45 }
0x151c   :  { %v1561_v49 = vpop.xlane.xlu1 %1560 }
0x151d   :  { %4437 = vrsqrt.f32 %v1564_v48  ;;  %v1563_v51 = vmul.f32 0.03125, %v1561_v49 }
0x151f   :  { %v1565_v52 = vadd.f32 1e-12, %v1563_v51 }
0x1520   :  { %v1804_v53 = vpop.xlane.xlu1 %1803  ;;  %v1801_v54 = vpop.xlane.xlu0 %1800 }
0x1521   :  { %4439 = vrsqrt.f32 %v1565_v52  ;;  %v1806_v55 = vmul.f32 0.03125, %v1804_v53  ;;  %v1805_v57 = vmul.f32 0.03125, %v1801_v54 }
0x1523   :  { %v1808_v58 = vadd.f32 1e-12, %v1806_v55  ;;  %v1807_v60 = vadd.f32 1e-12, %v1805_v57 }
0x1525   :  { %4441 = vrsqrt.f32 %v1808_v58 }
0x1526   :  { %4443 = vrsqrt.f32 %v1807_v60 }
0x152a   :  { %v4438_v62 = vpop.eup %4437 }
0x152b   :  { %v1568_v63 = vmul.f32 %v4438_v62, %v1552_v23  ;;  %v1835_v23 = vpack.c.bf16 %v3766_v1, %v3765_v20 }
0x152d   :  { %v1576_v6 = vmul.f32 %v3734_v2, %v1568_v63 }
0x152e   :  { %v4440_v47 = vpop.eup %4439 }
0x152f   :  { %v1569_v5 = vmul.f32 %v4440_v47, %v1553_v27  ;;  %v5055_v0 = vadd.f32 %v3735_v8, %v1576_v6  ;;  %v3747_v27 = vld [vmem:[%s5620_s12 + $0x60] sm:$0xff] }
0x1531   :  { %v1577_v9 = vmul.f32 %v3734_v2, %v1569_v5 }
0x1532   :  { %v4442_v35 = vpop.eup %4441 }
0x1533   :  { %v4444_v15 = vpop.eup %4443  ;;  %v1812_v36 = vmul.f32 %v4442_v35, %v1796_v28  ;;  %v5057_v4 = vadd.f32 %v3735_v8, %v1577_v9  ;;  %v3748_v28 = vld [vmem:[%s5620_s12 + $0x68] sm:$0xff] }
0x1534   :  { %v1811_v17 = vmul.f32 %v4444_v15, %v1795_v31  ;;  %v1676_v29 = vpack.c.bf16 %v3748_v28, %v3747_v27  ;;  %v3744_v31 = vld [vmem:[%s5620_s12 + $0x48] sm:$0xff] }
0x1535   :  { %v1586_v19 = vpack.c.bf16 %v5057_v4, %v5055_v0  ;;  %v1820_v46 = vmul.f32 %v3763_v13, %v1812_v36  ;;  %v1674_v32 = vpack.c.bf16 %v3744_v31, %v3743_v7 }
0x1536   :  { %v1819_v21 = vmul.f32 %v3763_v13, %v1811_v17  ;;  %4159 = vmatpush3.bf16.msra.mxu0 %v1676_v29 }
0x1537   :  { %4153 = vmatmul.mubr.msk.bf16.vlgmr.msra.gmra.mxu1 %vm73_vm0, %v1586_v19  ;;  %v5071_v22 = vadd.f32 %v3764_v16, %v1820_v46  ;;  %4160 = vmatprep.subr.bf16.mxu0 %v4509_v14 }
0x1538   :  { %4169 = vmatpush3.bf16.msra.mxu1 %v1836_v18  ;;  %4172 = vmatprep.mubr.msk.bf16.mxu1 %vm4510_vm1, %v4509_v14  ;;  %v5075_v61 = vadd.f32 %v3764_v16, %v1819_v21 }
0x1539   :  { %4170 = vmatprep.subr.bf16.mxu1 %v4509_v14 }
0x153a   :  { %v1829_v24 = vpack.c.bf16 %v5071_v22, %v5075_v61  ;;  %4161 = vmatpush3.bf16.msra.mxu0 %v1675_v30 }
0x153b   :  { %4162 = vmatprep.subr.bf16.mxu0 %v4509_v14 }
0x153c   :  { %4171 = vmatpush3.bf16.msra.mxu1 %v1835_v23  ;;  %v3774_v23 = vld.sshfl [vmem:[%s5614_s1 + $0x2] sm:$0x11 pattern:$0x75316420]  ;;  %s5664_s1 = smov 64  }
0x153d   :  { %4176 = vmatprep.subr.bf16.mxu1 %v4509_v14  ;;  %v1999_v25 = vcombine.high %v3774_v23, %v3774_v23 }
0x153e   :  { %4163 = vmatpush3.bf16.msra.mxu0 %v1674_v32 }
0x153f   :  { %4173 = vmatmul.mubr.msk.bf16.vlgmr.msra.gmra.mxu1 %vm73_vm0, %v1829_v24  ;;  %4182 = vmatprep.subr.bf16.mxu0 %v4509_v14  ;;  %v2006_v24 = vrot.slane %v3774_v23, %v4691_v56  ;;  %v2013_v26 = vrot.slane %v1999_v25, %v4691_v56 }
0x1540   :  { %4178 = vmatprep.mubr.msk.bf16.mxu1 %vm4510_vm1, %v4509_v14 }
0x1541   :  { %v5150_v50 = vrot.slane %v2006_v24, %v4697_v59  ;;  %v5155_v42 = vrot.slane %v2013_v26, %v4697_v59 }
0x15f7   :  { %v1639_v37 = vpop.f32.mrf.mxu1 }
0x15f8   :  { %v1640_v38 = vadd.f32 %v3741_v33, %v1639_v37 }
0x15f9   :  { %v4154_v34 = vpop.f32.mrf.mxu1 }
0x15fa   :  { %v1646_v39 = vmul.f32 %v1640_v38, %v1640_v38 }
0x15fb   :  { %v1642_v40 = vpop.f32.mrf.mxu1 }
0x15fc   :  { %v1648_v41 = vmul.f32 %v1646_v39, %v1640_v38  ;;  %v1643_v11 = vadd.f32 %v3741_v33, %v1642_v40 }
0x15fd   :  { %v4155_v43 = vpop.f32.mrf.mxu1 }
0x15fe   :  { %v1650_v45 = vmul.f32 0.044715, %v1648_v41  ;;  %v1647_v48 = vmul.f32 %v1643_v11, %v1643_v11 }
0x15ff   :  { %v1882_v49 = vpop.f32.mrf.mxu1 }
0x1600   :  { %v1652_v51 = vadd.f32 %v1650_v45, %v1640_v38  ;;  %v1649_v52 = vmul.f32 %v1647_v48, %v1643_v11  ;;  %v1883_v53 = vadd.f32 %v3770_v44, %v1882_v49 }
0x1601   :  { %v4174_v54 = vpop.f32.mrf.mxu1 }
0x1602   :  { %v1654_v55 = vmul.f32 0.7978846, %v1652_v51  ;;  %v1651_v57 = vmul.f32 0.044715, %v1649_v52  ;;  %v5118_v58 = vpack.c.bf16 %v1883_v53, %v1883_v53 }
0x1603   :  { %v1885_v60 = vpop.f32.mrf.mxu1 }
0x1604   :  { %4445 = vtanh.f32 %v1654_v55  ;;  %v1653_v62 = vadd.f32 %v1651_v57, %v1643_v11  ;;  %v1886_v63 = vadd.f32 %v3770_v44, %v1885_v60  ;;  %1892 = vrot.lane.b32.xlu0 %v5118_v58, %s5663_s17 }
0x1605   :  { %v4175_v2 = vpop.f32.mrf.mxu1 }
0x1606   :  { %v1655_v47 = vmul.f32 0.7978846, %v1653_v62  ;;  %v5122_v5 = vpack.c.bf16 %v1886_v63, %v1886_v63 }
0x1608   :  { %4447 = vtanh.f32 %v1655_v47  ;;  %1941 = vrot.lane.b32.xlu1 %v5122_v5, %s5663_s17 }
0x1611   :  { %v4446_v6 = vpop.eup %4445 }
0x1612   :  { %v1658_v8 = vadd.f32 1.0, %v4446_v6 }
0x1614   :  { %v1660_v10 = vmul.f32 0.5, %v1658_v8 }
0x1615   :  { %v4448_v9 = vpop.eup %4447 }
0x1616   :  { %v1659_v12 = vadd.f32 1.0, %v4448_v9  ;;  %v1662_v13 = vmul.f32 %v1660_v10, %v1640_v38 }
0x1618   :  { %v1661_v35 = vmul.f32 0.5, %v1659_v12 }
0x161a   :  { %v1663_v15 = vmul.f32 %v1661_v35, %v1643_v11 }
0x161c   :  { %v1664_v36 = vpack.c.bf16 %v1663_v15, %v1662_v13 }
0x161e   :  { %4165 = vmatmul.mubr.msk.bf16.vlgmr.msra.gmra.mxu0 %vm869_vm5, %v1664_v36 }
0x161f   :  { %4184 = vmatprep.mubr.msk.bf16.mxu0 %vm4510_vm1, %v4509_v14 }
0x1676   :  { %v1893_v16 = vpop.permute.xlu0 %1892 }
0x1677   :  { %v1898_v17 = vsel %vm180_vm2, %v1893_v16, 0 }
0x1678   :  { %4177 = vmatpush3.bf16.xpose.msra.mxu1 %v1898_v17 }
0x1679   :  { %4188 = vmatprep.subr.bf16.mxu1 %v4509_v14 }
0x167a   :  { %v1942_v18 = vpop.permute.xlu1 %1941 }
0x167b   :  { %v1947_v19 = vsel %vm180_vm2, %v1942_v18, 0 }
0x167c   :  { %4183 = vmatpush3.bf16.xpose.msra.mxu0 %v1947_v19 }
0x167d   :  { %4194 = vmatprep.subr.bf16.mxu0 %v4509_v14 }
0x167f   :  { %4179 = vmatmul.mubr.msk.bf16.vlgmr.msra.gmra.mxu1 %vm180_vm2, %v5118_v58 }
0x1680   :  { %4190 = vmatprep.mubr.msk.bf16.mxu1 %vm4510_vm1, %v4509_v14 }
0x1683   :  { %4185 = vmatmul.mubr.msk.bf16.vlgmr.msra.gmra.mxu0 %vm180_vm2, %v5122_v5 }
0x1684   :  { %4196 = vmatprep.mubr.msk.bf16.mxu0 %vm4510_vm1, %v4509_v14 }
0x16de   :  { %v5141_v20 = vpop.f32.mrf.mxu0 }
0x16e0   :  { %v4166_v1 = vpop.f32.mrf.mxu0 }
0x16e2   :  { %v5143_v46 = vpop.f32.mrf.mxu0 }
0x16e4   :  { %v4167_v21 = vpop.f32.mrf.mxu0 }
0x173f   :  { %v1934_v27 = vpop.f32.mrf.mxu1 }
0x1740   :  { %v1989_v28 = vmul.f32 0.25, %v1934_v27 }
0x1741   :  { %v4180_v29 = vpop.f32.mrf.mxu1 }
0x1742   :  { %v2024_v3 = vadd.f32 %v5150_v50, %v1989_v28 }
0x1743   :  { %v1937_v30 = vpop.f32.mrf.mxu1  ;;  %v1983_v7 = vpop.f32.mrf.mxu0 }
0x1744   :  { %v1990_v31 = vmul.f32 0.25, %v1983_v7  ;;  %v2026_v32 = vsel %vm313_vm3, %v2024_v3, -inf }
0x1745   :  { %2027 = vmax.xlane.f32.xlu1 %v2026_v32  ;;  %v4181_v33 = vpop.f32.mrf.mxu1  ;;  %v4186_v37 = vpop.f32.mrf.mxu0 }
0x1746   :  { %v2025_v38 = vadd.f32 %v5155_v42, %v1990_v31 }
0x1747   :  { %v1986_v34 = vpop.f32.mrf.mxu0 }
0x1748   :  { %v2029_v56 = vsel %vm313_vm3, %v2025_v38, -inf }
0x1749   :  { %2030 = vmax.xlane.f32.xlu0 %v2029_v56  ;;  %v4187_v39 = vpop.f32.mrf.mxu0 }
0x1756   :  { %2098 = vrot.lane.b32.xlu1 %v5122_v5, %s5664_s1 }
0x175a   :  { %2148 = vrot.lane.b32.xlu1 %v5118_v58, %s5659_s21 }
0x17ce   :  { %v2028_v59 = vpop.xlane.xlu1 %2027 }
0x17cf   :  { %v2032_v40 = vsub.f32 %v2024_v3, %v2028_v59 }
0x17d1   :  { %v2034_v41 = vmul.f32 1.442695, %v2032_v40 }
0x17d2   :  { %v2099_v11 = vpop.permute.xlu1 %2098  ;;  %v2031_v43 = vpop.xlane.xlu0 %2030 }
0x17d3   :  { %4449 = vpow2.f32 %v2034_v41  ;;  %v2104_v44 = vsel %vm343_vm4, %v2099_v11, 0  ;;  %v2033_v45 = vsub.f32 %v2025_v38, %v2031_v43 }
0x17d4   :  { %4195 = vmatpush3.bf16.msra.mxu0 %v2104_v44 }
0x17d5   :  { %v2036_v48 = vmul.f32 1.442695, %v2033_v45  ;;  %4206 = vmatprep.subr.bf16.mxu0 %v4509_v14 }
0x17d6   :  { %v2149_v54 = vpop.permute.xlu1 %2148 }
0x17d7   :  { %4451 = vpow2.f32 %v2036_v48  ;;  %v2154_v8 = vsel %vm180_vm2, %v2149_v54, 0 }
0x17e0   :  { %v4450_v49 = vpop.eup %4449 }
0x17e1   :  { %v2038_v51 = vsel %vm313_vm3, %v4450_v49, 0.0 }
0x17e2   :  { %2039 = vadd.xlane.f32.xlu0 %v2038_v51 }
0x17e4   :  { %v4452_v52 = vpop.eup %4451 }
0x17e5   :  { %v2041_v53 = vsel %vm313_vm3, %v4452_v52, 0.0 }
0x17e6   :  { %2042 = vadd.xlane.f32.xlu1 %v2041_v53 }
0x17f7   :  { %2198 = vrot.lane.b32.xlu1 %v5122_v5, %s5659_s21 }
0x17f8   :  { %2050 = vrot.lane.b32.xlu0 %v5118_v58, %s5664_s1 }
0x17fb   :  { %2196 = vrot.lane.b32.xlu1 %v5122_v5, %s5660_s4 }
0x17fc   :  { %2146 = vrot.lane.b32.xlu0 %v5118_v58, %s5660_s4 }
0x186b   :  { %v2040_v55 = vpop.xlane.xlu0 %2039 }
0x186c   :  { %4453 = vrcp.f32 %v2040_v55 }
0x186f   :  { %v2043_v57 = vpop.xlane.xlu1 %2042  ;;  %v2051_v60 = vpop.permute.xlu0 %2050 }
0x1870   :  { %4455 = vrcp.f32 %v2043_v57  ;;  %v2056_v62 = vsel %vm343_vm4, %v2051_v60, 0 }
0x1871   :  { %4189 = vmatpush3.bf16.msra.mxu1 %v2056_v62 }
0x1872   :  { %4200 = vmatprep.subr.bf16.mxu1 %v4509_v14 }
0x1873   :  { %v2199_v10 = vpop.permute.xlu1 %2198  ;;  %v2147_v13 = vpop.permute.xlu0 %2146 }
0x1874   :  { %v2204_v35 = vsel %vm180_vm2, %v2199_v10, 0 }
0x1877   :  { %v2197_v15 = vpop.permute.xlu1 %2196 }
0x1879   :  { %v4454_v63 = vpop.eup %4453 }
0x187a   :  { %v2046_v2 = vmul.f32 %v4454_v63, %v4450_v49  ;;  %v3783_v63 = vld [vmem:[%s5615_s6 + $0x50] sm:$0xff] }
0x187c   :  { %v2048_v47 = vpack.c.bf16 %v2046_v2, %v2046_v2  ;;  %v3784_v2 = vld [vmem:[%s5615_s6 + $0x58] sm:$0xff] }
0x187d   :  { %v4456_v6 = vpop.eup %4455 }
0x187e   :  { %4191 = vmatmul.mubr.msk.bf16.vlgmr.msra.gmra.mxu1 %vm313_vm3, %v2048_v47  ;;  %v2047_v9 = vmul.f32 %v4456_v6, %v4452_v52  ;;  %v2387_v47 = vpack.c.bf16 %v3784_v2, %v3783_v63  ;;  %v3781_v6 = vld [vmem:[%s5615_s6 + $0x40] sm:$0xff] }
0x187f   :  { %4201 = vmatpush3.bf16.xpose.msra.mxu1 %v2154_v8  ;;  %4202 = vmatprep.mubr.msk.bf16.mxu1 %vm4510_vm1, %v4509_v14  ;;  %v3782_v8 = vld [vmem:[%s5615_s6 + $0x48] sm:$0xff] }
0x1880   :  { %v2049_v12 = vpack.c.bf16 %v2047_v9, %v2047_v9  ;;  %4212 = vmatprep.subr.bf16.mxu1 %v4509_v14  ;;  %v2386_v9 = vpack.c.bf16 %v3782_v8, %v3781_v6  ;;  %v3791_v6 = vld [vmem:[%s5619_s9 + $0x2] ss:$0 sm:$0xff] }
0x1882   :  { %4197 = vmatmul.mubr.msk.bf16.vlgmr.msra.gmra.mxu0 %vm313_vm3, %v2049_v12 }
0x1883   :  { %4207 = vmatpush3.bf16.xpose.msra.mxu0 %v2204_v35  ;;  %4208 = vmatprep.mubr.msk.bf16.mxu0 %vm4510_vm1, %v4509_v14 }
0x1884   :  { %4218 = vmatprep.subr.bf16.mxu0 %v4509_v14 }
0x1886   :  { %4203 = vmatmul.mubr.msk.bf16.vlgmr.msra.gmra.mxu1 %vm180_vm2, %v2147_v13 }
0x1887   :  { %4214 = vmatprep.mubr.msk.bf16.mxu1 %vm4510_vm1, %v4509_v14 }
0x188a   :  { %4209 = vmatmul.mubr.msk.bf16.vlgmr.msra.gmra.mxu0 %vm180_vm2, %v2197_v15 }
0x188b   :  { %4220 = vmatprep.mubr.msk.bf16.mxu0 %vm4510_vm1, %v4509_v14 }
0x193e   :  { %v5194_v36 = vpop.f32.mrf.mxu1 }
0x1940   :  { %v4192_v16 = vpop.f32.mrf.mxu1 }
0x1942   :  { %v2095_v17 = vpop.f32.mrf.mxu1  ;;  %v5196_v18 = vpop.f32.mrf.mxu0 }
0x1944   :  { %v4193_v19 = vpop.f32.mrf.mxu1  ;;  %v4198_v1 = vpop.f32.mrf.mxu0 }
0x1946   :  { %v2143_v21 = vpop.f32.mrf.mxu0  ;;  %v2190_v23 = vpop.f32.mrf.mxu1 }
0x1947   :  { %v2246_v24 = vmul.f32 0.25, %v2190_v23 }
0x1948   :  { %v4199_v25 = vpop.f32.mrf.mxu0  ;;  %v4204_v26 = vpop.f32.mrf.mxu1 }
0x1949   :  { %v2248_v27 = vadd.f32 %v2246_v24, %v5150_v50 }
0x194a   :  { %v2193_v28 = vpop.f32.mrf.mxu1  ;;  %v2240_v29 = vpop.f32.mrf.mxu0 }
0x194b   :  { %v2247_v3 = vmul.f32 0.25, %v2240_v29  ;;  %v2250_v30 = vsel %vm313_vm3, %v2248_v27, -inf  ;;  %v3786_v28 = vld [vmem:[%s5616_s7 + $0x2] ss:$0 sm:$0xff] }
0x194c   :  { %2251 = vmax.xlane.f32.xlu0 %v2250_v30  ;;  %v4205_v7 = vpop.f32.mrf.mxu1  ;;  %v4210_v31 = vpop.f32.mrf.mxu0 }
0x194d   :  { %v2249_v32 = vadd.f32 %v2247_v3, %v5155_v42 }
0x194e   :  { %v2243_v33 = vpop.f32.mrf.mxu0 }
0x194f   :  { %v2253_v37 = vsel %vm313_vm3, %v2249_v32, -inf }
0x1950   :  { %2254 = vmax.xlane.f32.xlu1 %v2253_v37  ;;  %v4211_v38 = vpop.f32.mrf.mxu0 }
0x1961   :  { %2322 = vrot.lane.b32.xlu1 %v5122_v5, %s5661_s24 }
0x19d5   :  { %v2252_v34 = vpop.xlane.xlu0 %2251 }
0x19d6   :  { %v2256_v56 = vsub.f32 %v2248_v27, %v2252_v34 }
0x19d8   :  { %v2258_v39 = vmul.f32 1.442695, %v2256_v56 }
0x19d9   :  { %v2255_v59 = vpop.xlane.xlu1 %2254 }
0x19da   :  { %4457 = vpow2.f32 %v2258_v39  ;;  %v2257_v40 = vsub.f32 %v2249_v32, %v2255_v59 }
0x19dc   :  { %v2260_v41 = vmul.f32 1.442695, %v2257_v40 }
0x19dd   :  { %v2323_v11 = vpop.permute.xlu1 %2322 }
0x19de   :  { %4459 = vpow2.f32 %v2260_v41  ;;  %v2328_v43 = vsel %vm343_vm4, %v2323_v11, 0 }
0x19df   :  { %4219 = vmatpush3.bf16.msra.mxu0 %v2328_v43 }
0x19e0   :  { %4232 = vmatprep.subr.bf16.mxu0 %v4509_v14 }
0x19e7   :  { %v4458_v44 = vpop.eup %4457 }
0x19e8   :  { %v2262_v45 = vsel %vm313_vm3, %v4458_v44, 0.0 }
0x19e9   :  { %2263 = vadd.xlane.f32.xlu0 %v2262_v45 }
0x19eb   :  { %v4460_v48 = vpop.eup %4459 }
0x19ec   :  { %v2265_v5 = vsel %vm313_vm3, %v4460_v48, 0.0 }
0x19ed   :  { %2266 = vadd.xlane.f32.xlu0 %v2265_v5  ;;  %v3793_v5 = vld [vmem:[%s5617_s10 + $0x48] sm:$0xff] }
0x1a03   :  { %2274 = vrot.lane.b32.xlu0 %v5118_v58, %s5661_s24 }
0x1a72   :  { %v2264_v49 = vpop.xlane.xlu0 %2263 }
0x1a73   :  { %4461 = vrcp.f32 %v2264_v49 }
0x1a76   :  { %v2267_v51 = vpop.xlane.xlu0 %2266 }
0x1a77   :  { %4463 = vrcp.f32 %v2267_v51 }
0x1a7a   :  { %v2275_v52 = vpop.permute.xlu0 %2274 }
0x1a7b   :  { %v2280_v53 = vsel %vm343_vm4, %v2275_v52, 0 }
0x1a7c   :  { %4213 = vmatpush3.bf16.msra.mxu1 %v2280_v53 }
0x1a7d   :  { %4224 = vmatprep.subr.bf16.mxu1 %v4509_v14 }
0x1a80   :  { %v4462_v54 = vpop.eup %4461 }
0x1a81   :  { %v2270_v55 = vmul.f32 %v4462_v54, %v4458_v44  ;;  %v3795_v44 = vld [vmem:[%s5617_s10 + $0x58] sm:$0xff] }
0x1a83   :  { %v2272_v57 = vpack.c.bf16 %v2270_v55, %v2270_v55 }
0x1a84   :  { %v4464_v60 = vpop.eup %4463 }
0x1a85   :  { %4215 = vmatmul.mubr.msk.bf16.vlgmr.msra.gmra.mxu1 %vm313_vm3, %v2272_v57  ;;  %v2271_v62 = vmul.f32 %v4464_v60, %v4460_v48  ;;  %v3792_v48 = vld [vmem:[%s5617_s10 + $0x40] sm:$0xff] }
0x1a86   :  { %4228 = vmatprep.mubr.msk.bf16.mxu1 %vm4510_vm1, %v4509_v14  ;;  %4225 = vmatpush3.bf16.msra.mxu1 %v2387_v47  ;;  %v2494_v49 = vpack.c.bf16 %v3793_v5, %v3792_v48  ;;  %v3808_v5 = vld [vmem:[%s5622_s13 + $0x2] ss:$0 sm:$0xff] }
0x1a87   :  { %v2273_v58 = vpack.c.bf16 %v2271_v62, %v2271_v62  ;;  %4226 = vmatprep.subr.bf16.mxu1 %v4509_v14 }
0x1a89   :  { %4221 = vmatmul.mubr.msk.bf16.vlgmr.msra.gmra.mxu0 %vm313_vm3, %v2273_v58  ;;  %v3790_v58 = vld [vmem:[%s5618_s8 + $0x2] ss:$0 sm:$0xff] }
0x1a8a   :  { %4236 = vmatprep.mubr.msk.bf16.mxu0 %vm4510_vm1, %v4509_v14  ;;  %4227 = vmatpush3.bf16.msra.mxu1 %v2386_v9 }
0x1a8b   :  { %4240 = vmatprep.subr.bf16.mxu1 %v4509_v14 }
0x1b45   :  { %v2316_v10 = vpop.f32.mrf.mxu1 }
0x1b47   :  { %v4216_v12 = vpop.f32.mrf.mxu1 }
0x1b49   :  { %v2319_v35 = vpop.f32.mrf.mxu1  ;;  %v2364_v13 = vpop.f32.mrf.mxu0 }
0x1b4a   :  { %v4379_v15 = vpack.i.bf16 %v2364_v13, %v2316_v10  ;;  %v3805_v35 = vld [vmem:[%s5620_s12 + $0xb0] sm:$0xff]  ;;  %v3806_v13 = vld [vmem:[%s5620_s12 + $0xb8] sm:$0xff] }
0x1b4b   :  { %v4217_v16 = vpop.f32.mrf.mxu1  ;;  %v4222_v17 = vpop.f32.mrf.mxu0 }
0x1b4c   :  { %4380 = vrot.lane.b32.xlu1 %v4379_v15, %s5662_s2  ;;  %v2579_v15 = vpack.c.bf16 %v3806_v13, %v3805_v35  ;;  %v3803_v16 = vld [vmem:[%s5620_s12 + $0xa0] sm:$0xff]  ;;  %v3804_v17 = vld [vmem:[%s5620_s12 + $0xa8] sm:$0xff] }
0x1b4d   :  { %v2367_v19 = vpop.f32.mrf.mxu0 }
0x1b4e   :  { %v2578_v19 = vpack.c.bf16 %v3804_v17, %v3803_v16  ;;  %v3817_v16 = vld [vmem:[%s5655_s26 + $0x78] sm:$0xff] }
0x1b4f   :  { %v4223_v1 = vpop.f32.mrf.mxu0 }
0x1b50   :  { %v3801_v1 = vld [vmem:[%s5620_s12 + $0x90] sm:$0xff] }
0x1bbe   :  { %v4381_v21 = vpop.permute.xlu1 %4380 }
0x1bbf   :  { %v4383_v23 = vunpack.i.h.bf16 %v4381_v21  ;;  %v4382_v24 = vunpack.i.l.bf16 %v4381_v21  ;;  %v3802_v21 = vld [vmem:[%s5620_s12 + $0x98] sm:$0xff] }
0x1bc1   :  { %v2379_v25 = vsel %vm180_vm2, %v5196_v18, %v4383_v23  ;;  %v2378_v26 = vsel %vm180_vm2, %v5194_v36, %v4382_v24  ;;  %v2577_v23 = vpack.c.bf16 %v3802_v21, %v3801_v1  ;;  %v3799_v24 = vld [vmem:[%s5620_s12 + $0x80] sm:$0xff]  ;;  %v3815_v1 = vld [vmem:[%s5655_s26 + $0x68] sm:$0xff] }
0x1bc2   :  { %v2380_v27 = vpack.c.bf16 %v2379_v25, %v2378_v26  ;;  %v3800_v25 = vld [vmem:[%s5620_s12 + $0x88] sm:$0xff] }
0x1bc3   :  { %v2576_v26 = vpack.c.bf16 %v3800_v25, %v3799_v24 }
0x1bc4   :  { %4229 = vmatmul.mubr.msk.bf16.vlgmr.msra.gmra.mxu1 %vm73_vm0, %v2380_v27  ;;  %v3797_v27 = vld [vmem:[%s5621_s11 + $0x2] ss:$0 sm:$0xff] }
0x1bc5   :  { %4248 = vmatprep.mubr.msk.bf16.mxu1 %vm4510_vm1, %v4509_v14  ;;  %4241 = vmatpush3.bf16.msra.mxu1 %v2579_v15 }
0x1bc6   :  { %4242 = vmatprep.subr.bf16.mxu1 %v4509_v14 }
0x1bc9   :  { %4243 = vmatpush3.bf16.msra.mxu1 %v2578_v19  ;;  %v3814_v19 = vld [vmem:[%s5655_s26 + $0x60] sm:$0xff] }
0x1bca   :  { %4244 = vmatprep.subr.bf16.mxu1 %v4509_v14  ;;  %v2686_v21 = vpack.c.bf16 %v3815_v1, %v3814_v19 }
0x1bcd   :  { %4245 = vmatpush3.bf16.msra.mxu1 %v2577_v23 }
0x1bce   :  { %4246 = vmatprep.subr.bf16.mxu1 %v4509_v14 }
0x1bd1   :  { %4247 = vmatpush3.bf16.msra.mxu1 %v2576_v26 }
0x1bd2   :  { %4266 = vmatprep.subr.bf16.mxu1 %v4509_v14 }
0x1c84   :  { %v2433_v29 = vpop.f32.mrf.mxu1 }
0x1c85   :  { %v2434_v3 = vadd.f32 %v3786_v28, %v2433_v29 }
0x1c86   :  { %v4230_v30 = vpop.f32.mrf.mxu1 }
0x1c87   :  { %v2440_v7 = vadd.f32 %v2434_v3, %v5075_v61 }
0x1c88   :  { %v2436_v31 = vpop.f32.mrf.mxu1 }
0x1c89   :  { %v2437_v18 = vadd.f32 %v3786_v28, %v2436_v31  ;;  %v2446_v32 = vsel %vm73_vm0, %v2440_v7, 0.0 }
0x1c8a   :  { %2447 = vadd.xlane.f32.xlu1 %v2446_v32  ;;  %v4231_v36 = vpop.f32.mrf.mxu1 }
0x1c8b   :  { %v2441_v33 = vadd.f32 %v2437_v18, %v5071_v22  ;;  %v3794_v22 = vld [vmem:[%s5617_s10 + $0x50] sm:$0xff] }
0x1c8c   :  { %v2495_v45 = vpack.c.bf16 %v3795_v44, %v3794_v22 }
0x1c8d   :  { %v2449_v37 = vsel %vm73_vm0, %v2441_v33, 0.0 }
0x1c8e   :  { %2450 = vadd.xlane.f32.xlu0 %v2449_v37  ;;  %4233 = vmatpush3.bf16.msra.mxu0 %v2495_v45 }
0x1c8f   :  { %4234 = vmatprep.subr.bf16.mxu0 %v4509_v14 }
0x1c92   :  { %4235 = vmatpush3.bf16.msra.mxu0 %v2494_v49 }
0x1c93   :  { %4252 = vmatprep.subr.bf16.mxu0 %v4509_v14 }
0x1d13   :  { %v2448_v38 = vpop.xlane.xlu1 %2447 }
0x1d14   :  { %v2452_v34 = vmul.f32 0.03125, %v2448_v38 }
0x1d16   :  { %v2454_v56 = vsub.f32 %v2440_v7, %v2452_v34 }
0x1d17   :  { %v2451_v39 = vpop.xlane.xlu0 %2450 }
0x1d18   :  { %v2453_v59 = vmul.f32 0.03125, %v2451_v39  ;;  %v2456_v40 = vmul.f32 %v2454_v56, %v2454_v56 }
0x1d1a   :  { %v2455_v41 = vsub.f32 %v2441_v33, %v2453_v59  ;;  %v2458_v61 = vsel %vm73_vm0, %v2456_v40, 0.0 }
0x1d1b   :  { %2459 = vadd.xlane.f32.xlu0 %v2458_v61 }
0x1d1c   :  { %v2457_v11 = vmul.f32 %v2455_v41, %v2455_v41 }
0x1d1e   :  { %v2461_v43 = vsel %vm73_vm0, %v2457_v11, 0.0 }
0x1d1f   :  { %2462 = vadd.xlane.f32.xlu0 %v2461_v43 }
0x1da4   :  { %v2460_v51 = vpop.xlane.xlu0 %2459 }
0x1da5   :  { %v2464_v52 = vmul.f32 0.03125, %v2460_v51 }
0x1da7   :  { %v2466_v53 = vadd.f32 1e-12, %v2464_v52 }
0x1da8   :  { %v2463_v54 = vpop.xlane.xlu0 %2462 }
0x1da9   :  { %4465 = vrsqrt.f32 %v2466_v53  ;;  %v2465_v55 = vmul.f32 0.03125, %v2463_v54 }
0x1dab   :  { %v2467_v57 = vadd.f32 1e-12, %v2465_v55 }
0x1dad   :  { %4467 = vrsqrt.f32 %v2467_v57 }
0x1db6   :  { %v4466_v60 = vpop.eup %4465 }
0x1db7   :  { %v2470_v62 = vmul.f32 %v4466_v60, %v2454_v56 }
0x1db9   :  { %v2478_v47 = vmul.f32 %v3790_v58, %v2470_v62 }
0x1dba   :  { %v4468_v63 = vpop.eup %4467 }
0x1dbb   :  { %v2471_v2 = vmul.f32 %v4468_v63, %v2455_v41  ;;  %v2486_v9 = vadd.f32 %v3791_v6, %v2478_v47 }
0x1dbd   :  { %v2479_v8 = vmul.f32 %v3790_v58, %v2471_v2 }
0x1dbf   :  { %v5269_v10 = vadd.f32 %v3791_v6, %v2479_v8 }
0x1dc1   :  { %v2488_v12 = vpack.c.bf16 %v5269_v10, %v2486_v9 }
0x1dc3   :  { %4237 = vmatmul.mubr.msk.bf16.vlgmr.msra.gmra.mxu0 %vm73_vm0, %v2488_v12 }
0x1dc4   :  { %4256 = vmatprep.mubr.msk.bf16.mxu0 %vm4510_vm1, %v4509_v14 }
0x1e83   :  { %v2541_v28 = vpop.f32.mrf.mxu0 }
0x1e84   :  { %v2542_v29 = vadd.f32 %v3797_v27, %v2541_v28 }
0x1e85   :  { %v4238_v3 = vpop.f32.mrf.mxu0 }
0x1e86   :  { %v2548_v30 = vmul.f32 %v2542_v29, %v2542_v29 }
0x1e87   :  { %v2544_v7 = vpop.f32.mrf.mxu0 }
0x1e88   :  { %v2550_v31 = vmul.f32 %v2548_v30, %v2542_v29  ;;  %v2545_v18 = vadd.f32 %v3797_v27, %v2544_v7  ;;  %v3812_v30 = vld [vmem:[%s5623_s14 + $0x2] ss:$0 sm:$0xff] }
0x1e89   :  { %v4239_v32 = vpop.f32.mrf.mxu0 }
0x1e8a   :  { %v2552_v36 = vmul.f32 0.044715, %v2550_v31  ;;  %v2549_v33 = vmul.f32 %v2545_v18, %v2545_v18  ;;  %v3813_v32 = vld [vmem:[%s5624_s15 + $0x2] ss:$0 sm:$0xff] }
0x1e8c   :  { %v2554_v37 = vadd.f32 %v2552_v36, %v2542_v29  ;;  %v2551_v38 = vmul.f32 %v2549_v33, %v2545_v18 }
0x1e8e   :  { %v2556_v34 = vmul.f32 0.7978846, %v2554_v37  ;;  %v2553_v56 = vmul.f32 0.044715, %v2551_v38 }
0x1e90   :  { %4469 = vtanh.f32 %v2556_v34  ;;  %v2555_v39 = vadd.f32 %v2553_v56, %v2545_v18  ;;  %v3819_v34 = vld [vmem:[%s5658_s28 + $0x3] ss:$0 sm:$0xff] }
0x1e92   :  { %v2557_v59 = vmul.f32 0.7978846, %v2555_v39 }
0x1e94   :  { %4471 = vtanh.f32 %v2557_v59 }
0x1e9d   :  { %v4470_v40 = vpop.eup %4469 }
0x1e9e   :  { %v2560_v41 = vadd.f32 1.0, %v4470_v40 }
0x1ea0   :  { %v2562_v11 = vmul.f32 0.5, %v2560_v41 }
0x1ea1   :  { %v4472_v61 = vpop.eup %4471 }
0x1ea2   :  { %v2561_v43 = vadd.f32 1.0, %v4472_v61  ;;  %v2564_v44 = vmul.f32 %v2562_v11, %v2542_v29 }
0x1ea4   :  { %v2563_v22 = vmul.f32 0.5, %v2561_v43 }
0x1ea6   :  { %v2565_v45 = vmul.f32 %v2563_v22, %v2545_v18 }
0x1ea8   :  { %v2566_v48 = vpack.c.bf16 %v2565_v45, %v2564_v44 }
0x1eaa   :  { %4249 = vmatmul.mubr.msk.bf16.vlgmr.msra.gmra.mxu1 %vm869_vm5, %v2566_v48 }
0x1eab   :  { %4268 = vmatprep.mubr.msk.bf16.mxu1 %vm4510_vm1, %v4509_v14 }
0x1f6a   :  { %v2625_v49 = vpop.f32.mrf.mxu1 }
0x1f6b   :  { %v2626_v51 = vadd.f32 %v3808_v5, %v2625_v49 }
0x1f6c   :  { %v4250_v52 = vpop.f32.mrf.mxu1 }
0x1f6d   :  { %v2632_v53 = vadd.f32 %v2626_v51, %v2486_v9 }
0x1f6e   :  { %v2628_v54 = vpop.f32.mrf.mxu1 }
0x1f6f   :  { %v2629_v55 = vadd.f32 %v3808_v5, %v2628_v54  ;;  %v2638_v57 = vsel %vm73_vm0, %v2632_v53, 0.0 }
0x1f70   :  { %2639 = vadd.xlane.f32.xlu1 %v2638_v57  ;;  %v4251_v60 = vpop.f32.mrf.mxu1 }
0x1f71   :  { %v2633_v62 = vadd.f32 %v2629_v55, %v5269_v10  ;;  %v3816_v10 = vld [vmem:[%s5655_s26 + $0x70] sm:$0xff] }
0x1f72   :  { %v2687_v17 = vpack.c.bf16 %v3817_v16, %v3816_v10 }
0x1f73   :  { %v2641_v58 = vsel %vm73_vm0, %v2633_v62, 0.0 }
0x1f74   :  { %2642 = vadd.xlane.f32.xlu0 %v2641_v58  ;;  %4253 = vmatpush3.bf16.msra.mxu0 %v2687_v17 }
0x1f75   :  { %4254 = vmatprep.subr.bf16.mxu0 %v4509_v14 }
0x1f78   :  { %4255 = vmatpush3.bf16.msra.mxu0 %v2686_v21 }
0x1f79   :  { %4260 = vmatprep.subr.bf16.mxu0 %v4509_v14 }
0x1ff9   :  { %v2640_v63 = vpop.xlane.xlu1 %2639 }
0x1ffa   :  { %v2644_v2 = vmul.f32 0.03125, %v2640_v63 }
0x1ffc   :  { %v2646_v47 = vsub.f32 %v2632_v53, %v2644_v2 }
0x1ffd   :  { %v2643_v6 = vpop.xlane.xlu0 %2642 }
0x1ffe   :  { %v2645_v8 = vmul.f32 0.03125, %v2643_v6  ;;  %v2648_v12 = vmul.f32 %v2646_v47, %v2646_v47 }
0x2000   :  { %v2647_v35 = vsub.f32 %v2633_v62, %v2645_v8  ;;  %v2650_v9 = vsel %vm73_vm0, %v2648_v12, 0.0 }
0x2001   :  { %2651 = vadd.xlane.f32.xlu1 %v2650_v9 }
0x2002   :  { %v2649_v13 = vmul.f32 %v2647_v35, %v2647_v35 }
0x2004   :  { %v2653_v15 = vsel %vm73_vm0, %v2649_v13, 0.0 }
0x2005   :  { %2654 = vadd.xlane.f32.xlu0 %v2653_v15 }
0x208a   :  { %v2652_v23 = vpop.xlane.xlu1 %2651 }
0x208b   :  { %v2656_v24 = vmul.f32 0.03125, %v2652_v23 }
0x208d   :  { %v2658_v25 = vadd.f32 1e-12, %v2656_v24 }
0x208e   :  { %v2655_v26 = vpop.xlane.xlu0 %2654 }
0x208f   :  { %4473 = vrsqrt.f32 %v2658_v25  ;;  %v2657_v27 = vmul.f32 0.03125, %v2655_v26 }
0x2091   :  { %v2659_v28 = vadd.f32 1e-12, %v2657_v27 }
0x2093   :  { %4475 = vrsqrt.f32 %v2659_v28 }
0x209c   :  { %v4474_v29 = vpop.eup %4473 }
0x209d   :  { %v2662_v3 = vmul.f32 %v4474_v29, %v2646_v47 }
0x209f   :  { %v2670_v18 = vmul.f32 %v3812_v30, %v2662_v3 }
0x20a0   :  { %v4476_v7 = vpop.eup %4475 }
0x20a1   :  { %v2663_v31 = vmul.f32 %v4476_v7, %v2647_v35  ;;  %v5337_v33 = vadd.f32 %v3813_v32, %v2670_v18 }
0x20a3   :  { %v2671_v36 = vmul.f32 %v3812_v30, %v2663_v31 }
0x20a5   :  { %v5339_v37 = vadd.f32 %v3813_v32, %v2671_v36 }
0x20a7   :  { %v2680_v38 = vpack.c.bf16 %v5339_v37, %v5337_v33 }
0x20a9   :  { %4257 = vmatmul.mubr.msk.bf16.vlgmr.msra.gmra.mxu0 %vm73_vm0, %v2680_v38 }
0x20aa   :  { %4262 = vmatprep.mubr.msk.bf16.mxu0 %vm4510_vm1, %v4509_v14 }
0x2169   :  { %v2733_v56 = vpop.f32.mrf.mxu0 }
0x216a   :  { %v2734_v39 = vadd.f32 %v3819_v34, %v2733_v56 }
0x216b   :  { %v4258_v59 = vpop.f32.mrf.mxu0 }
0x216c   :  { %v5349_v40 = vpack.c.bf16 %v2734_v39, %v2734_v39 }
0x216d   :  { %v2736_v41 = vpop.f32.mrf.mxu0 }
0x216e   :  { %v2737_v61 = vadd.f32 %v3819_v34, %v2736_v41  ;;  %2743 = vrot.lane.b32.xlu1 %v5349_v40, %s5663_s17 }
0x216f   :  { %v4259_v11 = vpop.f32.mrf.mxu0 }
0x2170   :  { %v5353_v43 = vpack.c.bf16 %v2737_v61, %v2737_v61 }
0x2172   :  { %2792 = vrot.lane.b32.xlu0 %v5353_v43, %s5663_s17 }
0x21e0   :  { %v2744_v22 = vpop.permute.xlu1 %2743 }
0x21e1   :  { %v2749_v44 = vsel %vm180_vm2, %v2744_v22, 0 }
0x21e2   :  { %4261 = vmatpush3.bf16.xpose.msra.mxu0 %v2749_v44 }
0x21e3   :  { %4272 = vmatprep.subr.bf16.mxu0 %v4509_v14 }
0x21e4   :  { %v2793_v45 = vpop.permute.xlu0 %2792 }
0x21e5   :  { %v2798_v48 = vsel %vm180_vm2, %v2793_v45, 0 }
0x21e6   :  { %4267 = vmatpush3.bf16.xpose.msra.mxu1 %v2798_v48 }
0x21e7   :  { %4278 = vmatprep.subr.bf16.mxu1 %v4509_v14 }
0x21e9   :  { %4263 = vmatmul.mubr.msk.bf16.vlgmr.msra.gmra.mxu0 %vm180_vm2, %v5349_v40 }
0x21ea   :  { %4274 = vmatprep.mubr.msk.bf16.mxu0 %vm4510_vm1, %v4509_v14 }
0x21ed   :  { %4269 = vmatmul.mubr.msk.bf16.vlgmr.msra.gmra.mxu1 %vm180_vm2, %v5353_v43 }
0x21ee   :  { %4280 = vmatprep.mubr.msk.bf16.mxu1 %vm4510_vm1, %v4509_v14 }
0x22a9   :  { %v2785_v5 = vpop.f32.mrf.mxu0 }
0x22aa   :  { %v2840_v49 = vmul.f32 0.25, %v2785_v5 }
0x22ab   :  { %v4264_v51 = vpop.f32.mrf.mxu0 }
0x22ac   :  { %v2842_v52 = vadd.f32 %v2840_v49, %v5150_v50 }
0x22ad   :  { %v2788_v53 = vpop.f32.mrf.mxu0  ;;  %v2834_v54 = vpop.f32.mrf.mxu1 }
0x22ae   :  { %v2841_v55 = vmul.f32 0.25, %v2834_v54  ;;  %v2844_v57 = vsel %vm313_vm3, %v2842_v52, -inf }
0x22af   :  { %v4270_v60 = vpop.f32.mrf.mxu1  ;;  %2845 = vmax.xlane.f32.xlu1 %v2844_v57  ;;  %v4265_v62 = vpop.f32.mrf.mxu0 }
0x22b0   :  { %v2843_v58 = vadd.f32 %v2841_v55, %v5155_v42 }
0x22b1   :  { %v2837_v63 = vpop.f32.mrf.mxu1 }
0x22b2   :  { %v2847_v2 = vsel %vm313_vm3, %v2843_v58, -inf }
0x22b3   :  { %2848 = vmax.xlane.f32.xlu0 %v2847_v2  ;;  %v4271_v47 = vpop.f32.mrf.mxu1 }
0x22c0   :  { %2868 = vrot.lane.b32.xlu1 %v5349_v40, %s5664_s1 }
0x2338   :  { %v2846_v6 = vpop.xlane.xlu1 %2845 }
0x2339   :  { %v2850_v8 = vsub.f32 %v2842_v52, %v2846_v6 }
0x233b   :  { %v2852_v12 = vmul.f32 1.442695, %v2850_v8 }
0x233c   :  { %v2849_v35 = vpop.xlane.xlu0 %2848  ;;  %v2869_v9 = vpop.permute.xlu1 %2868 }
0x233d   :  { %4477 = vpow2.f32 %v2852_v12  ;;  %v2851_v13 = vsub.f32 %v2843_v58, %v2849_v35  ;;  %v2874_v15 = vsel %vm343_vm4, %v2869_v9, 0 }
0x233e   :  { %4273 = vmatpush3.bf16.msra.mxu0 %v2874_v15 }
0x233f   :  { %v2854_v10 = vmul.f32 1.442695, %v2851_v13  ;;  %4284 = vmatprep.subr.bf16.mxu0 %v4509_v14 }
0x2341   :  { %4479 = vpow2.f32 %v2854_v10 }
0x234a   :  { %v4478_v16 = vpop.eup %4477 }
0x234b   :  { %v2856_v17 = vsel %vm313_vm3, %v4478_v16, 0.0 }
0x234c   :  { %2857 = vadd.xlane.f32.xlu1 %v2856_v17 }
0x234e   :  { %v4480_v19 = vpop.eup %4479 }
0x234f   :  { %v2859_v1 = vsel %vm313_vm3, %v4480_v19, 0.0 }
0x2350   :  { %2860 = vadd.xlane.f32.xlu0 %v2859_v1 }
0x235d   :  { %2966 = vrot.lane.b32.xlu1 %v5349_v40, %s5659_s21 }
0x2361   :  { %3016 = vrot.lane.b32.xlu1 %v5353_v43, %s5659_s21 }
0x2365   :  { %2964 = vrot.lane.b32.xlu1 %v5349_v40, %s5660_s4 }
0x2366   :  { %2916 = vrot.lane.b32.xlu0 %v5353_v43, %s5664_s1 }
0x236a   :  { %3014 = vrot.lane.b32.xlu0 %v5353_v43, %s5660_s4 }
0x23d5   :  { %v2858_v21 = vpop.xlane.xlu1 %2857 }
0x23d6   :  { %4481 = vrcp.f32 %v2858_v21 }
0x23d9   :  { %v2861_v23 = vpop.xlane.xlu0 %2860  ;;  %v2967_v27 = vpop.permute.xlu1 %2966 }
0x23da   :  { %4483 = vrcp.f32 %v2861_v23  ;;  %v2972_v30 = vsel %vm180_vm2, %v2967_v27, 0 }
0x23dd   :  { %v2917_v24 = vpop.permute.xlu0 %2916  ;;  %v3017_v31 = vpop.permute.xlu1 %3016 }
0x23de   :  { %v2922_v25 = vsel %vm343_vm4, %v2917_v24, 0  ;;  %v3022_v32 = vsel %vm180_vm2, %v3017_v31, 0 }
0x23df   :  { %4279 = vmatpush3.bf16.msra.mxu1 %v2922_v25  ;;  %v3831_v25 = vld [vmem:[%s5615_s6 + $0x70] sm:$0xff] }
0x23e0   :  { %4290 = vmatprep.subr.bf16.mxu1 %v4509_v14 }
0x23e1   :  { %v2965_v36 = vpop.permute.xlu1 %2964  ;;  %v3015_v38 = vpop.permute.xlu0 %3014 }
0x23e3   :  { %v4482_v26 = vpop.eup %4481 }
0x23e4   :  { %v2864_v28 = vmul.f32 %v4482_v26, %v4478_v16  ;;  %v3832_v26 = vld [vmem:[%s5615_s6 + $0x78] sm:$0xff] }
0x23e5   :  { %v3205_v27 = vpack.c.bf16 %v3832_v26, %v3831_v25  ;;  %v3839_v26 = vld [vmem:[%s5619_s9 + $0x3] ss:$0 sm:$0xff]  ;;  %s5666_s9 = sld [smem:[#allocation9_spill]] }
0x23e6   :  { %v2866_v29 = vpack.c.bf16 %v2864_v28, %v2864_v28  ;;  %v3829_v28 = vld [vmem:[%s5615_s6 + $0x60] sm:$0xff] }
0x23e7   :  { %v4484_v3 = vpop.eup %4483 }
0x23e8   :  { %4275 = vmatmul.mubr.msk.bf16.vlgmr.msra.gmra.mxu0 %vm313_vm3, %v2866_v29  ;;  %v2865_v7 = vmul.f32 %v4484_v3, %v4480_v19  ;;  %v3830_v29 = vld [vmem:[%s5615_s6 + $0x68] sm:$0xff] }
0x23e9   :  { %4285 = vmatpush3.bf16.xpose.msra.mxu0 %v2972_v30  ;;  %4286 = vmatprep.mubr.msk.bf16.mxu0 %vm4510_vm1, %v4509_v14  ;;  %v3204_v3 = vpack.c.bf16 %v3830_v29, %v3829_v28 }
0x23ea   :  { %v2867_v18 = vpack.c.bf16 %v2865_v7, %v2865_v7  ;;  %4296 = vmatprep.subr.bf16.mxu0 %v4509_v14 }
0x23ec   :  { %4281 = vmatmul.mubr.msk.bf16.vlgmr.msra.gmra.mxu1 %vm313_vm3, %v2867_v18 }
0x23ed   :  { %4291 = vmatpush3.bf16.xpose.msra.mxu1 %v3022_v32  ;;  %4292 = vmatprep.mubr.msk.bf16.mxu1 %vm4510_vm1, %v4509_v14 }
0x23ee   :  { %4302 = vmatprep.subr.bf16.mxu1 %v4509_v14 }
0x23f0   :  { %4287 = vmatmul.mubr.msk.bf16.vlgmr.msra.gmra.mxu0 %vm180_vm2, %v2965_v36 }
0x23f1   :  { %4298 = vmatprep.mubr.msk.bf16.mxu0 %vm4510_vm1, %v4509_v14 }
0x23f4   :  { %4293 = vmatmul.mubr.msk.bf16.vlgmr.msra.gmra.mxu1 %vm180_vm2, %v3015_v38 }
0x23f5   :  { %4304 = vmatprep.mubr.msk.bf16.mxu1 %vm4510_vm1, %v4509_v14 }
0x24a8   :  { %v5407_v34 = vpop.f32.mrf.mxu0 }
0x24aa   :  { %v4276_v56 = vpop.f32.mrf.mxu0 }
0x24ac   :  { %v2913_v39 = vpop.f32.mrf.mxu0  ;;  %v5409_v59 = vpop.f32.mrf.mxu1 }
0x24ae   :  { %v4277_v41 = vpop.f32.mrf.mxu0  ;;  %v4282_v61 = vpop.f32.mrf.mxu1 }
0x24b0   :  { %v2961_v11 = vpop.f32.mrf.mxu1  ;;  %v3008_v22 = vpop.f32.mrf.mxu0 }
0x24b1   :  { %v3064_v44 = vmul.f32 0.25, %v3008_v22 }
0x24b2   :  { %v4283_v45 = vpop.f32.mrf.mxu1  ;;  %v4288_v48 = vpop.f32.mrf.mxu0 }
0x24b3   :  { %v3066_v5 = vadd.f32 %v3064_v44, %v5150_v50  ;;  %v3834_v48 = vld [vmem:[%s5616_s7 + $0x3] ss:$0 sm:$0xff] }
0x24b4   :  { %v3011_v49 = vpop.f32.mrf.mxu0  ;;  %v3058_v51 = vpop.f32.mrf.mxu1 }
0x24b5   :  { %v3065_v52 = vmul.f32 0.25, %v3058_v51  ;;  %v3068_v53 = vsel %vm313_vm3, %v3066_v5, -inf }
0x24b6   :  { %v4294_v54 = vpop.f32.mrf.mxu1  ;;  %3069 = vmax.xlane.f32.xlu1 %v3068_v53  ;;  %v4289_v55 = vpop.f32.mrf.mxu0 }
0x24b7   :  { %v3067_v57 = vadd.f32 %v3065_v52, %v5155_v42 }
0x24b8   :  { %v3061_v60 = vpop.f32.mrf.mxu1 }
0x24b9   :  { %v3071_v62 = vsel %vm313_vm3, %v3067_v57, -inf }
0x24ba   :  { %3072 = vmax.xlane.f32.xlu0 %v3071_v62  ;;  %v4295_v58 = vpop.f32.mrf.mxu1 }
0x24c7   :  { %3092 = vrot.lane.b32.xlu1 %v5349_v40, %s5661_s24 }
0x253f   :  { %v3070_v63 = vpop.xlane.xlu1 %3069 }
0x2540   :  { %v3074_v50 = vsub.f32 %v3066_v5, %v3070_v63 }
0x2542   :  { %v3076_v2 = vmul.f32 1.442695, %v3074_v50 }
0x2543   :  { %v3073_v47 = vpop.xlane.xlu0 %3072  ;;  %v3093_v6 = vpop.permute.xlu1 %3092 }
0x2544   :  { %4485 = vpow2.f32 %v3076_v2  ;;  %v3075_v8 = vsub.f32 %v3067_v57, %v3073_v47  ;;  %v3098_v12 = vsel %vm343_vm4, %v3093_v6, 0 }
0x2545   :  { %4297 = vmatpush3.bf16.msra.mxu0 %v3098_v12  ;;  %v3843_v12 = vld [vmem:[%s5617_s10 + $0x78] sm:$0xff] }
0x2546   :  { %v3078_v35 = vmul.f32 1.442695, %v3075_v8  ;;  %4308 = vmatprep.subr.bf16.mxu0 %v4509_v14 }
0x2548   :  { %4487 = vpow2.f32 %v3078_v35 }
0x2551   :  { %v4486_v42 = vpop.eup %4485 }
0x2552   :  { %v3080_v9 = vsel %vm313_vm3, %v4486_v42, 0.0 }
0x2553   :  { %3081 = vadd.xlane.f32.xlu0 %v3080_v9  ;;  %v3841_v9 = vld [vmem:[%s5617_s10 + $0x68] sm:$0xff] }
0x2555   :  { %v4488_v13 = vpop.eup %4487 }
0x2556   :  { %v3083_v40 = vsel %vm313_vm3, %v4488_v13, 0.0 }
0x2557   :  { %3084 = vadd.xlane.f32.xlu0 %v3083_v40 }
0x256d   :  { %3140 = vrot.lane.b32.xlu0 %v5353_v43, %s5661_s24  ;;  %s5665_s24 = sld [smem:[#allocation8_spill]] }
0x25dc   :  { %v3082_v15 = vpop.xlane.xlu0 %3081 }
0x25dd   :  { %4489 = vrcp.f32 %v3082_v15 }
0x25e0   :  { %v3085_v10 = vpop.xlane.xlu0 %3084 }
0x25e1   :  { %4491 = vrcp.f32 %v3085_v10 }
0x25e4   :  { %v3141_v16 = vpop.permute.xlu0 %3140 }
0x25e5   :  { %v3146_v17 = vsel %vm343_vm4, %v3141_v16, 0 }
0x25e6   :  { %4303 = vmatpush3.bf16.msra.mxu1 %v3146_v17 }
0x25e7   :  { %4316 = vmatprep.subr.bf16.mxu1 %v4509_v14 }
0x25ea   :  { %v4490_v19 = vpop.eup %4489 }
0x25eb   :  { %v3088_v1 = vmul.f32 %v4490_v19, %v4486_v42  ;;  %v3840_v42 = vld [vmem:[%s5617_s10 + $0x60] sm:$0xff] }
0x25ed   :  { %v3090_v21 = vpack.c.bf16 %v3088_v1, %v3088_v1 }
0x25ee   :  { %v4492_v23 = vpop.eup %4491 }
0x25ef   :  { %4299 = vmatmul.mubr.msk.bf16.vlgmr.msra.gmra.mxu0 %vm313_vm3, %v3090_v21  ;;  %v3089_v24 = vmul.f32 %v4492_v23, %v4488_v13  ;;  %v3312_v13 = vpack.c.bf16 %v3841_v9, %v3840_v42  ;;  %v3838_v23 = vld [vmem:[%s5618_s8 + $0x3] ss:$0 sm:$0xff] }
0x25f0   :  { %4312 = vmatprep.mubr.msk.bf16.mxu0 %vm4510_vm1, %v4509_v14  ;;  %4309 = vmatpush3.bf16.msra.mxu0 %v3205_v27  ;;  %v3856_v42 = vld [vmem:[%s5622_s13 + $0x3] ss:$0 sm:$0xff] }
0x25f1   :  { %v3091_v43 = vpack.c.bf16 %v3089_v24, %v3089_v24  ;;  %4310 = vmatprep.subr.bf16.mxu0 %v4509_v14 }
0x25f3   :  { %4305 = vmatmul.mubr.msk.bf16.vlgmr.msra.gmra.mxu1 %vm313_vm3, %v3091_v43 }
0x25f4   :  { %4320 = vmatprep.mubr.msk.bf16.mxu1 %vm4510_vm1, %v4509_v14  ;;  %4311 = vmatpush3.bf16.msra.mxu0 %v3204_v3 }
0x25f5   :  { %4324 = vmatprep.subr.bf16.mxu0 %v4509_v14 }
0x26af   :  { %v3134_v30 = vpop.f32.mrf.mxu0 }
0x26b1   :  { %v4300_v7 = vpop.f32.mrf.mxu0 }
0x26b2   :  { %v3854_v7 = vld [vmem:[%s5620_s12 + $0xf8] sm:$0xff] }
0x26b3   :  { %v3137_v31 = vpop.f32.mrf.mxu0  ;;  %v3182_v18 = vpop.f32.mrf.mxu1 }
0x26b4   :  { %v4384_v32 = vpack.i.bf16 %v3182_v18, %v3134_v30  ;;  %v3853_v30 = vld [vmem:[%s5620_s12 + $0xf0] sm:$0xff]  ;;  %v3851_v18 = vld [vmem:[%s5620_s12 + $0xe0] sm:$0xff] }
0x26b5   :  { %v4301_v36 = vpop.f32.mrf.mxu0  ;;  %v4306_v38 = vpop.f32.mrf.mxu1  ;;  %v3397_v31 = vpack.c.bf16 %v3854_v7, %v3853_v30 }
0x26b6   :  { %4385 = vrot.lane.b32.xlu1 %v4384_v32, %s5662_s2  ;;  %v3852_v32 = vld [vmem:[%s5620_s12 + $0xe8] sm:$0xff]  ;;  %v3849_v38 = vld [vmem:[%s5620_s12 + $0xd0] sm:$0xff] }
0x26b7   :  { %v3185_v56 = vpop.f32.mrf.mxu1  ;;  %v3396_v36 = vpack.c.bf16 %v3852_v32, %v3851_v18 }
0x26b8   :  { %v3850_v56 = vld [vmem:[%s5620_s12 + $0xd8] sm:$0xff] }
0x26b9   :  { %v4307_v39 = vpop.f32.mrf.mxu1 }
0x26ba   :  { %v3395_v39 = vpack.c.bf16 %v3850_v56, %v3849_v38 }
0x2728   :  { %v4386_v41 = vpop.permute.xlu1 %4385 }
0x2729   :  { %v4388_v61 = vunpack.i.h.bf16 %v4386_v41  ;;  %v4387_v11 = vunpack.i.l.bf16 %v4386_v41  ;;  %v3847_v41 = vld [vmem:[%s5620_s12 + $0xc0] sm:$0xff] }
0x272b   :  { %v3197_v22 = vsel %vm180_vm2, %v5409_v59, %v4388_v61  ;;  %v3196_v44 = vsel %vm180_vm2, %v5407_v34, %v4387_v11  ;;  %v3848_v61 = vld [vmem:[%s5620_s12 + $0xc8] sm:$0xff] }
0x272c   :  { %v3198_v45 = vpack.c.bf16 %v3197_v22, %v3196_v44  ;;  %v3394_v11 = vpack.c.bf16 %v3848_v61, %v3847_v41  ;;  %v3845_v22 = vld [vmem:[%s5621_s11 + $0x3] ss:$0 sm:$0xff] }
0x272e   :  { %4313 = vmatmul.mubr.msk.bf16.vlgmr.msra.gmra.mxu0 %vm73_vm0, %v3198_v45 }
0x272f   :  { %4332 = vmatprep.mubr.msk.bf16.mxu0 %vm4510_vm1, %v4509_v14  ;;  %4325 = vmatpush3.bf16.msra.mxu0 %v3397_v31 }
0x2730   :  { %4326 = vmatprep.subr.bf16.mxu0 %v4509_v14 }
0x2733   :  { %4327 = vmatpush3.bf16.msra.mxu0 %v3396_v36 }
0x2734   :  { %4328 = vmatprep.subr.bf16.mxu0 %v4509_v14 }
0x2737   :  { %4329 = vmatpush3.bf16.msra.mxu0 %v3395_v39 }
0x2738   :  { %4330 = vmatprep.subr.bf16.mxu0 %v4509_v14 }
0x273b   :  { %4331 = vmatpush3.bf16.msra.mxu0 %v3394_v11 }
0x273c   :  { %4352 = vmatprep.subr.bf16.mxu0 %v4509_v14 }
0x27ee   :  { %v3251_v5 = vpop.f32.mrf.mxu0 }
0x27ef   :  { %v3252_v49 = vadd.f32 %v3834_v48, %v3251_v5 }
0x27f0   :  { %v4314_v51 = vpop.f32.mrf.mxu0 }
0x27f1   :  { %v3258_v52 = vadd.f32 %v3252_v49, %v5337_v33 }
0x27f2   :  { %v3254_v53 = vpop.f32.mrf.mxu0 }
0x27f3   :  { %v3255_v59 = vadd.f32 %v3834_v48, %v3254_v53  ;;  %v3264_v54 = vsel %vm73_vm0, %v3258_v52, 0.0 }
0x27f4   :  { %3265 = vadd.xlane.f32.xlu1 %v3264_v54  ;;  %v4315_v34 = vpop.f32.mrf.mxu0 }
0x27f5   :  { %v3259_v55 = vadd.f32 %v3255_v59, %v5339_v37  ;;  %v3842_v37 = vld [vmem:[%s5617_s10 + $0x70] sm:$0xff] }
0x27f6   :  { %v3313_v35 = vpack.c.bf16 %v3843_v12, %v3842_v37 }
0x27f7   :  { %v3267_v57 = vsel %vm73_vm0, %v3259_v55, 0.0 }
0x27f8   :  { %3268 = vadd.xlane.f32.xlu0 %v3267_v57  ;;  %4317 = vmatpush3.bf16.msra.mxu1 %v3313_v35  ;;  %v3752_v35 = vld [vmem:[%s5622_s13 + $0x1] ss:$0 sm:$0xff] }
0x27f9   :  { %4318 = vmatprep.subr.bf16.mxu1 %v4509_v14 }
0x27fc   :  { %4319 = vmatpush3.bf16.msra.mxu1 %v3312_v13  ;;  %v1724_v13 = vadd.f32 %v3752_v35, %v5141_v20 }
0x27fd   :  { %4336 = vmatprep.subr.bf16.mxu1 %v4509_v14 }
0x287d   :  { %v3266_v60 = vpop.xlane.xlu1 %3265 }
0x287e   :  { %v3270_v62 = vmul.f32 0.03125, %v3266_v60 }
0x2880   :  { %v3272_v58 = vsub.f32 %v3258_v52, %v3270_v62 }
0x2881   :  { %v3269_v63 = vpop.xlane.xlu0 %3268 }
0x2882   :  { %v3271_v50 = vmul.f32 0.03125, %v3269_v63  ;;  %v3274_v2 = vmul.f32 %v3272_v58, %v3272_v58 }
0x2884   :  { %v3273_v47 = vsub.f32 %v3259_v55, %v3271_v50  ;;  %v3276_v33 = vsel %vm73_vm0, %v3274_v2, 0.0 }
0x2885   :  { %3277 = vadd.xlane.f32.xlu0 %v3276_v33 }
0x2886   :  { %v3275_v6 = vmul.f32 %v3273_v47, %v3273_v47 }
0x2888   :  { %v3279_v8 = vsel %vm73_vm0, %v3275_v6, 0.0 }
0x2889   :  { %3280 = vadd.xlane.f32.xlu1 %v3279_v8 }
0x290e   :  { %v3278_v40 = vpop.xlane.xlu0 %3277 }
0x290f   :  { %v3282_v15 = vmul.f32 0.03125, %v3278_v40 }
0x2911   :  { %v3284_v10 = vadd.f32 1e-12, %v3282_v15 }
0x2912   :  { %v3281_v16 = vpop.xlane.xlu1 %3280 }
0x2913   :  { %4493 = vrsqrt.f32 %v3284_v10  ;;  %v3283_v17 = vmul.f32 0.03125, %v3281_v16 }
0x2915   :  { %v3285_v19 = vadd.f32 1e-12, %v3283_v17  ;;  %v1730_v17 = vadd.f32 %v1724_v13, %v5055_v0 }
0x2917   :  { %4495 = vrsqrt.f32 %v3285_v19  ;;  %v1727_v19 = vadd.f32 %v3752_v35, %v5143_v46 }
0x2920   :  { %v4494_v1 = vpop.eup %4493 }
0x2921   :  { %v3288_v21 = vmul.f32 %v4494_v1, %v3272_v58 }
0x2923   :  { %v3296_v25 = vmul.f32 %v3838_v23, %v3288_v21 }
0x2924   :  { %v4496_v24 = vpop.eup %4495 }
0x2925   :  { %v3289_v43 = vmul.f32 %v4496_v24, %v3273_v47  ;;  %v3304_v28 = vadd.f32 %v3839_v26, %v3296_v25  ;;  %v1736_v25 = vsel %vm73_vm0, %v1730_v17, 0.0 }
0x2927   :  { %v3297_v27 = vmul.f32 %v3838_v23, %v3289_v43  ;;  %v1731_v43 = vadd.f32 %v1727_v19, %v5057_v4 }
0x2929   :  { %v5482_v29 = vadd.f32 %v3839_v26, %v3297_v27  ;;  %v1739_v26 = vsel %vm73_vm0, %v1731_v43, 0.0 }
0x292b   :  { %v3306_v3 = vpack.c.bf16 %v5482_v29, %v3304_v28 }
0x292d   :  { %4321 = vmatmul.mubr.msk.bf16.vlgmr.msra.gmra.mxu1 %vm73_vm0, %v3306_v3 }
0x292e   :  { %4340 = vmatprep.mubr.msk.bf16.mxu1 %vm4510_vm1, %v4509_v14 }
0x29ed   :  { %v3359_v44 = vpop.f32.mrf.mxu1 }
0x29ee   :  { %v3360_v45 = vadd.f32 %v3845_v22, %v3359_v44  ;;  %v3864_v44 = vld [vmem:[%s5625_s16 + $0x30] sm:$0xff] }
0x29ef   :  { %v4322_v48 = vpop.f32.mrf.mxu1 }
0x29f0   :  { %v3366_v5 = vmul.f32 %v3360_v45, %v3360_v45  ;;  %v3862_v48 = vld [vmem:[%s5625_s16 + $0x20] sm:$0xff] }
0x29f1   :  { %v3362_v49 = vpop.f32.mrf.mxu1 }
0x29f2   :  { %v3368_v51 = vmul.f32 %v3366_v5, %v3360_v45  ;;  %v3363_v52 = vadd.f32 %v3845_v22, %v3362_v49  ;;  %v3863_v49 = vld [vmem:[%s5625_s16 + $0x28] sm:$0xff] }
0x29f3   :  { %v4323_v53 = vpop.f32.mrf.mxu1 }
0x29f4   :  { %v3370_v59 = vmul.f32 0.044715, %v3368_v51  ;;  %v3367_v54 = vmul.f32 %v3363_v52, %v3363_v52  ;;  %v3513_v51 = vpack.c.bf16 %v3863_v49, %v3862_v48 }
0x29f6   :  { %v3372_v34 = vadd.f32 %v3370_v59, %v3360_v45  ;;  %v3369_v55 = vmul.f32 %v3367_v54, %v3363_v52 }
0x29f8   :  { %v3374_v57 = vmul.f32 0.7978846, %v3372_v34  ;;  %v3371_v60 = vmul.f32 0.044715, %v3369_v55 }
0x29fa   :  { %4497 = vtanh.f32 %v3374_v57  ;;  %v3373_v62 = vadd.f32 %v3371_v60, %v3363_v52 }
0x29fc   :  { %v3375_v58 = vmul.f32 0.7978846, %v3373_v62 }
0x29fe   :  { %4499 = vtanh.f32 %v3375_v58 }
0x2a07   :  { %v4498_v63 = vpop.eup %4497 }
0x2a08   :  { %v3378_v50 = vadd.f32 1.0, %v4498_v63 }
0x2a0a   :  { %v3380_v47 = vmul.f32 0.5, %v3378_v50 }
0x2a0b   :  { %v4500_v2 = vpop.eup %4499 }
0x2a0c   :  { %v3379_v33 = vadd.f32 1.0, %v4500_v2  ;;  %v3382_v8 = vmul.f32 %v3380_v47, %v3360_v45  ;;  %v3865_v45 = vld [vmem:[%s5625_s16 + $0x38] sm:$0xff]  ;;  %v3860_v47 = vld [vmem:[%s5623_s14 + $0x3] ss:$0 sm:$0xff] }
0x2a0d   :  { %v3514_v5 = vpack.c.bf16 %v3865_v45, %v3864_v44  ;;  %v25_v45 = vstv %s5627_s19 }
0x2a0e   :  { %v3381_v6 = vmul.f32 0.5, %v3379_v33  ;;  %26 = vst [vmem:[#allocation2] sm:$0x1] %v25_v45 }
0x2a0f   :  { %4337 = vmatpush3.bf16.msra.mxu1 %v3514_v5 }
0x2a10   :  { %v3383_v37 = vmul.f32 %v3381_v6, %v3363_v52  ;;  %4338 = vmatprep.subr.bf16.mxu1 %v4509_v14 }
0x2a12   :  { %v3384_v12 = vpack.c.bf16 %v3383_v37, %v3382_v8 }
0x2a13   :  { %4339 = vmatpush3.bf16.msra.mxu1 %v3513_v51 }
0x2a14   :  { %4333 = vmatmul.mubr.msk.bf16.vlgmr.msra.gmra.mxu0 %vm869_vm5, %v3384_v12  ;;  %4344 = vmatprep.subr.bf16.mxu1 %v4509_v14  ;;  %v3861_v12 = vld [vmem:[%s5624_s15 + $0x3] ss:$0 sm:$0xff] }
0x2a15   :  { %4356 = vmatprep.mubr.msk.bf16.mxu0 %vm4510_vm1, %v4509_v14 }
0x2ad4   :  { %v3443_v9 = vpop.f32.mrf.mxu0 }
0x2ad5   :  { %v3444_v40 = vadd.f32 %v3856_v42, %v3443_v9  ;;  %v3756_v9 = vld [vmem:[%s5623_s14 + $0x1] ss:$0 sm:$0xff] }
0x2ad6   :  { %v4334_v15 = vpop.f32.mrf.mxu0 }
0x2ad7   :  { %v3450_v10 = vadd.f32 %v3444_v40, %v3304_v28 }
0x2ad8   :  { %v3446_v16 = vpop.f32.mrf.mxu0 }
0x2ad9   :  { %v3447_v1 = vadd.f32 %v3856_v42, %v3446_v16  ;;  %v3456_v21 = vsel %vm73_vm0, %v3450_v10, 0.0 }
0x2ada   :  { %3457 = vadd.xlane.f32.xlu1 %v3456_v21  ;;  %v4335_v23 = vpop.f32.mrf.mxu0 }
0x2adb   :  { %v3451_v24 = vadd.f32 %v3447_v1, %v5482_v29  ;;  %v3757_v1 = vld [vmem:[%s5624_s15 + $0x1] ss:$0 sm:$0xff] }
0x2add   :  { %v3459_v20 = vsel %vm73_vm0, %v3451_v24, 0.0 }
0x2ade   :  { %1737 = vadd.xlane.f32.xlu1 %v1736_v25  ;;  %3460 = vadd.xlane.f32.xlu0 %v3459_v20  ;;  %v3502_v20 = vld [vmem:[%s5625_s16 + $0x10] sm:$0xff] }
0x2ae2   :  { %1740 = vadd.xlane.f32.xlu0 %v1739_v26  ;;  %v3503_v26 = vld [vmem:[%s5625_s16 + $0x18] sm:$0xff] }
0x2b63   :  { %v3458_v0 = vpop.xlane.xlu1 %3457 }
0x2b64   :  { %v3462_v46 = vmul.f32 0.03125, %v3458_v0 }
0x2b66   :  { %v3464_v27 = vsub.f32 %v3450_v10, %v3462_v46 }
0x2b67   :  { %v1738_v28 = vpop.xlane.xlu1 %1737  ;;  %v3461_v3 = vpop.xlane.xlu0 %3460 }
0x2b68   :  { %v1742_v30 = vmul.f32 0.03125, %v1738_v28  ;;  %v3463_v7 = vmul.f32 0.03125, %v3461_v3  ;;  %v3466_v31 = vmul.f32 %v3464_v27, %v3464_v27 }
0x2b6a   :  { %v1744_v29 = vsub.f32 %v1730_v17, %v1742_v30  ;;  %v3465_v18 = vsub.f32 %v3451_v24, %v3463_v7  ;;  %v3468_v4 = vsel %vm73_vm0, %v3466_v31, 0.0  ;;  %v3505_v30 = vpack.c.bf16 %v3503_v26, %v3502_v20 }
0x2b6b   :  { %3469 = vadd.xlane.f32.xlu1 %v3468_v4  ;;  %v1741_v32 = vpop.xlane.xlu0 %1740 }
0x2b6c   :  { %v1743_v36 = vmul.f32 0.03125, %v1741_v32  ;;  %v1746_v38 = vmul.f32 %v1744_v29, %v1744_v29  ;;  %v3467_v56 = vmul.f32 %v3465_v18, %v3465_v18 }
0x2b6e   :  { %v1745_v39 = vsub.f32 %v1731_v43, %v1743_v36  ;;  %v1748_v41 = vsel %vm73_vm0, %v1746_v38, 0.0  ;;  %v3471_v61 = vsel %vm73_vm0, %v3467_v56, 0.0 }
0x2b6f   :  { %1749 = vadd.xlane.f32.xlu1 %v1748_v41  ;;  %3472 = vadd.xlane.f32.xlu0 %v3471_v61  ;;  %v3628_v41 = vld [vmem:[%s5626_s18 + $0x18] sm:$0xff] }
0x2b70   :  { %v1747_v11 = vmul.f32 %v1745_v39, %v1745_v39 }
0x2b72   :  { %v1751_v22 = vsel %vm73_vm0, %v1747_v11, 0.0  ;;  %v3625_v11 = vld [vmem:[%s5626_s18] sm:$0xff] }
0x2b73   :  { %1752 = vadd.xlane.f32.xlu0 %v1751_v22  ;;  %v3626_v22 = vld [vmem:[%s5626_s18 + $0x8] sm:$0xff] }
0x2b74   :  { %v3629_v44 = vpack.c.bf16 %v3626_v22, %v3625_v11 }
0x2bf4   :  { %v3470_v52 = vpop.xlane.xlu1 %3469 }
0x2bf5   :  { %v3474_v53 = vmul.f32 0.03125, %v3470_v52  ;;  %v3868_v52 = vld [vmem:[%s5665_s24] ss:$0 sm:$0xff] }
0x2bf7   :  { %v3476_v59 = vadd.f32 1e-12, %v3474_v53 }
0x2bf8   :  { %v1750_v54 = vpop.xlane.xlu1 %1749  ;;  %v3473_v34 = vpop.xlane.xlu0 %3472 }
0x2bf9   :  { %4501 = vrsqrt.f32 %v3476_v59  ;;  %v1754_v55 = vmul.f32 0.03125, %v1750_v54  ;;  %v3475_v57 = vmul.f32 0.03125, %v3473_v34 }
0x2bfb   :  { %v1756_v60 = vadd.f32 1e-12, %v1754_v55  ;;  %v3477_v62 = vadd.f32 1e-12, %v3475_v57 }
0x2bfc   :  { %v1753_v58 = vpop.xlane.xlu0 %1752 }
0x2bfd   :  { %4503 = vrsqrt.f32 %v1756_v60  ;;  %v1755_v63 = vmul.f32 0.03125, %v1753_v58  ;;  %v3869_v60 = vld [vmem:[#allocation2] ss:$0 sm:$0xff] }
0x2bfe   :  { %4505 = vrsqrt.f32 %v3477_v62 }
0x2bff   :  { %v1757_v50 = vadd.f32 1e-12, %v1755_v63 }
0x2c01   :  { %4507 = vrsqrt.f32 %v1757_v50 }
0x2c06   :  { %v4502_v2 = vpop.eup %4501 }
0x2c07   :  { %v3480_v33 = vmul.f32 %v4502_v2, %v3464_v27 }
0x2c09   :  { %v3488_v8 = vmul.f32 %v3860_v47, %v3480_v33 }
0x2c0a   :  { %v4504_v6 = vpop.eup %4503 }
0x2c0b   :  { %v4506_v37 = vpop.eup %4505  ;;  %v1760_v35 = vmul.f32 %v4504_v6, %v1744_v29  ;;  %v3496_v15 = vadd.f32 %v3861_v12, %v3488_v8  ;;  %v3500_v29 = vld [vmem:[%s5625_s16] sm:$0xff] }
0x2c0c   :  { %v3481_v42 = vmul.f32 %v4506_v37, %v3465_v18  ;;  %v3501_v18 = vld [vmem:[%s5625_s16 + $0x8] sm:$0xff] }
0x2c0d   :  { %v1768_v16 = vmul.f32 %v3756_v9, %v1760_v35  ;;  %v3506_v21 = vpack.c.bf16 %v3496_v15, %v3496_v15  ;;  %v3504_v32 = vpack.c.bf16 %v3501_v18, %v3500_v29 }
0x2c0e   :  { %v4508_v13 = vpop.eup %4507  ;;  %v3489_v40 = vmul.f32 %v3860_v47, %v3481_v42 }
0x2c0f   :  { %v1761_v10 = vmul.f32 %v4508_v13, %v1745_v39  ;;  %v1776_v25 = vadd.f32 %v3757_v1, %v1768_v16  ;;  %v3517_v46 = vunpack.c.l.b16 %v3506_v21  ;;  %v3627_v39 = vld [vmem:[%s5626_s18 + $0x10] sm:$0xff] }
0x2c10   :  { %v3497_v17 = vadd.f32 %v3861_v12, %v3489_v40  ;;  %v3630_v61 = vpack.c.bf16 %v3628_v41, %v3627_v39 }
0x2c11   :  { %v1769_v19 = vmul.f32 %v3756_v9, %v1761_v10  ;;  %v3498_v7 = vpack.c.bf16 %v1776_v25, %v1776_v25 }
0x2c12   :  { %v3507_v23 = vpack.c.bf16 %v3497_v17, %v3497_v17  ;;  %4353 = vmatpush3.bf16.msra.mxu0 %v3630_v61 }
0x2c13   :  { %v1777_v24 = vadd.f32 %v3757_v1, %v1769_v19  ;;  %v3568_v36 = vunpack.c.l.b16 %v3498_v7  ;;  %4354 = vmatprep.subr.bf16.mxu0 %v4509_v14 }
0x2c14   :  { %v3518_v43 = vunpack.c.l.b16 %v3507_v23 }
0x2c15   :  { %v3499_v0 = vpack.c.bf16 %v1777_v24, %v1777_v24 }
0x2c16   :  { %v3519_v27 = vrot.slane %v3518_v43, 7  ;;  %4355 = vmatpush3.bf16.msra.mxu0 %v3629_v44 }
0x2c17   :  { %v3569_v28 = vunpack.c.l.b16 %v3499_v0 }
0x2c18   :  { %v3521_v3 = vsel %vm3520_vm6, %v3519_v27, %v3517_v46 }
0x2c19   :  { %v3522_v31 = vpack.c.b16 %v3521_v3, %v3521_v3  ;;  %v3570_v4 = vrot.slane %v3569_v28, 7 }
0x2c1b   :  { %4341 = vmatmul.mubr.msk.bf16.vlgmr.msra.gmra.mxu1 %vm73_vm0, %v3522_v31  ;;  %v3571_v38 = vsel %vm3520_vm6, %v3570_v4, %v3568_v36 }
0x2c1c   :  { %4345 = vmatpush3.bf16.msra.mxu1 %v3505_v30  ;;  %4348 = vmatprep.mubr.msk.bf16.mxu1 %vm4510_vm1, %v4509_v14  ;;  %v3572_v56 = vpack.c.b16 %v3571_v38, %v3571_v38 }
0x2c1d   :  { %4346 = vmatprep.subr.bf16.mxu1 %v4509_v14 }
0x2c20   :  { %4347 = vmatpush3.bf16.msra.mxu1 %v3504_v32 }
0x2c23   :  { %4349 = vmatmul.mubr.msk.bf16.vlgmr.msra.gmra.mxu1 %vm73_vm0, %v3572_v56 }
0x2cdb   :  { %v3560_v48 = vpop.f32.mrf.mxu1 }
0x2cdd   :  { %v4342_v5 = vpop.f32.mrf.mxu1 }
0x2cdf   :  { %v3563_v49 = vpop.f32.mrf.mxu1 }
0x2ce1   :  { %v4343_v51 = vpop.f32.mrf.mxu1 }
0x2ce3   :  { %v3610_v14 = vpop.f32.mrf.mxu1 }
0x2ce4   :  { %v3611_v53 = vadd.f32 %v3610_v14, %v3560_v48 }
0x2ce5   :  { %v4350_v59 = vpop.f32.mrf.mxu1 }
0x2ce6   :  { %v3623_v54 = vadd.f32 %v3868_v52, %v3611_v53 }
0x2ce7   :  { %v3613_v34 = vpop.f32.mrf.mxu1 }
0x2ce8   :  { %v3624_v55 = vpack.c.bf16 %v3623_v54, %v3623_v54 }
0x2ce9   :  { %v4351_v57 = vpop.f32.mrf.mxu1 }
0x2cea   :  { %4357 = vmatmul.mubr.msk.bf16.vlgmr.msra.gmra.mxu0 %vm73_vm0, %v3624_v55 }
0x2daa   :  { %v3675_v62 = vpop.f32.mrf.mxu0 }
0x2dab   :  { %v3676_v58 = vadd.f32 %v3869_v60, %v3675_v62 }
0x2dac   :  { %v4358_v63 = vpop.f32.mrf.mxu0 }
0x2dad   :  { %3682 = vst.msk [vmem:[%s5666_s9] sm:$0x3] %vm3681_vm7, %v3676_v58 }
0x2dae   :  { %v3678_v50 = vpop.f32.mrf.mxu0 }
0x2db0   :  { %v4359_v2 = vpop.f32.mrf.mxu0 }

</bundles_post_ra>
